<compile_context>
chip_gen: v6e
topology: v6e:2x2x1
jax: 0.10.0
libtpu: 0.0.40
codegen_flags: <defaults>
</compile_context>

<pallas_src>
import functools
import math

import jax
import jax.numpy as jnp
from jax.experimental import pallas as pl
from jax.experimental.pallas import tpu as pltpu


def _round_up(x, m):
    return ((x + m - 1) // m) * m


def _largest_chunk(T, bytes_per_step, cap):
    """Largest divisor Tc of T with Tc * bytes_per_step <= cap (min 1)."""
    best = 1
    for d in range(1, T + 1):
        if T % d == 0 and d * bytes_per_step <= cap:
            best = d
    return best


_GI_SCRATCH_CAP_BYTES = 8 << 20   # bound the hoisted-projection scratch (v7x: 64 MiB VMEM)


# ----------------------------------------------------------------------------
# Fused kernel: all GRU layers + fc + sigmoid, single invocation (no grid).
#   x_ref    : (T*B, H)       time-major, padded, flattened input (f32)
#   wih_ref  : (L, H, 3H)     per-layer W_ih^T (per-gate lane-aligned blocks r|z|n)
#   whh_ref  : (L, H, 3H)     per-layer W_hh^T
#   bih_ref  : (L, 1, 3H)     b_ih with b_hh folded in for the r and z gates (f32)
#   bhhn_ref : (L, 1, H)      n-gate b_hh (must stay separate: r * (h@Whh_n + b_hh_n))
#   wfc_ref  : (H, O)         fc weight^T
#   bfc_ref  : (1, O)
#   out_ref  : (T*B, O)
#   act_ref  : VMEM (T*B, H)  inter-layer activation slab
#   gi_ref   : VMEM (Tc*B, 3H) hoisted input-projection chunk
# B, H, O are padded (B % 8 == 0, H % 128 == 0, O % 128 == 0).
# ----------------------------------------------------------------------------
def _supervisor_kernel(x_ref, wih_ref, whh_ref, bih_ref, bhhn_ref,
                       wfc_ref, bfc_ref, out_ref, act_ref, gi_ref,
                       *, T, B, H, L, Tc, unroll):
    wdt = wfc_ref.dtype               # matmul operand dtype (bf16 by default)
    n_chunks = T // Tc

    for l in range(L):                # static unroll over layers
        # Layer 0 reads directly from x_ref (no prologue slab copy); deeper layers
        # read the previous layer's activations from act_ref.
        src = x_ref if l == 0 else act_ref
        # Hoisted broadcast (JAX does not CSE broadcast_in_dim inside the loop).
        bhhn_b = jnp.broadcast_to(bhhn_ref[l], (B, H))

        h = jnp.zeros((B, H), jnp.float32)
        for c in range(n_chunks):     # static chunking of the gi scratch over time
            coff = c * Tc * B
            # Hoisted input projection for Tc timesteps: one large MXU matmul with the
            # (folded) bias added once -- off the serial critical path.
            src_blk = src[pl.ds(coff, Tc * B), :]
            gi_ref[...] = (
                jnp.dot(src_blk.astype(wdt), wih_ref[l],
                        preferred_element_type=jnp.float32)
                + bih_ref[l]
            )

            def step(t, h, _l=l, _coff=coff, _bhhn=bhhn_b):
                off = pl.multiple_of(t * B, B)            # B is a multiple of 8
                gi_t = gi_ref[pl.ds(off, B), :]           # (B, 3H)
                # Serial-path matmul; weight ref indexed inside the loop keeps vreg
                # live ranges short.
                gh = jnp.dot(h.astype(wdt), whh_ref[_l],
                             preferred_element_type=jnp.float32)
                # PyTorch GRU gate order r, z, n; 128-lane-aligned static slices.
                r = jax.nn.sigmoid(gi_t[:, 0 * H:1 * H] + gh[:, 0 * H:1 * H])
                z = jax.nn.sigmoid(gi_t[:, 1 * H:2 * H] + gh[:, 1 * H:2 * H])
                n = jnp.tanh(gi_t[:, 2 * H:3 * H] + r * (gh[:, 2 * H:3 * H] + _bhhn))
                h_new = (1.0 - z) * n + z * h
                act_ref[pl.ds(_coff + off, B), :] = h_new
                return h_new

            h = jax.lax.fori_loop(0, Tc, step, h, unroll=unroll)

    # fc + sigmoid epilogue on the whole (T*B, H) slab; output is lane-dense.
    y = (jnp.dot(act_ref[...].astype(wdt), wfc_ref[...],
                 preferred_element_type=jnp.float32)
         + bfc_ref[...])
    out_ref[...] = jax.nn.sigmoid(y).astype(out_ref.dtype)


# ----------------------------------------------------------------------------
# Weight re-layout helpers (PyTorch convention -> per-gate, lane-padded).
# ----------------------------------------------------------------------------
def _pad_gate_matrix(w, H, Hp, dtype):
    """w: (3H, H) PyTorch [r;z;n] rows -> (Hp, 3*Hp) transposed, per-gate lane-padded."""
    gates = []
    for g in range(3):
        wg_t = jnp.transpose(w[g * H:(g + 1) * H, :])                    # (H, H)
        gates.append(jnp.zeros((Hp, Hp), jnp.float32).at[:H, :H].set(wg_t))
    return jnp.concatenate(gates, axis=1).astype(dtype)                  # (Hp, 3*Hp)


def _pack_biases(b_ih, b_hh, H, Hp):
    """Fold b_hh into b_ih for the r and z gates; keep the n-gate's b_hh separate."""
    parts = []
    for g in range(3):
        bg = b_ih[g * H:(g + 1) * H]
        if g < 2:
            bg = bg + b_hh[g * H:(g + 1) * H]
        parts.append(jnp.zeros((Hp,), jnp.float32).at[:H].set(bg))
    bih_packed = jnp.concatenate(parts).reshape(1, 3 * Hp)               # (1, 3Hp)
    bhh_n = jnp.zeros((Hp,), jnp.float32).at[:H].set(b_hh[2 * H:3 * H]).reshape(1, Hp)
    return bih_packed, bhh_n


# ----------------------------------------------------------------------------
# Public forward (batch_first, like the PyTorch module).
# ----------------------------------------------------------------------------
@functools.partial(jax.jit, static_argnames=("weight_dtype",))
def supervisor_forward(x_bth, params, weight_dtype=jnp.bfloat16):
    """x_bth: (B, T, hidden_dim). Supervisor: input_dim == hidden_dim == output_dim."""
    B, T, Hin = x_bth.shape
    H = params["gru_layers"][0]["w_hh"].shape[1]
    O = params["fc_w"].shape[0]
    assert Hin == H, "Supervisor uses input_dim == hidden_dim"
    L = len(params["gru_layers"])

    Bp = _round_up(max(B, 8), 8)          # sublane-aligned batch
    Hp = _round_up(max(H, 128), 128)      # lane-aligned hidden (per-gate blocks)
    Op = _round_up(max(O, 128), 128)      # lane-dense fc output

    # Time-major, padded, flattened to a lane/sublane-aligned 2-D slab.
    x_tbh = jnp.transpose(x_bth, (1, 0, 2)).astype(jnp.float32)          # (T, B, H)
    x2d = (jnp.zeros((T, Bp, Hp), jnp.float32)
           .at[:, :B, :H].set(x_tbh)
           .reshape(T * Bp, Hp))

    layers = params["gru_layers"]
    wih = jnp.stack([_pad_gate_matrix(l["w_ih"], H, Hp, weight_dtype) for l in layers])
    whh = jnp.stack([_pad_gate_matrix(l["w_hh"], H, Hp, weight_dtype) for l in layers])
    bias_pairs = [_pack_biases(l["b_ih"], l["b_hh"], H, Hp) for l in layers]
    bih = jnp.stack([p[0] for p in bias_pairs])                          # (L, 1, 3Hp) f32
    bhhn = jnp.stack([p[1] for p in bias_pairs])                         # (L, 1, Hp)  f32
    wfc = (jnp.zeros((Hp, Op), jnp.float32)
           .at[:H, :O].set(jnp.transpose(params["fc_w"]))
           .astype(weight_dtype))
    bfc = jnp.zeros((1, Op), jnp.float32).at[0, :O].set(params["fc_b"])

    # gi-scratch chunking over time (bounds the largest T-scaled buffer).
    gi_step_bytes = Bp * 3 * Hp * 4
    Tc = _largest_chunk(T, gi_step_bytes, _GI_SCRATCH_CAP_BYTES)
    unroll = min(Tc, 8)

    wbytes = jnp.dtype(weight_dtype).itemsize
    vmem_bytes = (
        T * Bp * Hp * 4                       # x slab
        + 2 * L * Hp * 3 * Hp * wbytes        # wih + whh stacks
        + L * 3 * Hp * 4 + L * Hp * 4         # biases
        + Hp * Op * wbytes + Op * 4           # fc weight + bias
        + T * Bp * Op * 4                     # out slab
        + T * Bp * Hp * 4                     # act scratch
        + Tc * Bp * 3 * Hp * 4                # gi scratch
    )
    vmem_limit = min(128 << 20, max(32 << 20, int(vmem_bytes * 3 // 2) + (2 << 20)))

    kernel = functools.partial(_supervisor_kernel, T=T, B=Bp, H=Hp, L=L,
                               Tc=Tc, unroll=unroll)

    vmem_spec = pl.BlockSpec(memory_space=pltpu.MemorySpace.VMEM)

    out2d = pl.pallas_call(
        kernel,
        out_shape=jax.ShapeDtypeStruct((T * Bp, Op), jnp.float32),
        in_specs=[vmem_spec] * 7,             # no grid -> single-buffered VMEM operands
        out_specs=vmem_spec,
        scratch_shapes=[
            pltpu.VMEM((T * Bp, Hp), jnp.float32),        # inter-layer activations
            pltpu.VMEM((Tc * Bp, 3 * Hp), jnp.float32),   # hoisted input projection
        ],
        compiler_params=pltpu.CompilerParams(vmem_limit_bytes=vmem_limit),
    )(x2d, wih, whh, bih, bhhn, wfc, bfc)

    out = out2d.reshape(T, Bp, Op)[:, :B, :O]
    return jnp.transpose(out, (1, 0, 2))                  # (B, T, output_dim)


# ----------------------------------------------------------------------------
# Parameter init (PyTorch nn.GRU / nn.Linear conventions, Supervisor sizing).
# ----------------------------------------------------------------------------
def init_supervisor_params(key, hidden_dim, n_layers):
    output_dim = hidden_dim                         # Supervisor: GRUNet(H, H, H, L)
    params = {"gru_layers": []}
    scale = 1.0 / math.sqrt(hidden_dim)
    for _ in range(n_layers):
        key, k1, k2, k3, k4 = jax.random.split(key, 5)
        params["gru_layers"].append({
            "w_ih": jax.random.uniform(k1, (3 * hidden_dim, hidden_dim),
                                       minval=-scale, maxval=scale, dtype=jnp.float32),
            "w_hh": jax.random.uniform(k2, (3 * hidden_dim, hidden_dim),
                                       minval=-scale, maxval=scale, dtype=jnp.float32),
            "b_ih": jax.random.uniform(k3, (3 * hidden_dim,),
                                       minval=-scale, maxval=scale, dtype=jnp.float32),
            "b_hh": jax.random.uniform(k4, (3 * hidden_dim,),
                                       minval=-scale, maxval=scale, dtype=jnp.float32),
        })
    key, k5, k6 = jax.random.split(key, 3)
    params["fc_w"] = jax.random.uniform(k5, (output_dim, hidden_dim),
                                        minval=-scale, maxval=scale, dtype=jnp.float32)
    params["fc_b"] = jax.random.uniform(k6, (output_dim,),
                                        minval=-scale, maxval=scale, dtype=jnp.float32)
    return params


# ----------------------------------------------------------------------------
# Pure-JAX reference (matches torch.nn.GRU semantics). `weight_dtype` lets us
# compare the kernel both against an identically-rounded bf16-weight model
# (tight tolerance) and against the exact f32 model (loose tolerance).
# ----------------------------------------------------------------------------
def _reference_forward(x_bth, params, weight_dtype=jnp.float32):
    wd = weight_dtype
    x = jnp.transpose(x_bth, (1, 0, 2)).astype(jnp.float32)   # (T, B, H)
    for layer in params["gru_layers"]:
        w_ih = layer["w_ih"].astype(wd)
        w_hh = layer["w_hh"].astype(wd)
        b_ih, b_hh = layer["b_ih"], layer["b_hh"]
        H = layer["w_hh"].shape[1]

        def step(h, x_t, w_ih=w_ih, w_hh=w_hh, b_ih=b_ih, b_hh=b_hh, H=H):
            gi = jnp.dot(x_t.astype(wd), w_ih.T, preferred_element_type=jnp.float32) + b_ih
            gh = jnp.dot(h.astype(wd), w_hh.T, preferred_element_type=jnp.float32) + b_hh
            r = jax.nn.sigmoid(gi[:, :H] + gh[:, :H])
            z = jax.nn.sigmoid(gi[:, H:2 * H] + gh[:, H:2 * H])
            n = jnp.tanh(gi[:, 2 * H:] + r * gh[:, 2 * H:])
            h_new = (1.0 - z) * n + z * h
            return h_new, h_new

        h0 = jnp.zeros((x.shape[1], H), jnp.float32)
        _, x = jax.lax.scan(step, h0, x)

    T_, B_, H_ = x.shape
    y = jnp.dot(x.reshape(T_ * B_, H_).astype(wd), params["fc_w"].astype(wd).T,
                preferred_element_type=jnp.float32).reshape(T_, B_, -1)
    y = jax.nn.sigmoid(y + params["fc_b"])
    return jnp.transpose(y, (1, 0, 2))


if __name__ == "__main__":
    B, T = 2, 8
    hidden_dim, n_layers = 32, 2

    key = jax.random.PRNGKey(0)
    k_x, k_p = jax.random.split(key)
    x = jax.random.normal(k_x, (B, T, hidden_dim), dtype=jnp.float32)
    params = init_supervisor_params(k_p, hidden_dim, n_layers)

    out = supervisor_forward(x, params)           # default perf config: bf16 weights
    jax.block_until_ready(out)
    assert out.shape == (B, T, hidden_dim)

    # Tight check vs a pure-JAX reference using the identical bf16 weight cast.
    ref_bf16 = _reference_forward(x, params, weight_dtype=jnp.bfloat16)
    assert jnp.max(jnp.abs(out - ref_bf16)) < 2e-3

    # Semantics check vs the exact f32 PyTorch-convention reference (looser:
    # bf16 weight rounding compounds through the recurrence).
    ref_f32 = _reference_forward(x, params, weight_dtype=jnp.float32)
    assert jnp.max(jnp.abs(out - ref_f32)) < 5e-2

    print("KERNEL_OK")
</pallas_src>

<mosaic_0001>
module attributes {stable_mosaic.version = 11 : i64} {
  func.func @_supervisor_kernel(%arg0: memref<64x128xf32, #tpu.memory_space<vmem>>, %arg1: memref<2x128x384xbf16, #tpu.memory_space<vmem>>, %arg2: memref<2x128x384xbf16, #tpu.memory_space<vmem>>, %arg3: memref<2x1x384xf32, #tpu.memory_space<vmem>>, %arg4: memref<2x1x128xf32, #tpu.memory_space<vmem>>, %arg5: memref<128x128xbf16, #tpu.memory_space<vmem>>, %arg6: memref<1x128xf32, #tpu.memory_space<vmem>>, %arg7: memref<64x128xf32, #tpu.memory_space<vmem>>, %arg8: memref<64x128xf32, #tpu.memory_space<vmem>>, %arg9: memref<64x384xf32, #tpu.memory_space<vmem>>) attributes {dimension_semantics = [], scalar_prefetch = 0 : i64, scratch_operands = 2 : i64, tpu.core_type = #tpu.core_type<tc>} {
    %c0 = arith.constant 0 : index
    %c0_0 = arith.constant 0 : index
    %c0_1 = arith.constant 0 : index
    %0 = vector.load %arg4[%c0, %c0_0, %c0_1] : memref<2x1x128xf32, #tpu.memory_space<vmem>>, vector<1x1x128xf32>
    %1 = vector.shape_cast %0 : vector<1x1x128xf32> to vector<1x128xf32>
    %2 = vector.shape_cast %1 : vector<1x128xf32> to vector<1x128xf32>
    %3 = vector.broadcast %2 : vector<1x128xf32> to vector<8x128xf32>
    %cst = arith.constant 0.000000e+00 : f32
    %4 = vector.broadcast %cst : f32 to vector<8x128xf32>
    %c0_2 = arith.constant 0 : index
    %c0_3 = arith.constant 0 : index
    %5 = vector.load %arg0[%c0_2, %c0_3] : memref<64x128xf32, #tpu.memory_space<vmem>>, vector<64x128xf32>
    %6 = arith.truncf %5 : vector<64x128xf32> to vector<64x128xbf16>
    %c0_4 = arith.constant 0 : index
    %c0_5 = arith.constant 0 : index
    %c0_6 = arith.constant 0 : index
    %7 = vector.load %arg1[%c0_4, %c0_5, %c0_6] : memref<2x128x384xbf16, #tpu.memory_space<vmem>>, vector<1x128x384xbf16>
    %8 = vector.shape_cast %7 : vector<1x128x384xbf16> to vector<128x384xbf16>
    %cst_7 = arith.constant dense<0.000000e+00> : vector<64x384xf32>
    %9 = tpu.matmul %6, %8, %cst_7 {dimension_numbers = #tpu.dot_dimension_numbers<[1], [0], [0], [1], [0, 0, 1, 1], [], []>} : vector<64x128xbf16>, vector<128x384xbf16>, vector<64x384xf32> -> vector<64x384xf32>
    %c0_8 = arith.constant 0 : index
    %c0_9 = arith.constant 0 : index
    %c0_10 = arith.constant 0 : index
    %10 = vector.load %arg3[%c0_8, %c0_9, %c0_10] : memref<2x1x384xf32, #tpu.memory_space<vmem>>, vector<1x1x384xf32>
    %11 = vector.shape_cast %10 : vector<1x1x384xf32> to vector<1x384xf32>
    %12 = vector.broadcast %11 : vector<1x384xf32> to vector<64x384xf32>
    %13 = arith.addf %9, %12 : vector<64x384xf32>
    %c0_11 = arith.constant 0 : index
    %c0_12 = arith.constant 0 : index
    %14 = vector.load %arg9[%c0_11, %c0_12] : memref<64x384xf32, #tpu.memory_space<vmem>>, vector<64x384xf32>
    tpu.vector_store %arg9[%c0_11, %c0_12], %13 {strides = array<i32>} : memref<64x384xf32, #tpu.memory_space<vmem>>, vector<64x384xf32>,
    %c0_i32 = arith.constant 0 : i32
    %c8_i32 = arith.constant 8 : i32
    %15 = arith.muli %c0_i32, %c8_i32 : i32
    %16 = tpu.assume_multiple %15, 8 : i32
    %17 = arith.index_cast %16 : i32 to index
    %c0_13 = arith.constant 0 : index
    %18 = vector.load %arg9[%17, %c0_13] : memref<64x384xf32, #tpu.memory_space<vmem>>, vector<8x384xf32>
    %19 = arith.truncf %4 : vector<8x128xf32> to vector<8x128xbf16>
    %c0_14 = arith.constant 0 : index
    %c0_15 = arith.constant 0 : index
    %c0_16 = arith.constant 0 : index
    %20 = vector.load %arg2[%c0_14, %c0_15, %c0_16] : memref<2x128x384xbf16, #tpu.memory_space<vmem>>, vector<1x128x384xbf16>
    %21 = vector.shape_cast %20 : vector<1x128x384xbf16> to vector<128x384xbf16>
    %cst_17 = arith.constant dense<0.000000e+00> : vector<8x384xf32>
    %22 = tpu.matmul %19, %21, %cst_17 {dimension_numbers = #tpu.dot_dimension_numbers<[1], [0], [0], [1], [0, 0, 1, 1], [], []>} : vector<8x128xbf16>, vector<128x384xbf16>, vector<8x384xf32> -> vector<8x384xf32>
    %23 = vector.extract_strided_slice %18 {offsets = [0, 0], sizes = [8, 128], strides = [1, 1]} : vector<8x384xf32> to vector<8x128xf32>
    %24 = vector.extract_strided_slice %22 {offsets = [0, 0], sizes = [8, 128], strides = [1, 1]} : vector<8x384xf32> to vector<8x128xf32>
    %25 = arith.addf %23, %24 : vector<8x128xf32>
    %26 = arith.negf %25 : vector<8x128xf32>
    %27 = math.exp %26 : vector<8x128xf32>
    %cst_18 = arith.constant 1.000000e+00 : f32
    %28 = vector.broadcast %cst_18 : f32 to vector<8x128xf32>
    %29 = arith.addf %28, %27 : vector<8x128xf32>
    %30 = arith.divf %28, %29 : vector<8x128xf32>
    %31 = vector.extract_strided_slice %18 {offsets = [0, 128], sizes = [8, 128], strides = [1, 1]} : vector<8x384xf32> to vector<8x128xf32>
    %32 = vector.extract_strided_slice %22 {offsets = [0, 128], sizes = [8, 128], strides = [1, 1]} : vector<8x384xf32> to vector<8x128xf32>
    %33 = arith.addf %31, %32 : vector<8x128xf32>
    %34 = arith.negf %33 : vector<8x128xf32>
    %35 = math.exp %34 : vector<8x128xf32>
    %cst_19 = arith.constant 1.000000e+00 : f32
    %36 = vector.broadcast %cst_19 : f32 to vector<8x128xf32>
    %37 = arith.addf %36, %35 : vector<8x128xf32>
    %38 = arith.divf %36, %37 : vector<8x128xf32>
    %39 = vector.extract_strided_slice %18 {offsets = [0, 256], sizes = [8, 128], strides = [1, 1]} : vector<8x384xf32> to vector<8x128xf32>
    %40 = vector.extract_strided_slice %22 {offsets = [0, 256], sizes = [8, 128], strides = [1, 1]} : vector<8x384xf32> to vector<8x128xf32>
    %41 = arith.addf %40, %3 : vector<8x128xf32>
    %42 = arith.mulf %30, %41 : vector<8x128xf32>
    %43 = arith.addf %39, %42 : vector<8x128xf32>
    %44 = math.tanh %43 : vector<8x128xf32>
    %cst_20 = arith.constant 1.000000e+00 : f32
    %45 = vector.broadcast %cst_20 : f32 to vector<8x128xf32>
    %46 = arith.subf %45, %38 : vector<8x128xf32>
    %47 = arith.mulf %46, %44 : vector<8x128xf32>
    %48 = arith.mulf %38, %4 : vector<8x128xf32>
    %49 = arith.addf %47, %48 : vector<8x128xf32>
    %c0_i32_21 = arith.constant 0 : i32
    %50 = arith.addi %c0_i32_21, %16 : i32
    %51 = arith.index_cast %50 : i32 to index
    %c0_22 = arith.constant 0 : index
    %52 = vector.load %arg8[%51, %c0_22] : memref<64x128xf32, #tpu.memory_space<vmem>>, vector<8x128xf32>
    tpu.vector_store %arg8[%51, %c0_22], %49 {strides = array<i32>} : memref<64x128xf32, #tpu.memory_space<vmem>>, vector<8x128xf32>,
    %c1_i32 = arith.constant 1 : i32
    %c8_i32_23 = arith.constant 8 : i32
    %53 = arith.muli %c1_i32, %c8_i32_23 : i32
    %54 = tpu.assume_multiple %53, 8 : i32
    %55 = arith.index_cast %54 : i32 to index
    %c0_24 = arith.constant 0 : index
    %56 = vector.load %arg9[%55, %c0_24] : memref<64x384xf32, #tpu.memory_space<vmem>>, vector<8x384xf32>
    %57 = arith.truncf %49 : vector<8x128xf32> to vector<8x128xbf16>
    %c0_25 = arith.constant 0 : index
    %c0_26 = arith.constant 0 : index
    %c0_27 = arith.constant 0 : index
    %58 = vector.load %arg2[%c0_25, %c0_26, %c0_27] : memref<2x128x384xbf16, #tpu.memory_space<vmem>>, vector<1x128x384xbf16>
    %59 = vector.shape_cast %58 : vector<1x128x384xbf16> to vector<128x384xbf16>
    %cst_28 = arith.constant dense<0.000000e+00> : vector<8x384xf32>
    %60 = tpu.matmul %57, %59, %cst_28 {dimension_numbers = #tpu.dot_dimension_numbers<[1], [0], [0], [1], [0, 0, 1, 1], [], []>} : vector<8x128xbf16>, vector<128x384xbf16>, vector<8x384xf32> -> vector<8x384xf32>
    %61 = vector.extract_strided_slice %56 {offsets = [0, 0], sizes = [8, 128], strides = [1, 1]} : vector<8x384xf32> to vector<8x128xf32>
    %62 = vector.extract_strided_slice %60 {offsets = [0, 0], sizes = [8, 128], strides = [1, 1]} : vector<8x384xf32> to vector<8x128xf32>
    %63 = arith.addf %61, %62 : vector<8x128xf32>
    %64 = arith.negf %63 : vector<8x128xf32>
    %65 = math.exp %64 : vector<8x128xf32>
    %cst_29 = arith.constant 1.000000e+00 : f32
    %66 = vector.broadcast %cst_29 : f32 to vector<8x128xf32>
    %67 = arith.addf %66, %65 : vector<8x128xf32>
    %68 = arith.divf %66, %67 : vector<8x128xf32>
    %69 = vector.extract_strided_slice %56 {offsets = [0, 128], sizes = [8, 128], strides = [1, 1]} : vector<8x384xf32> to vector<8x128xf32>
    %70 = vector.extract_strided_slice %60 {offsets = [0, 128], sizes = [8, 128], strides = [1, 1]} : vector<8x384xf32> to vector<8x128xf32>
    %71 = arith.addf %69, %70 : vector<8x128xf32>
    %72 = arith.negf %71 : vector<8x128xf32>
    %73 = math.exp %72 : vector<8x128xf32>
    %cst_30 = arith.constant 1.000000e+00 : f32
    %74 = vector.broadcast %cst_30 : f32 to vector<8x128xf32>
    %75 = arith.addf %74, %73 : vector<8x128xf32>
    %76 = arith.divf %74, %75 : vector<8x128xf32>
    %77 = vector.extract_strided_slice %56 {offsets = [0, 256], sizes = [8, 128], strides = [1, 1]} : vector<8x384xf32> to vector<8x128xf32>
    %78 = vector.extract_strided_slice %60 {offsets = [0, 256], sizes = [8, 128], strides = [1, 1]} : vector<8x384xf32> to vector<8x128xf32>
    %79 = arith.addf %78, %3 : vector<8x128xf32>
    %80 = arith.mulf %68, %79 : vector<8x128xf32>
    %81 = arith.addf %77, %80 : vector<8x128xf32>
    %82 = math.tanh %81 : vector<8x128xf32>
    %cst_31 = arith.constant 1.000000e+00 : f32
    %83 = vector.broadcast %cst_31 : f32 to vector<8x128xf32>
    %84 = arith.subf %83, %76 : vector<8x128xf32>
    %85 = arith.mulf %84, %82 : vector<8x128xf32>
    %86 = arith.mulf %76, %49 : vector<8x128xf32>
    %87 = arith.addf %85, %86 : vector<8x128xf32>
    %c0_i32_32 = arith.constant 0 : i32
    %88 = arith.addi %c0_i32_32, %54 : i32
    %89 = arith.index_cast %88 : i32 to index
    %c0_33 = arith.constant 0 : index
    %90 = vector.load %arg8[%89, %c0_33] : memref<64x128xf32, #tpu.memory_space<vmem>>, vector<8x128xf32>
    tpu.vector_store %arg8[%89, %c0_33], %87 {strides = array<i32>} : memref<64x128xf32, #tpu.memory_space<vmem>>, vector<8x128xf32>,
    %c2_i32 = arith.constant 2 : i32
    %c8_i32_34 = arith.constant 8 : i32
    %91 = arith.muli %c2_i32, %c8_i32_34 : i32
    %92 = tpu.assume_multiple %91, 8 : i32
    %93 = arith.index_cast %92 : i32 to index
    %c0_35 = arith.constant 0 : index
    %94 = vector.load %arg9[%93, %c0_35] : memref<64x384xf32, #tpu.memory_space<vmem>>, vector<8x384xf32>
    %95 = arith.truncf %87 : vector<8x128xf32> to vector<8x128xbf16>
    %c0_36 = arith.constant 0 : index
    %c0_37 = arith.constant 0 : index
    %c0_38 = arith.constant 0 : index
    %96 = vector.load %arg2[%c0_36, %c0_37, %c0_38] : memref<2x128x384xbf16, #tpu.memory_space<vmem>>, vector<1x128x384xbf16>
    %97 = vector.shape_cast %96 : vector<1x128x384xbf16> to vector<128x384xbf16>
    %cst_39 = arith.constant dense<0.000000e+00> : vector<8x384xf32>
    %98 = tpu.matmul %95, %97, %cst_39 {dimension_numbers = #tpu.dot_dimension_numbers<[1], [0], [0], [1], [0, 0, 1, 1], [], []>} : vector<8x128xbf16>, vector<128x384xbf16>, vector<8x384xf32> -> vector<8x384xf32>
    %99 = vector.extract_strided_slice %94 {offsets = [0, 0], sizes = [8, 128], strides = [1, 1]} : vector<8x384xf32> to vector<8x128xf32>
    %100 = vector.extract_strided_slice %98 {offsets = [0, 0], sizes = [8, 128], strides = [1, 1]} : vector<8x384xf32> to vector<8x128xf32>
    %101 = arith.addf %99, %100 : vector<8x128xf32>
    %102 = arith.negf %101 : vector<8x128xf32>
    %103 = math.exp %102 : vector<8x128xf32>
    %cst_40 = arith.constant 1.000000e+00 : f32
    %104 = vector.broadcast %cst_40 : f32 to vector<8x128xf32>
    %105 = arith.addf %104, %103 : vector<8x128xf32>
    %106 = arith.divf %104, %105 : vector<8x128xf32>
    %107 = vector.extract_strided_slice %94 {offsets = [0, 128], sizes = [8, 128], strides = [1, 1]} : vector<8x384xf32> to vector<8x128xf32>
    %108 = vector.extract_strided_slice %98 {offsets = [0, 128], sizes = [8, 128], strides = [1, 1]} : vector<8x384xf32> to vector<8x128xf32>
    %109 = arith.addf %107, %108 : vector<8x128xf32>
    %110 = arith.negf %109 : vector<8x128xf32>
    %111 = math.exp %110 : vector<8x128xf32>
    %cst_41 = arith.constant 1.000000e+00 : f32
    %112 = vector.broadcast %cst_41 : f32 to vector<8x128xf32>
    %113 = arith.addf %112, %111 : vector<8x128xf32>
    %114 = arith.divf %112, %113 : vector<8x128xf32>
    %115 = vector.extract_strided_slice %94 {offsets = [0, 256], sizes = [8, 128], strides = [1, 1]} : vector<8x384xf32> to vector<8x128xf32>
    %116 = vector.extract_strided_slice %98 {offsets = [0, 256], sizes = [8, 128], strides = [1, 1]} : vector<8x384xf32> to vector<8x128xf32>
    %117 = arith.addf %116, %3 : vector<8x128xf32>
    %118 = arith.mulf %106, %117 : vector<8x128xf32>
    %119 = arith.addf %115, %118 : vector<8x128xf32>
    %120 = math.tanh %119 : vector<8x128xf32>
    %cst_42 = arith.constant 1.000000e+00 : f32
    %121 = vector.broadcast %cst_42 : f32 to vector<8x128xf32>
    %122 = arith.subf %121, %114 : vector<8x128xf32>
    %123 = arith.mulf %122, %120 : vector<8x128xf32>
    %124 = arith.mulf %114, %87 : vector<8x128xf32>
    %125 = arith.addf %123, %124 : vector<8x128xf32>
    %c0_i32_43 = arith.constant 0 : i32
    %126 = arith.addi %c0_i32_43, %92 : i32
    %127 = arith.index_cast %126 : i32 to index
    %c0_44 = arith.constant 0 : index
    %128 = vector.load %arg8[%127, %c0_44] : memref<64x128xf32, #tpu.memory_space<vmem>>, vector<8x128xf32>
    tpu.vector_store %arg8[%127, %c0_44], %125 {strides = array<i32>} : memref<64x128xf32, #tpu.memory_space<vmem>>, vector<8x128xf32>,
    %c3_i32 = arith.constant 3 : i32
    %c8_i32_45 = arith.constant 8 : i32
    %129 = arith.muli %c3_i32, %c8_i32_45 : i32
    %130 = tpu.assume_multiple %129, 8 : i32
    %131 = arith.index_cast %130 : i32 to index
    %c0_46 = arith.constant 0 : index
    %132 = vector.load %arg9[%131, %c0_46] : memref<64x384xf32, #tpu.memory_space<vmem>>, vector<8x384xf32>
    %133 = arith.truncf %125 : vector<8x128xf32> to vector<8x128xbf16>
    %c0_47 = arith.constant 0 : index
    %c0_48 = arith.constant 0 : index
    %c0_49 = arith.constant 0 : index
    %134 = vector.load %arg2[%c0_47, %c0_48, %c0_49] : memref<2x128x384xbf16, #tpu.memory_space<vmem>>, vector<1x128x384xbf16>
    %135 = vector.shape_cast %134 : vector<1x128x384xbf16> to vector<128x384xbf16>
    %cst_50 = arith.constant dense<0.000000e+00> : vector<8x384xf32>
    %136 = tpu.matmul %133, %135, %cst_50 {dimension_numbers = #tpu.dot_dimension_numbers<[1], [0], [0], [1], [0, 0, 1, 1], [], []>} : vector<8x128xbf16>, vector<128x384xbf16>, vector<8x384xf32> -> vector<8x384xf32>
    %137 = vector.extract_strided_slice %132 {offsets = [0, 0], sizes = [8, 128], strides = [1, 1]} : vector<8x384xf32> to vector<8x128xf32>
    %138 = vector.extract_strided_slice %136 {offsets = [0, 0], sizes = [8, 128], strides = [1, 1]} : vector<8x384xf32> to vector<8x128xf32>
    %139 = arith.addf %137, %138 : vector<8x128xf32>
    %140 = arith.negf %139 : vector<8x128xf32>
    %141 = math.exp %140 : vector<8x128xf32>
    %cst_51 = arith.constant 1.000000e+00 : f32
    %142 = vector.broadcast %cst_51 : f32 to vector<8x128xf32>
    %143 = arith.addf %142, %141 : vector<8x128xf32>
    %144 = arith.divf %142, %143 : vector<8x128xf32>
    %145 = vector.extract_strided_slice %132 {offsets = [0, 128], sizes = [8, 128], strides = [1, 1]} : vector<8x384xf32> to vector<8x128xf32>
    %146 = vector.extract_strided_slice %136 {offsets = [0, 128], sizes = [8, 128], strides = [1, 1]} : vector<8x384xf32> to vector<8x128xf32>
    %147 = arith.addf %145, %146 : vector<8x128xf32>
    %148 = arith.negf %147 : vector<8x128xf32>
    %149 = math.exp %148 : vector<8x128xf32>
    %cst_52 = arith.constant 1.000000e+00 : f32
    %150 = vector.broadcast %cst_52 : f32 to vector<8x128xf32>
    %151 = arith.addf %150, %149 : vector<8x128xf32>
    %152 = arith.divf %150, %151 : vector<8x128xf32>
    %153 = vector.extract_strided_slice %132 {offsets = [0, 256], sizes = [8, 128], strides = [1, 1]} : vector<8x384xf32> to vector<8x128xf32>
    %154 = vector.extract_strided_slice %136 {offsets = [0, 256], sizes = [8, 128], strides = [1, 1]} : vector<8x384xf32> to vector<8x128xf32>
    %155 = arith.addf %154, %3 : vector<8x128xf32>
    %156 = arith.mulf %144, %155 : vector<8x128xf32>
    %157 = arith.addf %153, %156 : vector<8x128xf32>
    %158 = math.tanh %157 : vector<8x128xf32>
    %cst_53 = arith.constant 1.000000e+00 : f32
    %159 = vector.broadcast %cst_53 : f32 to vector<8x128xf32>
    %160 = arith.subf %159, %152 : vector<8x128xf32>
    %161 = arith.mulf %160, %158 : vector<8x128xf32>
    %162 = arith.mulf %152, %125 : vector<8x128xf32>
    %163 = arith.addf %161, %162 : vector<8x128xf32>
    %c0_i32_54 = arith.constant 0 : i32
    %164 = arith.addi %c0_i32_54, %130 : i32
    %165 = arith.index_cast %164 : i32 to index
    %c0_55 = arith.constant 0 : index
    %166 = vector.load %arg8[%165, %c0_55] : memref<64x128xf32, #tpu.memory_space<vmem>>, vector<8x128xf32>
    tpu.vector_store %arg8[%165, %c0_55], %163 {strides = array<i32>} : memref<64x128xf32, #tpu.memory_space<vmem>>, vector<8x128xf32>,
    %c4_i32 = arith.constant 4 : i32
    %c8_i32_56 = arith.constant 8 : i32
    %167 = arith.muli %c4_i32, %c8_i32_56 : i32
    %168 = tpu.assume_multiple %167, 8 : i32
    %169 = arith.index_cast %168 : i32 to index
    %c0_57 = arith.constant 0 : index
    %170 = vector.load %arg9[%169, %c0_57] : memref<64x384xf32, #tpu.memory_space<vmem>>, vector<8x384xf32>
    %171 = arith.truncf %163 : vector<8x128xf32> to vector<8x128xbf16>
    %c0_58 = arith.constant 0 : index
    %c0_59 = arith.constant 0 : index
    %c0_60 = arith.constant 0 : index
    %172 = vector.load %arg2[%c0_58, %c0_59, %c0_60] : memref<2x128x384xbf16, #tpu.memory_space<vmem>>, vector<1x128x384xbf16>
    %173 = vector.shape_cast %172 : vector<1x128x384xbf16> to vector<128x384xbf16>
    %cst_61 = arith.constant dense<0.000000e+00> : vector<8x384xf32>
    %174 = tpu.matmul %171, %173, %cst_61 {dimension_numbers = #tpu.dot_dimension_numbers<[1], [0], [0], [1], [0, 0, 1, 1], [], []>} : vector<8x128xbf16>, vector<128x384xbf16>, vector<8x384xf32> -> vector<8x384xf32>
    %175 = vector.extract_strided_slice %170 {offsets = [0, 0], sizes = [8, 128], strides = [1, 1]} : vector<8x384xf32> to vector<8x128xf32>
    %176 = vector.extract_strided_slice %174 {offsets = [0, 0], sizes = [8, 128], strides = [1, 1]} : vector<8x384xf32> to vector<8x128xf32>
    %177 = arith.addf %175, %176 : vector<8x128xf32>
    %178 = arith.negf %177 : vector<8x128xf32>
    %179 = math.exp %178 : vector<8x128xf32>
    %cst_62 = arith.constant 1.000000e+00 : f32
    %180 = vector.broadcast %cst_62 : f32 to vector<8x128xf32>
    %181 = arith.addf %180, %179 : vector<8x128xf32>
    %182 = arith.divf %180, %181 : vector<8x128xf32>
    %183 = vector.extract_strided_slice %170 {offsets = [0, 128], sizes = [8, 128], strides = [1, 1]} : vector<8x384xf32> to vector<8x128xf32>
    %184 = vector.extract_strided_slice %174 {offsets = [0, 128], sizes = [8, 128], strides = [1, 1]} : vector<8x384xf32> to vector<8x128xf32>
    %185 = arith.addf %183, %184 : vector<8x128xf32>
    %186 = arith.negf %185 : vector<8x128xf32>
    %187 = math.exp %186 : vector<8x128xf32>
    %cst_63 = arith.constant 1.000000e+00 : f32
    %188 = vector.broadcast %cst_63 : f32 to vector<8x128xf32>
    %189 = arith.addf %188, %187 : vector<8x128xf32>
    %190 = arith.divf %188, %189 : vector<8x128xf32>
    %191 = vector.extract_strided_slice %170 {offsets = [0, 256], sizes = [8, 128], strides = [1, 1]} : vector<8x384xf32> to vector<8x128xf32>
    %192 = vector.extract_strided_slice %174 {offsets = [0, 256], sizes = [8, 128], strides = [1, 1]} : vector<8x384xf32> to vector<8x128xf32>
    %193 = arith.addf %192, %3 : vector<8x128xf32>
    %194 = arith.mulf %182, %193 : vector<8x128xf32>
    %195 = arith.addf %191, %194 : vector<8x128xf32>
    %196 = math.tanh %195 : vector<8x128xf32>
    %cst_64 = arith.constant 1.000000e+00 : f32
    %197 = vector.broadcast %cst_64 : f32 to vector<8x128xf32>
    %198 = arith.subf %197, %190 : vector<8x128xf32>
    %199 = arith.mulf %198, %196 : vector<8x128xf32>
    %200 = arith.mulf %190, %163 : vector<8x128xf32>
    %201 = arith.addf %199, %200 : vector<8x128xf32>
    %c0_i32_65 = arith.constant 0 : i32
    %202 = arith.addi %c0_i32_65, %168 : i32
    %203 = arith.index_cast %202 : i32 to index
    %c0_66 = arith.constant 0 : index
    %204 = vector.load %arg8[%203, %c0_66] : memref<64x128xf32, #tpu.memory_space<vmem>>, vector<8x128xf32>
    tpu.vector_store %arg8[%203, %c0_66], %201 {strides = array<i32>} : memref<64x128xf32, #tpu.memory_space<vmem>>, vector<8x128xf32>,
    %c5_i32 = arith.constant 5 : i32
    %c8_i32_67 = arith.constant 8 : i32
    %205 = arith.muli %c5_i32, %c8_i32_67 : i32
    %206 = tpu.assume_multiple %205, 8 : i32
    %207 = arith.index_cast %206 : i32 to index
    %c0_68 = arith.constant 0 : index
    %208 = vector.load %arg9[%207, %c0_68] : memref<64x384xf32, #tpu.memory_space<vmem>>, vector<8x384xf32>
    %209 = arith.truncf %201 : vector<8x128xf32> to vector<8x128xbf16>
    %c0_69 = arith.constant 0 : index
    %c0_70 = arith.constant 0 : index
    %c0_71 = arith.constant 0 : index
    %210 = vector.load %arg2[%c0_69, %c0_70, %c0_71] : memref<2x128x384xbf16, #tpu.memory_space<vmem>>, vector<1x128x384xbf16>
    %211 = vector.shape_cast %210 : vector<1x128x384xbf16> to vector<128x384xbf16>
    %cst_72 = arith.constant dense<0.000000e+00> : vector<8x384xf32>
    %212 = tpu.matmul %209, %211, %cst_72 {dimension_numbers = #tpu.dot_dimension_numbers<[1], [0], [0], [1], [0, 0, 1, 1], [], []>} : vector<8x128xbf16>, vector<128x384xbf16>, vector<8x384xf32> -> vector<8x384xf32>
    %213 = vector.extract_strided_slice %208 {offsets = [0, 0], sizes = [8, 128], strides = [1, 1]} : vector<8x384xf32> to vector<8x128xf32>
    %214 = vector.extract_strided_slice %212 {offsets = [0, 0], sizes = [8, 128], strides = [1, 1]} : vector<8x384xf32> to vector<8x128xf32>
    %215 = arith.addf %213, %214 : vector<8x128xf32>
    %216 = arith.negf %215 : vector<8x128xf32>
    %217 = math.exp %216 : vector<8x128xf32>
    %cst_73 = arith.constant 1.000000e+00 : f32
    %218 = vector.broadcast %cst_73 : f32 to vector<8x128xf32>
    %219 = arith.addf %218, %217 : vector<8x128xf32>
    %220 = arith.divf %218, %219 : vector<8x128xf32>
    %221 = vector.extract_strided_slice %208 {offsets = [0, 128], sizes = [8, 128], strides = [1, 1]} : vector<8x384xf32> to vector<8x128xf32>
    %222 = vector.extract_strided_slice %212 {offsets = [0, 128], sizes = [8, 128], strides = [1, 1]} : vector<8x384xf32> to vector<8x128xf32>
    %223 = arith.addf %221, %222 : vector<8x128xf32>
    %224 = arith.negf %223 : vector<8x128xf32>
    %225 = math.exp %224 : vector<8x128xf32>
    %cst_74 = arith.constant 1.000000e+00 : f32
    %226 = vector.broadcast %cst_74 : f32 to vector<8x128xf32>
    %227 = arith.addf %226, %225 : vector<8x128xf32>
    %228 = arith.divf %226, %227 : vector<8x128xf32>
    %229 = vector.extract_strided_slice %208 {offsets = [0, 256], sizes = [8, 128], strides = [1, 1]} : vector<8x384xf32> to vector<8x128xf32>
    %230 = vector.extract_strided_slice %212 {offsets = [0, 256], sizes = [8, 128], strides = [1, 1]} : vector<8x384xf32> to vector<8x128xf32>
    %231 = arith.addf %230, %3 : vector<8x128xf32>
    %232 = arith.mulf %220, %231 : vector<8x128xf32>
    %233 = arith.addf %229, %232 : vector<8x128xf32>
    %234 = math.tanh %233 : vector<8x128xf32>
    %cst_75 = arith.constant 1.000000e+00 : f32
    %235 = vector.broadcast %cst_75 : f32 to vector<8x128xf32>
    %236 = arith.subf %235, %228 : vector<8x128xf32>
    %237 = arith.mulf %236, %234 : vector<8x128xf32>
    %238 = arith.mulf %228, %201 : vector<8x128xf32>
    %239 = arith.addf %237, %238 : vector<8x128xf32>
    %c0_i32_76 = arith.constant 0 : i32
    %240 = arith.addi %c0_i32_76, %206 : i32
    %241 = arith.index_cast %240 : i32 to index
    %c0_77 = arith.constant 0 : index
    %242 = vector.load %arg8[%241, %c0_77] : memref<64x128xf32, #tpu.memory_space<vmem>>, vector<8x128xf32>
    tpu.vector_store %arg8[%241, %c0_77], %239 {strides = array<i32>} : memref<64x128xf32, #tpu.memory_space<vmem>>, vector<8x128xf32>,
    %c6_i32 = arith.constant 6 : i32
    %c8_i32_78 = arith.constant 8 : i32
    %243 = arith.muli %c6_i32, %c8_i32_78 : i32
    %244 = tpu.assume_multiple %243, 8 : i32
    %245 = arith.index_cast %244 : i32 to index
    %c0_79 = arith.constant 0 : index
    %246 = vector.load %arg9[%245, %c0_79] : memref<64x384xf32, #tpu.memory_space<vmem>>, vector<8x384xf32>
    %247 = arith.truncf %239 : vector<8x128xf32> to vector<8x128xbf16>
    %c0_80 = arith.constant 0 : index
    %c0_81 = arith.constant 0 : index
    %c0_82 = arith.constant 0 : index
    %248 = vector.load %arg2[%c0_80, %c0_81, %c0_82] : memref<2x128x384xbf16, #tpu.memory_space<vmem>>, vector<1x128x384xbf16>
    %249 = vector.shape_cast %248 : vector<1x128x384xbf16> to vector<128x384xbf16>
    %cst_83 = arith.constant dense<0.000000e+00> : vector<8x384xf32>
    %250 = tpu.matmul %247, %249, %cst_83 {dimension_numbers = #tpu.dot_dimension_numbers<[1], [0], [0], [1], [0, 0, 1, 1], [], []>} : vector<8x128xbf16>, vector<128x384xbf16>, vector<8x384xf32> -> vector<8x384xf32>
    %251 = vector.extract_strided_slice %246 {offsets = [0, 0], sizes = [8, 128], strides = [1, 1]} : vector<8x384xf32> to vector<8x128xf32>
    %252 = vector.extract_strided_slice %250 {offsets = [0, 0], sizes = [8, 128], strides = [1, 1]} : vector<8x384xf32> to vector<8x128xf32>
    %253 = arith.addf %251, %252 : vector<8x128xf32>
    %254 = arith.negf %253 : vector<8x128xf32>
    %255 = math.exp %254 : vector<8x128xf32>
    %cst_84 = arith.constant 1.000000e+00 : f32
    %256 = vector.broadcast %cst_84 : f32 to vector<8x128xf32>
    %257 = arith.addf %256, %255 : vector<8x128xf32>
    %258 = arith.divf %256, %257 : vector<8x128xf32>
    %259 = vector.extract_strided_slice %246 {offsets = [0, 128], sizes = [8, 128], strides = [1, 1]} : vector<8x384xf32> to vector<8x128xf32>
    %260 = vector.extract_strided_slice %250 {offsets = [0, 128], sizes = [8, 128], strides = [1, 1]} : vector<8x384xf32> to vector<8x128xf32>
    %261 = arith.addf %259, %260 : vector<8x128xf32>
    %262 = arith.negf %261 : vector<8x128xf32>
    %263 = math.exp %262 : vector<8x128xf32>
    %cst_85 = arith.constant 1.000000e+00 : f32
    %264 = vector.broadcast %cst_85 : f32 to vector<8x128xf32>
    %265 = arith.addf %264, %263 : vector<8x128xf32>
    %266 = arith.divf %264, %265 : vector<8x128xf32>
    %267 = vector.extract_strided_slice %246 {offsets = [0, 256], sizes = [8, 128], strides = [1, 1]} : vector<8x384xf32> to vector<8x128xf32>
    %268 = vector.extract_strided_slice %250 {offsets = [0, 256], sizes = [8, 128], strides = [1, 1]} : vector<8x384xf32> to vector<8x128xf32>
    %269 = arith.addf %268, %3 : vector<8x128xf32>
    %270 = arith.mulf %258, %269 : vector<8x128xf32>
    %271 = arith.addf %267, %270 : vector<8x128xf32>
    %272 = math.tanh %271 : vector<8x128xf32>
    %cst_86 = arith.constant 1.000000e+00 : f32
    %273 = vector.broadcast %cst_86 : f32 to vector<8x128xf32>
    %274 = arith.subf %273, %266 : vector<8x128xf32>
    %275 = arith.mulf %274, %272 : vector<8x128xf32>
    %276 = arith.mulf %266, %239 : vector<8x128xf32>
    %277 = arith.addf %275, %276 : vector<8x128xf32>
    %c0_i32_87 = arith.constant 0 : i32
    %278 = arith.addi %c0_i32_87, %244 : i32
    %279 = arith.index_cast %278 : i32 to index
    %c0_88 = arith.constant 0 : index
    %280 = vector.load %arg8[%279, %c0_88] : memref<64x128xf32, #tpu.memory_space<vmem>>, vector<8x128xf32>
    tpu.vector_store %arg8[%279, %c0_88], %277 {strides = array<i32>} : memref<64x128xf32, #tpu.memory_space<vmem>>, vector<8x128xf32>,
    %c7_i32 = arith.constant 7 : i32
    %c8_i32_89 = arith.constant 8 : i32
    %281 = arith.muli %c7_i32, %c8_i32_89 : i32
    %282 = tpu.assume_multiple %281, 8 : i32
    %283 = arith.index_cast %282 : i32 to index
    %c0_90 = arith.constant 0 : index
    %284 = vector.load %arg9[%283, %c0_90] : memref<64x384xf32, #tpu.memory_space<vmem>>, vector<8x384xf32>
    %285 = arith.truncf %277 : vector<8x128xf32> to vector<8x128xbf16>
    %c0_91 = arith.constant 0 : index
    %c0_92 = arith.constant 0 : index
    %c0_93 = arith.constant 0 : index
    %286 = vector.load %arg2[%c0_91, %c0_92, %c0_93] : memref<2x128x384xbf16, #tpu.memory_space<vmem>>, vector<1x128x384xbf16>
    %287 = vector.shape_cast %286 : vector<1x128x384xbf16> to vector<128x384xbf16>
    %cst_94 = arith.constant dense<0.000000e+00> : vector<8x384xf32>
    %288 = tpu.matmul %285, %287, %cst_94 {dimension_numbers = #tpu.dot_dimension_numbers<[1], [0], [0], [1], [0, 0, 1, 1], [], []>} : vector<8x128xbf16>, vector<128x384xbf16>, vector<8x384xf32> -> vector<8x384xf32>
    %289 = vector.extract_strided_slice %284 {offsets = [0, 0], sizes = [8, 128], strides = [1, 1]} : vector<8x384xf32> to vector<8x128xf32>
    %290 = vector.extract_strided_slice %288 {offsets = [0, 0], sizes = [8, 128], strides = [1, 1]} : vector<8x384xf32> to vector<8x128xf32>
    %291 = arith.addf %289, %290 : vector<8x128xf32>
    %292 = arith.negf %291 : vector<8x128xf32>
    %293 = math.exp %292 : vector<8x128xf32>
    %cst_95 = arith.constant 1.000000e+00 : f32
    %294 = vector.broadcast %cst_95 : f32 to vector<8x128xf32>
    %295 = arith.addf %294, %293 : vector<8x128xf32>
    %296 = arith.divf %294, %295 : vector<8x128xf32>
    %297 = vector.extract_strided_slice %284 {offsets = [0, 128], sizes = [8, 128], strides = [1, 1]} : vector<8x384xf32> to vector<8x128xf32>
    %298 = vector.extract_strided_slice %288 {offsets = [0, 128], sizes = [8, 128], strides = [1, 1]} : vector<8x384xf32> to vector<8x128xf32>
    %299 = arith.addf %297, %298 : vector<8x128xf32>
    %300 = arith.negf %299 : vector<8x128xf32>
    %301 = math.exp %300 : vector<8x128xf32>
    %cst_96 = arith.constant 1.000000e+00 : f32
    %302 = vector.broadcast %cst_96 : f32 to vector<8x128xf32>
    %303 = arith.addf %302, %301 : vector<8x128xf32>
    %304 = arith.divf %302, %303 : vector<8x128xf32>
    %305 = vector.extract_strided_slice %284 {offsets = [0, 256], sizes = [8, 128], strides = [1, 1]} : vector<8x384xf32> to vector<8x128xf32>
    %306 = vector.extract_strided_slice %288 {offsets = [0, 256], sizes = [8, 128], strides = [1, 1]} : vector<8x384xf32> to vector<8x128xf32>
    %307 = arith.addf %306, %3 : vector<8x128xf32>
    %308 = arith.mulf %296, %307 : vector<8x128xf32>
    %309 = arith.addf %305, %308 : vector<8x128xf32>
    %310 = math.tanh %309 : vector<8x128xf32>
    %cst_97 = arith.constant 1.000000e+00 : f32
    %311 = vector.broadcast %cst_97 : f32 to vector<8x128xf32>
    %312 = arith.subf %311, %304 : vector<8x128xf32>
    %313 = arith.mulf %312, %310 : vector<8x128xf32>
    %314 = arith.mulf %304, %277 : vector<8x128xf32>
    %315 = arith.addf %313, %314 : vector<8x128xf32>
    %c0_i32_98 = arith.constant 0 : i32
    %316 = arith.addi %c0_i32_98, %282 : i32
    %317 = arith.index_cast %316 : i32 to index
    %c0_99 = arith.constant 0 : index
    %318 = vector.load %arg8[%317, %c0_99] : memref<64x128xf32, #tpu.memory_space<vmem>>, vector<8x128xf32>
    tpu.vector_store %arg8[%317, %c0_99], %315 {strides = array<i32>} : memref<64x128xf32, #tpu.memory_space<vmem>>, vector<8x128xf32>,
    %c8_i32_100 = arith.constant 8 : i32
    %c1 = arith.constant 1 : index
    %c0_101 = arith.constant 0 : index
    %c0_102 = arith.constant 0 : index
    %319 = vector.load %arg4[%c1, %c0_101, %c0_102] : memref<2x1x128xf32, #tpu.memory_space<vmem>>, vector<1x1x128xf32>
    %320 = vector.shape_cast %319 : vector<1x1x128xf32> to vector<1x128xf32>
    %321 = vector.shape_cast %320 : vector<1x128xf32> to vector<1x128xf32>
    %322 = vector.broadcast %321 : vector<1x128xf32> to vector<8x128xf32>
    %cst_103 = arith.constant 0.000000e+00 : f32
    %323 = vector.broadcast %cst_103 : f32 to vector<8x128xf32>
    %c0_104 = arith.constant 0 : index
    %c0_105 = arith.constant 0 : index
    %324 = vector.load %arg8[%c0_104, %c0_105] : memref<64x128xf32, #tpu.memory_space<vmem>>, vector<64x128xf32>
    %325 = arith.truncf %324 : vector<64x128xf32> to vector<64x128xbf16>
    %c1_106 = arith.constant 1 : index
    %c0_107 = arith.constant 0 : index
    %c0_108 = arith.constant 0 : index
    %326 = vector.load %arg1[%c1_106, %c0_107, %c0_108] : memref<2x128x384xbf16, #tpu.memory_space<vmem>>, vector<1x128x384xbf16>
    %327 = vector.shape_cast %326 : vector<1x128x384xbf16> to vector<128x384xbf16>
    %cst_109 = arith.constant dense<0.000000e+00> : vector<64x384xf32>
    %328 = tpu.matmul %325, %327, %cst_109 {dimension_numbers = #tpu.dot_dimension_numbers<[1], [0], [0], [1], [0, 0, 1, 1], [], []>} : vector<64x128xbf16>, vector<128x384xbf16>, vector<64x384xf32> -> vector<64x384xf32>
    %c1_110 = arith.constant 1 : index
    %c0_111 = arith.constant 0 : index
    %c0_112 = arith.constant 0 : index
    %329 = vector.load %arg3[%c1_110, %c0_111, %c0_112] : memref<2x1x384xf32, #tpu.memory_space<vmem>>, vector<1x1x384xf32>
    %330 = vector.shape_cast %329 : vector<1x1x384xf32> to vector<1x384xf32>
    %331 = vector.broadcast %330 : vector<1x384xf32> to vector<64x384xf32>
    %332 = arith.addf %328, %331 : vector<64x384xf32>
    %c0_113 = arith.constant 0 : index
    %c0_114 = arith.constant 0 : index
    %333 = vector.load %arg9[%c0_113, %c0_114] : memref<64x384xf32, #tpu.memory_space<vmem>>, vector<64x384xf32>
    tpu.vector_store %arg9[%c0_113, %c0_114], %332 {strides = array<i32>} : memref<64x384xf32, #tpu.memory_space<vmem>>, vector<64x384xf32>,
    %c0_i32_115 = arith.constant 0 : i32
    %c8_i32_116 = arith.constant 8 : i32
    %334 = arith.muli %c0_i32_115, %c8_i32_116 : i32
    %335 = tpu.assume_multiple %334, 8 : i32
    %336 = arith.index_cast %335 : i32 to index
    %c0_117 = arith.constant 0 : index
    %337 = vector.load %arg9[%336, %c0_117] : memref<64x384xf32, #tpu.memory_space<vmem>>, vector<8x384xf32>
    %338 = arith.truncf %323 : vector<8x128xf32> to vector<8x128xbf16>
    %c1_118 = arith.constant 1 : index
    %c0_119 = arith.constant 0 : index
    %c0_120 = arith.constant 0 : index
    %339 = vector.load %arg2[%c1_118, %c0_119, %c0_120] : memref<2x128x384xbf16, #tpu.memory_space<vmem>>, vector<1x128x384xbf16>
    %340 = vector.shape_cast %339 : vector<1x128x384xbf16> to vector<128x384xbf16>
    %cst_121 = arith.constant dense<0.000000e+00> : vector<8x384xf32>
    %341 = tpu.matmul %338, %340, %cst_121 {dimension_numbers = #tpu.dot_dimension_numbers<[1], [0], [0], [1], [0, 0, 1, 1], [], []>} : vector<8x128xbf16>, vector<128x384xbf16>, vector<8x384xf32> -> vector<8x384xf32>
    %342 = vector.extract_strided_slice %337 {offsets = [0, 0], sizes = [8, 128], strides = [1, 1]} : vector<8x384xf32> to vector<8x128xf32>
    %343 = vector.extract_strided_slice %341 {offsets = [0, 0], sizes = [8, 128], strides = [1, 1]} : vector<8x384xf32> to vector<8x128xf32>
    %344 = arith.addf %342, %343 : vector<8x128xf32>
    %345 = arith.negf %344 : vector<8x128xf32>
    %346 = math.exp %345 : vector<8x128xf32>
    %cst_122 = arith.constant 1.000000e+00 : f32
    %347 = vector.broadcast %cst_122 : f32 to vector<8x128xf32>
    %348 = arith.addf %347, %346 : vector<8x128xf32>
    %349 = arith.divf %347, %348 : vector<8x128xf32>
    %350 = vector.extract_strided_slice %337 {offsets = [0, 128], sizes = [8, 128], strides = [1, 1]} : vector<8x384xf32> to vector<8x128xf32>
    %351 = vector.extract_strided_slice %341 {offsets = [0, 128], sizes = [8, 128], strides = [1, 1]} : vector<8x384xf32> to vector<8x128xf32>
    %352 = arith.addf %350, %351 : vector<8x128xf32>
    %353 = arith.negf %352 : vector<8x128xf32>
    %354 = math.exp %353 : vector<8x128xf32>
    %cst_123 = arith.constant 1.000000e+00 : f32
    %355 = vector.broadcast %cst_123 : f32 to vector<8x128xf32>
    %356 = arith.addf %355, %354 : vector<8x128xf32>
    %357 = arith.divf %355, %356 : vector<8x128xf32>
    %358 = vector.extract_strided_slice %337 {offsets = [0, 256], sizes = [8, 128], strides = [1, 1]} : vector<8x384xf32> to vector<8x128xf32>
    %359 = vector.extract_strided_slice %341 {offsets = [0, 256], sizes = [8, 128], strides = [1, 1]} : vector<8x384xf32> to vector<8x128xf32>
    %360 = arith.addf %359, %322 : vector<8x128xf32>
    %361 = arith.mulf %349, %360 : vector<8x128xf32>
    %362 = arith.addf %358, %361 : vector<8x128xf32>
    %363 = math.tanh %362 : vector<8x128xf32>
    %cst_124 = arith.constant 1.000000e+00 : f32
    %364 = vector.broadcast %cst_124 : f32 to vector<8x128xf32>
    %365 = arith.subf %364, %357 : vector<8x128xf32>
    %366 = arith.mulf %365, %363 : vector<8x128xf32>
    %367 = arith.mulf %357, %323 : vector<8x128xf32>
    %368 = arith.addf %366, %367 : vector<8x128xf32>
    %c0_i32_125 = arith.constant 0 : i32
    %369 = arith.addi %c0_i32_125, %335 : i32
    %370 = arith.index_cast %369 : i32 to index
    %c0_126 = arith.constant 0 : index
    %371 = vector.load %arg8[%370, %c0_126] : memref<64x128xf32, #tpu.memory_space<vmem>>, vector<8x128xf32>
    tpu.vector_store %arg8[%370, %c0_126], %368 {strides = array<i32>} : memref<64x128xf32, #tpu.memory_space<vmem>>, vector<8x128xf32>,
    %c1_i32_127 = arith.constant 1 : i32
    %c8_i32_128 = arith.constant 8 : i32
    %372 = arith.muli %c1_i32_127, %c8_i32_128 : i32
    %373 = tpu.assume_multiple %372, 8 : i32
    %374 = arith.index_cast %373 : i32 to index
    %c0_129 = arith.constant 0 : index
    %375 = vector.load %arg9[%374, %c0_129] : memref<64x384xf32, #tpu.memory_space<vmem>>, vector<8x384xf32>
    %376 = arith.truncf %368 : vector<8x128xf32> to vector<8x128xbf16>
    %c1_130 = arith.constant 1 : index
    %c0_131 = arith.constant 0 : index
    %c0_132 = arith.constant 0 : index
    %377 = vector.load %arg2[%c1_130, %c0_131, %c0_132] : memref<2x128x384xbf16, #tpu.memory_space<vmem>>, vector<1x128x384xbf16>
    %378 = vector.shape_cast %377 : vector<1x128x384xbf16> to vector<128x384xbf16>
    %cst_133 = arith.constant dense<0.000000e+00> : vector<8x384xf32>
    %379 = tpu.matmul %376, %378, %cst_133 {dimension_numbers = #tpu.dot_dimension_numbers<[1], [0], [0], [1], [0, 0, 1, 1], [], []>} : vector<8x128xbf16>, vector<128x384xbf16>, vector<8x384xf32> -> vector<8x384xf32>
    %380 = vector.extract_strided_slice %375 {offsets = [0, 0], sizes = [8, 128], strides = [1, 1]} : vector<8x384xf32> to vector<8x128xf32>
    %381 = vector.extract_strided_slice %379 {offsets = [0, 0], sizes = [8, 128], strides = [1, 1]} : vector<8x384xf32> to vector<8x128xf32>
    %382 = arith.addf %380, %381 : vector<8x128xf32>
    %383 = arith.negf %382 : vector<8x128xf32>
    %384 = math.exp %383 : vector<8x128xf32>
    %cst_134 = arith.constant 1.000000e+00 : f32
    %385 = vector.broadcast %cst_134 : f32 to vector<8x128xf32>
    %386 = arith.addf %385, %384 : vector<8x128xf32>
    %387 = arith.divf %385, %386 : vector<8x128xf32>
    %388 = vector.extract_strided_slice %375 {offsets = [0, 128], sizes = [8, 128], strides = [1, 1]} : vector<8x384xf32> to vector<8x128xf32>
    %389 = vector.extract_strided_slice %379 {offsets = [0, 128], sizes = [8, 128], strides = [1, 1]} : vector<8x384xf32> to vector<8x128xf32>
    %390 = arith.addf %388, %389 : vector<8x128xf32>
    %391 = arith.negf %390 : vector<8x128xf32>
    %392 = math.exp %391 : vector<8x128xf32>
    %cst_135 = arith.constant 1.000000e+00 : f32
    %393 = vector.broadcast %cst_135 : f32 to vector<8x128xf32>
    %394 = arith.addf %393, %392 : vector<8x128xf32>
    %395 = arith.divf %393, %394 : vector<8x128xf32>
    %396 = vector.extract_strided_slice %375 {offsets = [0, 256], sizes = [8, 128], strides = [1, 1]} : vector<8x384xf32> to vector<8x128xf32>
    %397 = vector.extract_strided_slice %379 {offsets = [0, 256], sizes = [8, 128], strides = [1, 1]} : vector<8x384xf32> to vector<8x128xf32>
    %398 = arith.addf %397, %322 : vector<8x128xf32>
    %399 = arith.mulf %387, %398 : vector<8x128xf32>
    %400 = arith.addf %396, %399 : vector<8x128xf32>
    %401 = math.tanh %400 : vector<8x128xf32>
    %cst_136 = arith.constant 1.000000e+00 : f32
    %402 = vector.broadcast %cst_136 : f32 to vector<8x128xf32>
    %403 = arith.subf %402, %395 : vector<8x128xf32>
    %404 = arith.mulf %403, %401 : vector<8x128xf32>
    %405 = arith.mulf %395, %368 : vector<8x128xf32>
    %406 = arith.addf %404, %405 : vector<8x128xf32>
    %c0_i32_137 = arith.constant 0 : i32
    %407 = arith.addi %c0_i32_137, %373 : i32
    %408 = arith.index_cast %407 : i32 to index
    %c0_138 = arith.constant 0 : index
    %409 = vector.load %arg8[%408, %c0_138] : memref<64x128xf32, #tpu.memory_space<vmem>>, vector<8x128xf32>
    tpu.vector_store %arg8[%408, %c0_138], %406 {strides = array<i32>} : memref<64x128xf32, #tpu.memory_space<vmem>>, vector<8x128xf32>,
    %c2_i32_139 = arith.constant 2 : i32
    %c8_i32_140 = arith.constant 8 : i32
    %410 = arith.muli %c2_i32_139, %c8_i32_140 : i32
    %411 = tpu.assume_multiple %410, 8 : i32
    %412 = arith.index_cast %411 : i32 to index
    %c0_141 = arith.constant 0 : index
    %413 = vector.load %arg9[%412, %c0_141] : memref<64x384xf32, #tpu.memory_space<vmem>>, vector<8x384xf32>
    %414 = arith.truncf %406 : vector<8x128xf32> to vector<8x128xbf16>
    %c1_142 = arith.constant 1 : index
    %c0_143 = arith.constant 0 : index
    %c0_144 = arith.constant 0 : index
    %415 = vector.load %arg2[%c1_142, %c0_143, %c0_144] : memref<2x128x384xbf16, #tpu.memory_space<vmem>>, vector<1x128x384xbf16>
    %416 = vector.shape_cast %415 : vector<1x128x384xbf16> to vector<128x384xbf16>
    %cst_145 = arith.constant dense<0.000000e+00> : vector<8x384xf32>
    %417 = tpu.matmul %414, %416, %cst_145 {dimension_numbers = #tpu.dot_dimension_numbers<[1], [0], [0], [1], [0, 0, 1, 1], [], []>} : vector<8x128xbf16>, vector<128x384xbf16>, vector<8x384xf32> -> vector<8x384xf32>
    %418 = vector.extract_strided_slice %413 {offsets = [0, 0], sizes = [8, 128], strides = [1, 1]} : vector<8x384xf32> to vector<8x128xf32>
    %419 = vector.extract_strided_slice %417 {offsets = [0, 0], sizes = [8, 128], strides = [1, 1]} : vector<8x384xf32> to vector<8x128xf32>
    %420 = arith.addf %418, %419 : vector<8x128xf32>
    %421 = arith.negf %420 : vector<8x128xf32>
    %422 = math.exp %421 : vector<8x128xf32>
    %cst_146 = arith.constant 1.000000e+00 : f32
    %423 = vector.broadcast %cst_146 : f32 to vector<8x128xf32>
    %424 = arith.addf %423, %422 : vector<8x128xf32>
    %425 = arith.divf %423, %424 : vector<8x128xf32>
    %426 = vector.extract_strided_slice %413 {offsets = [0, 128], sizes = [8, 128], strides = [1, 1]} : vector<8x384xf32> to vector<8x128xf32>
    %427 = vector.extract_strided_slice %417 {offsets = [0, 128], sizes = [8, 128], strides = [1, 1]} : vector<8x384xf32> to vector<8x128xf32>
    %428 = arith.addf %426, %427 : vector<8x128xf32>
    %429 = arith.negf %428 : vector<8x128xf32>
    %430 = math.exp %429 : vector<8x128xf32>
    %cst_147 = arith.constant 1.000000e+00 : f32
    %431 = vector.broadcast %cst_147 : f32 to vector<8x128xf32>
    %432 = arith.addf %431, %430 : vector<8x128xf32>
    %433 = arith.divf %431, %432 : vector<8x128xf32>
    %434 = vector.extract_strided_slice %413 {offsets = [0, 256], sizes = [8, 128], strides = [1, 1]} : vector<8x384xf32> to vector<8x128xf32>
    %435 = vector.extract_strided_slice %417 {offsets = [0, 256], sizes = [8, 128], strides = [1, 1]} : vector<8x384xf32> to vector<8x128xf32>
    %436 = arith.addf %435, %322 : vector<8x128xf32>
    %437 = arith.mulf %425, %436 : vector<8x128xf32>
    %438 = arith.addf %434, %437 : vector<8x128xf32>
    %439 = math.tanh %438 : vector<8x128xf32>
    %cst_148 = arith.constant 1.000000e+00 : f32
    %440 = vector.broadcast %cst_148 : f32 to vector<8x128xf32>
    %441 = arith.subf %440, %433 : vector<8x128xf32>
    %442 = arith.mulf %441, %439 : vector<8x128xf32>
    %443 = arith.mulf %433, %406 : vector<8x128xf32>
    %444 = arith.addf %442, %443 : vector<8x128xf32>
    %c0_i32_149 = arith.constant 0 : i32
    %445 = arith.addi %c0_i32_149, %411 : i32
    %446 = arith.index_cast %445 : i32 to index
    %c0_150 = arith.constant 0 : index
    %447 = vector.load %arg8[%446, %c0_150] : memref<64x128xf32, #tpu.memory_space<vmem>>, vector<8x128xf32>
    tpu.vector_store %arg8[%446, %c0_150], %444 {strides = array<i32>} : memref<64x128xf32, #tpu.memory_space<vmem>>, vector<8x128xf32>,
    %c3_i32_151 = arith.constant 3 : i32
    %c8_i32_152 = arith.constant 8 : i32
    %448 = arith.muli %c3_i32_151, %c8_i32_152 : i32
    %449 = tpu.assume_multiple %448, 8 : i32
    %450 = arith.index_cast %449 : i32 to index
    %c0_153 = arith.constant 0 : index
    %451 = vector.load %arg9[%450, %c0_153] : memref<64x384xf32, #tpu.memory_space<vmem>>, vector<8x384xf32>
    %452 = arith.truncf %444 : vector<8x128xf32> to vector<8x128xbf16>
    %c1_154 = arith.constant 1 : index
    %c0_155 = arith.constant 0 : index
    %c0_156 = arith.constant 0 : index
    %453 = vector.load %arg2[%c1_154, %c0_155, %c0_156] : memref<2x128x384xbf16, #tpu.memory_space<vmem>>, vector<1x128x384xbf16>
    %454 = vector.shape_cast %453 : vector<1x128x384xbf16> to vector<128x384xbf16>
    %cst_157 = arith.constant dense<0.000000e+00> : vector<8x384xf32>
    %455 = tpu.matmul %452, %454, %cst_157 {dimension_numbers = #tpu.dot_dimension_numbers<[1], [0], [0], [1], [0, 0, 1, 1], [], []>} : vector<8x128xbf16>, vector<128x384xbf16>, vector<8x384xf32> -> vector<8x384xf32>
    %456 = vector.extract_strided_slice %451 {offsets = [0, 0], sizes = [8, 128], strides = [1, 1]} : vector<8x384xf32> to vector<8x128xf32>
    %457 = vector.extract_strided_slice %455 {offsets = [0, 0], sizes = [8, 128], strides = [1, 1]} : vector<8x384xf32> to vector<8x128xf32>
    %458 = arith.addf %456, %457 : vector<8x128xf32>
    %459 = arith.negf %458 : vector<8x128xf32>
    %460 = math.exp %459 : vector<8x128xf32>
    %cst_158 = arith.constant 1.000000e+00 : f32
    %461 = vector.broadcast %cst_158 : f32 to vector<8x128xf32>
    %462 = arith.addf %461, %460 : vector<8x128xf32>
    %463 = arith.divf %461, %462 : vector<8x128xf32>
    %464 = vector.extract_strided_slice %451 {offsets = [0, 128], sizes = [8, 128], strides = [1, 1]} : vector<8x384xf32> to vector<8x128xf32>
    %465 = vector.extract_strided_slice %455 {offsets = [0, 128], sizes = [8, 128], strides = [1, 1]} : vector<8x384xf32> to vector<8x128xf32>
    %466 = arith.addf %464, %465 : vector<8x128xf32>
    %467 = arith.negf %466 : vector<8x128xf32>
    %468 = math.exp %467 : vector<8x128xf32>
    %cst_159 = arith.constant 1.000000e+00 : f32
    %469 = vector.broadcast %cst_159 : f32 to vector<8x128xf32>
    %470 = arith.addf %469, %468 : vector<8x128xf32>
    %471 = arith.divf %469, %470 : vector<8x128xf32>
    %472 = vector.extract_strided_slice %451 {offsets = [0, 256], sizes = [8, 128], strides = [1, 1]} : vector<8x384xf32> to vector<8x128xf32>
    %473 = vector.extract_strided_slice %455 {offsets = [0, 256], sizes = [8, 128], strides = [1, 1]} : vector<8x384xf32> to vector<8x128xf32>
    %474 = arith.addf %473, %322 : vector<8x128xf32>
    %475 = arith.mulf %463, %474 : vector<8x128xf32>
    %476 = arith.addf %472, %475 : vector<8x128xf32>
    %477 = math.tanh %476 : vector<8x128xf32>
    %cst_160 = arith.constant 1.000000e+00 : f32
    %478 = vector.broadcast %cst_160 : f32 to vector<8x128xf32>
    %479 = arith.subf %478, %471 : vector<8x128xf32>
    %480 = arith.mulf %479, %477 : vector<8x128xf32>
    %481 = arith.mulf %471, %444 : vector<8x128xf32>
    %482 = arith.addf %480, %481 : vector<8x128xf32>
    %c0_i32_161 = arith.constant 0 : i32
    %483 = arith.addi %c0_i32_161, %449 : i32
    %484 = arith.index_cast %483 : i32 to index
    %c0_162 = arith.constant 0 : index
    %485 = vector.load %arg8[%484, %c0_162] : memref<64x128xf32, #tpu.memory_space<vmem>>, vector<8x128xf32>
    tpu.vector_store %arg8[%484, %c0_162], %482 {strides = array<i32>} : memref<64x128xf32, #tpu.memory_space<vmem>>, vector<8x128xf32>,
    %c4_i32_163 = arith.constant 4 : i32
    %c8_i32_164 = arith.constant 8 : i32
    %486 = arith.muli %c4_i32_163, %c8_i32_164 : i32
    %487 = tpu.assume_multiple %486, 8 : i32
    %488 = arith.index_cast %487 : i32 to index
    %c0_165 = arith.constant 0 : index
    %489 = vector.load %arg9[%488, %c0_165] : memref<64x384xf32, #tpu.memory_space<vmem>>, vector<8x384xf32>
    %490 = arith.truncf %482 : vector<8x128xf32> to vector<8x128xbf16>
    %c1_166 = arith.constant 1 : index
    %c0_167 = arith.constant 0 : index
    %c0_168 = arith.constant 0 : index
    %491 = vector.load %arg2[%c1_166, %c0_167, %c0_168] : memref<2x128x384xbf16, #tpu.memory_space<vmem>>, vector<1x128x384xbf16>
    %492 = vector.shape_cast %491 : vector<1x128x384xbf16> to vector<128x384xbf16>
    %cst_169 = arith.constant dense<0.000000e+00> : vector<8x384xf32>
    %493 = tpu.matmul %490, %492, %cst_169 {dimension_numbers = #tpu.dot_dimension_numbers<[1], [0], [0], [1], [0, 0, 1, 1], [], []>} : vector<8x128xbf16>, vector<128x384xbf16>, vector<8x384xf32> -> vector<8x384xf32>
    %494 = vector.extract_strided_slice %489 {offsets = [0, 0], sizes = [8, 128], strides = [1, 1]} : vector<8x384xf32> to vector<8x128xf32>
    %495 = vector.extract_strided_slice %493 {offsets = [0, 0], sizes = [8, 128], strides = [1, 1]} : vector<8x384xf32> to vector<8x128xf32>
    %496 = arith.addf %494, %495 : vector<8x128xf32>
    %497 = arith.negf %496 : vector<8x128xf32>
    %498 = math.exp %497 : vector<8x128xf32>
    %cst_170 = arith.constant 1.000000e+00 : f32
    %499 = vector.broadcast %cst_170 : f32 to vector<8x128xf32>
    %500 = arith.addf %499, %498 : vector<8x128xf32>
    %501 = arith.divf %499, %500 : vector<8x128xf32>
    %502 = vector.extract_strided_slice %489 {offsets = [0, 128], sizes = [8, 128], strides = [1, 1]} : vector<8x384xf32> to vector<8x128xf32>
    %503 = vector.extract_strided_slice %493 {offsets = [0, 128], sizes = [8, 128], strides = [1, 1]} : vector<8x384xf32> to vector<8x128xf32>
    %504 = arith.addf %502, %503 : vector<8x128xf32>
    %505 = arith.negf %504 : vector<8x128xf32>
    %506 = math.exp %505 : vector<8x128xf32>
    %cst_171 = arith.constant 1.000000e+00 : f32
    %507 = vector.broadcast %cst_171 : f32 to vector<8x128xf32>
    %508 = arith.addf %507, %506 : vector<8x128xf32>
    %509 = arith.divf %507, %508 : vector<8x128xf32>
    %510 = vector.extract_strided_slice %489 {offsets = [0, 256], sizes = [8, 128], strides = [1, 1]} : vector<8x384xf32> to vector<8x128xf32>
    %511 = vector.extract_strided_slice %493 {offsets = [0, 256], sizes = [8, 128], strides = [1, 1]} : vector<8x384xf32> to vector<8x128xf32>
    %512 = arith.addf %511, %322 : vector<8x128xf32>
    %513 = arith.mulf %501, %512 : vector<8x128xf32>
    %514 = arith.addf %510, %513 : vector<8x128xf32>
    %515 = math.tanh %514 : vector<8x128xf32>
    %cst_172 = arith.constant 1.000000e+00 : f32
    %516 = vector.broadcast %cst_172 : f32 to vector<8x128xf32>
    %517 = arith.subf %516, %509 : vector<8x128xf32>
    %518 = arith.mulf %517, %515 : vector<8x128xf32>
    %519 = arith.mulf %509, %482 : vector<8x128xf32>
    %520 = arith.addf %518, %519 : vector<8x128xf32>
    %c0_i32_173 = arith.constant 0 : i32
    %521 = arith.addi %c0_i32_173, %487 : i32
    %522 = arith.index_cast %521 : i32 to index
    %c0_174 = arith.constant 0 : index
    %523 = vector.load %arg8[%522, %c0_174] : memref<64x128xf32, #tpu.memory_space<vmem>>, vector<8x128xf32>
    tpu.vector_store %arg8[%522, %c0_174], %520 {strides = array<i32>} : memref<64x128xf32, #tpu.memory_space<vmem>>, vector<8x128xf32>,
    %c5_i32_175 = arith.constant 5 : i32
    %c8_i32_176 = arith.constant 8 : i32
    %524 = arith.muli %c5_i32_175, %c8_i32_176 : i32
    %525 = tpu.assume_multiple %524, 8 : i32
    %526 = arith.index_cast %525 : i32 to index
    %c0_177 = arith.constant 0 : index
    %527 = vector.load %arg9[%526, %c0_177] : memref<64x384xf32, #tpu.memory_space<vmem>>, vector<8x384xf32>
    %528 = arith.truncf %520 : vector<8x128xf32> to vector<8x128xbf16>
    %c1_178 = arith.constant 1 : index
    %c0_179 = arith.constant 0 : index
    %c0_180 = arith.constant 0 : index
    %529 = vector.load %arg2[%c1_178, %c0_179, %c0_180] : memref<2x128x384xbf16, #tpu.memory_space<vmem>>, vector<1x128x384xbf16>
    %530 = vector.shape_cast %529 : vector<1x128x384xbf16> to vector<128x384xbf16>
    %cst_181 = arith.constant dense<0.000000e+00> : vector<8x384xf32>
    %531 = tpu.matmul %528, %530, %cst_181 {dimension_numbers = #tpu.dot_dimension_numbers<[1], [0], [0], [1], [0, 0, 1, 1], [], []>} : vector<8x128xbf16>, vector<128x384xbf16>, vector<8x384xf32> -> vector<8x384xf32>
    %532 = vector.extract_strided_slice %527 {offsets = [0, 0], sizes = [8, 128], strides = [1, 1]} : vector<8x384xf32> to vector<8x128xf32>
    %533 = vector.extract_strided_slice %531 {offsets = [0, 0], sizes = [8, 128], strides = [1, 1]} : vector<8x384xf32> to vector<8x128xf32>
    %534 = arith.addf %532, %533 : vector<8x128xf32>
    %535 = arith.negf %534 : vector<8x128xf32>
    %536 = math.exp %535 : vector<8x128xf32>
    %cst_182 = arith.constant 1.000000e+00 : f32
    %537 = vector.broadcast %cst_182 : f32 to vector<8x128xf32>
    %538 = arith.addf %537, %536 : vector<8x128xf32>
    %539 = arith.divf %537, %538 : vector<8x128xf32>
    %540 = vector.extract_strided_slice %527 {offsets = [0, 128], sizes = [8, 128], strides = [1, 1]} : vector<8x384xf32> to vector<8x128xf32>
    %541 = vector.extract_strided_slice %531 {offsets = [0, 128], sizes = [8, 128], strides = [1, 1]} : vector<8x384xf32> to vector<8x128xf32>
    %542 = arith.addf %540, %541 : vector<8x128xf32>
    %543 = arith.negf %542 : vector<8x128xf32>
    %544 = math.exp %543 : vector<8x128xf32>
    %cst_183 = arith.constant 1.000000e+00 : f32
    %545 = vector.broadcast %cst_183 : f32 to vector<8x128xf32>
    %546 = arith.addf %545, %544 : vector<8x128xf32>
    %547 = arith.divf %545, %546 : vector<8x128xf32>
    %548 = vector.extract_strided_slice %527 {offsets = [0, 256], sizes = [8, 128], strides = [1, 1]} : vector<8x384xf32> to vector<8x128xf32>
    %549 = vector.extract_strided_slice %531 {offsets = [0, 256], sizes = [8, 128], strides = [1, 1]} : vector<8x384xf32> to vector<8x128xf32>
    %550 = arith.addf %549, %322 : vector<8x128xf32>
    %551 = arith.mulf %539, %550 : vector<8x128xf32>
    %552 = arith.addf %548, %551 : vector<8x128xf32>
    %553 = math.tanh %552 : vector<8x128xf32>
    %cst_184 = arith.constant 1.000000e+00 : f32
    %554 = vector.broadcast %cst_184 : f32 to vector<8x128xf32>
    %555 = arith.subf %554, %547 : vector<8x128xf32>
    %556 = arith.mulf %555, %553 : vector<8x128xf32>
    %557 = arith.mulf %547, %520 : vector<8x128xf32>
    %558 = arith.addf %556, %557 : vector<8x128xf32>
    %c0_i32_185 = arith.constant 0 : i32
    %559 = arith.addi %c0_i32_185, %525 : i32
    %560 = arith.index_cast %559 : i32 to index
    %c0_186 = arith.constant 0 : index
    %561 = vector.load %arg8[%560, %c0_186] : memref<64x128xf32, #tpu.memory_space<vmem>>, vector<8x128xf32>
    tpu.vector_store %arg8[%560, %c0_186], %558 {strides = array<i32>} : memref<64x128xf32, #tpu.memory_space<vmem>>, vector<8x128xf32>,
    %c6_i32_187 = arith.constant 6 : i32
    %c8_i32_188 = arith.constant 8 : i32
    %562 = arith.muli %c6_i32_187, %c8_i32_188 : i32
    %563 = tpu.assume_multiple %562, 8 : i32
    %564 = arith.index_cast %563 : i32 to index
    %c0_189 = arith.constant 0 : index
    %565 = vector.load %arg9[%564, %c0_189] : memref<64x384xf32, #tpu.memory_space<vmem>>, vector<8x384xf32>
    %566 = arith.truncf %558 : vector<8x128xf32> to vector<8x128xbf16>
    %c1_190 = arith.constant 1 : index
    %c0_191 = arith.constant 0 : index
    %c0_192 = arith.constant 0 : index
    %567 = vector.load %arg2[%c1_190, %c0_191, %c0_192] : memref<2x128x384xbf16, #tpu.memory_space<vmem>>, vector<1x128x384xbf16>
    %568 = vector.shape_cast %567 : vector<1x128x384xbf16> to vector<128x384xbf16>
    %cst_193 = arith.constant dense<0.000000e+00> : vector<8x384xf32>
    %569 = tpu.matmul %566, %568, %cst_193 {dimension_numbers = #tpu.dot_dimension_numbers<[1], [0], [0], [1], [0, 0, 1, 1], [], []>} : vector<8x128xbf16>, vector<128x384xbf16>, vector<8x384xf32> -> vector<8x384xf32>
    %570 = vector.extract_strided_slice %565 {offsets = [0, 0], sizes = [8, 128], strides = [1, 1]} : vector<8x384xf32> to vector<8x128xf32>
    %571 = vector.extract_strided_slice %569 {offsets = [0, 0], sizes = [8, 128], strides = [1, 1]} : vector<8x384xf32> to vector<8x128xf32>
    %572 = arith.addf %570, %571 : vector<8x128xf32>
    %573 = arith.negf %572 : vector<8x128xf32>
    %574 = math.exp %573 : vector<8x128xf32>
    %cst_194 = arith.constant 1.000000e+00 : f32
    %575 = vector.broadcast %cst_194 : f32 to vector<8x128xf32>
    %576 = arith.addf %575, %574 : vector<8x128xf32>
    %577 = arith.divf %575, %576 : vector<8x128xf32>
    %578 = vector.extract_strided_slice %565 {offsets = [0, 128], sizes = [8, 128], strides = [1, 1]} : vector<8x384xf32> to vector<8x128xf32>
    %579 = vector.extract_strided_slice %569 {offsets = [0, 128], sizes = [8, 128], strides = [1, 1]} : vector<8x384xf32> to vector<8x128xf32>
    %580 = arith.addf %578, %579 : vector<8x128xf32>
    %581 = arith.negf %580 : vector<8x128xf32>
    %582 = math.exp %581 : vector<8x128xf32>
    %cst_195 = arith.constant 1.000000e+00 : f32
    %583 = vector.broadcast %cst_195 : f32 to vector<8x128xf32>
    %584 = arith.addf %583, %582 : vector<8x128xf32>
    %585 = arith.divf %583, %584 : vector<8x128xf32>
    %586 = vector.extract_strided_slice %565 {offsets = [0, 256], sizes = [8, 128], strides = [1, 1]} : vector<8x384xf32> to vector<8x128xf32>
    %587 = vector.extract_strided_slice %569 {offsets = [0, 256], sizes = [8, 128], strides = [1, 1]} : vector<8x384xf32> to vector<8x128xf32>
    %588 = arith.addf %587, %322 : vector<8x128xf32>
    %589 = arith.mulf %577, %588 : vector<8x128xf32>
    %590 = arith.addf %586, %589 : vector<8x128xf32>
    %591 = math.tanh %590 : vector<8x128xf32>
    %cst_196 = arith.constant 1.000000e+00 : f32
    %592 = vector.broadcast %cst_196 : f32 to vector<8x128xf32>
    %593 = arith.subf %592, %585 : vector<8x128xf32>
    %594 = arith.mulf %593, %591 : vector<8x128xf32>
    %595 = arith.mulf %585, %558 : vector<8x128xf32>
    %596 = arith.addf %594, %595 : vector<8x128xf32>
    %c0_i32_197 = arith.constant 0 : i32
    %597 = arith.addi %c0_i32_197, %563 : i32
    %598 = arith.index_cast %597 : i32 to index
    %c0_198 = arith.constant 0 : index
    %599 = vector.load %arg8[%598, %c0_198] : memref<64x128xf32, #tpu.memory_space<vmem>>, vector<8x128xf32>
    tpu.vector_store %arg8[%598, %c0_198], %596 {strides = array<i32>} : memref<64x128xf32, #tpu.memory_space<vmem>>, vector<8x128xf32>,
    %c7_i32_199 = arith.constant 7 : i32
    %c8_i32_200 = arith.constant 8 : i32
    %600 = arith.muli %c7_i32_199, %c8_i32_200 : i32
    %601 = tpu.assume_multiple %600, 8 : i32
    %602 = arith.index_cast %601 : i32 to index
    %c0_201 = arith.constant 0 : index
    %603 = vector.load %arg9[%602, %c0_201] : memref<64x384xf32, #tpu.memory_space<vmem>>, vector<8x384xf32>
    %604 = arith.truncf %596 : vector<8x128xf32> to vector<8x128xbf16>
    %c1_202 = arith.constant 1 : index
    %c0_203 = arith.constant 0 : index
    %c0_204 = arith.constant 0 : index
    %605 = vector.load %arg2[%c1_202, %c0_203, %c0_204] : memref<2x128x384xbf16, #tpu.memory_space<vmem>>, vector<1x128x384xbf16>
    %606 = vector.shape_cast %605 : vector<1x128x384xbf16> to vector<128x384xbf16>
    %cst_205 = arith.constant dense<0.000000e+00> : vector<8x384xf32>
    %607 = tpu.matmul %604, %606, %cst_205 {dimension_numbers = #tpu.dot_dimension_numbers<[1], [0], [0], [1], [0, 0, 1, 1], [], []>} : vector<8x128xbf16>, vector<128x384xbf16>, vector<8x384xf32> -> vector<8x384xf32>
    %608 = vector.extract_strided_slice %603 {offsets = [0, 0], sizes = [8, 128], strides = [1, 1]} : vector<8x384xf32> to vector<8x128xf32>
    %609 = vector.extract_strided_slice %607 {offsets = [0, 0], sizes = [8, 128], strides = [1, 1]} : vector<8x384xf32> to vector<8x128xf32>
    %610 = arith.addf %608, %609 : vector<8x128xf32>
    %611 = arith.negf %610 : vector<8x128xf32>
    %612 = math.exp %611 : vector<8x128xf32>
    %cst_206 = arith.constant 1.000000e+00 : f32
    %613 = vector.broadcast %cst_206 : f32 to vector<8x128xf32>
    %614 = arith.addf %613, %612 : vector<8x128xf32>
    %615 = arith.divf %613, %614 : vector<8x128xf32>
    %616 = vector.extract_strided_slice %603 {offsets = [0, 128], sizes = [8, 128], strides = [1, 1]} : vector<8x384xf32> to vector<8x128xf32>
    %617 = vector.extract_strided_slice %607 {offsets = [0, 128], sizes = [8, 128], strides = [1, 1]} : vector<8x384xf32> to vector<8x128xf32>
    %618 = arith.addf %616, %617 : vector<8x128xf32>
    %619 = arith.negf %618 : vector<8x128xf32>
    %620 = math.exp %619 : vector<8x128xf32>
    %cst_207 = arith.constant 1.000000e+00 : f32
    %621 = vector.broadcast %cst_207 : f32 to vector<8x128xf32>
    %622 = arith.addf %621, %620 : vector<8x128xf32>
    %623 = arith.divf %621, %622 : vector<8x128xf32>
    %624 = vector.extract_strided_slice %603 {offsets = [0, 256], sizes = [8, 128], strides = [1, 1]} : vector<8x384xf32> to vector<8x128xf32>
    %625 = vector.extract_strided_slice %607 {offsets = [0, 256], sizes = [8, 128], strides = [1, 1]} : vector<8x384xf32> to vector<8x128xf32>
    %626 = arith.addf %625, %322 : vector<8x128xf32>
    %627 = arith.mulf %615, %626 : vector<8x128xf32>
    %628 = arith.addf %624, %627 : vector<8x128xf32>
    %629 = math.tanh %628 : vector<8x128xf32>
    %cst_208 = arith.constant 1.000000e+00 : f32
    %630 = vector.broadcast %cst_208 : f32 to vector<8x128xf32>
    %631 = arith.subf %630, %623 : vector<8x128xf32>
    %632 = arith.mulf %631, %629 : vector<8x128xf32>
    %633 = arith.mulf %623, %596 : vector<8x128xf32>
    %634 = arith.addf %632, %633 : vector<8x128xf32>
    %c0_i32_209 = arith.constant 0 : i32
    %635 = arith.addi %c0_i32_209, %601 : i32
    %636 = arith.index_cast %635 : i32 to index
    %c0_210 = arith.constant 0 : index
    %637 = vector.load %arg8[%636, %c0_210] : memref<64x128xf32, #tpu.memory_space<vmem>>, vector<8x128xf32>
    tpu.vector_store %arg8[%636, %c0_210], %634 {strides = array<i32>} : memref<64x128xf32, #tpu.memory_space<vmem>>, vector<8x128xf32>,
    %c8_i32_211 = arith.constant 8 : i32
    %c0_212 = arith.constant 0 : index
    %c0_213 = arith.constant 0 : index
    %638 = vector.load %arg8[%c0_212, %c0_213] : memref<64x128xf32, #tpu.memory_space<vmem>>, vector<64x128xf32>
    %639 = arith.truncf %638 : vector<64x128xf32> to vector<64x128xbf16>
    %c0_214 = arith.constant 0 : index
    %c0_215 = arith.constant 0 : index
    %640 = vector.load %arg5[%c0_214, %c0_215] : memref<128x128xbf16, #tpu.memory_space<vmem>>, vector<128x128xbf16>
    %cst_216 = arith.constant dense<0.000000e+00> : vector<64x128xf32>
    %641 = tpu.matmul %639, %640, %cst_216 {dimension_numbers = #tpu.dot_dimension_numbers<[1], [0], [0], [1], [0, 0, 1, 1], [], []>} : vector<64x128xbf16>, vector<128x128xbf16>, vector<64x128xf32> -> vector<64x128xf32>
    %c0_217 = arith.constant 0 : index
    %c0_218 = arith.constant 0 : index
    %642 = vector.load %arg6[%c0_217, %c0_218] : memref<1x128xf32, #tpu.memory_space<vmem>>, vector<1x128xf32>
    %643 = vector.broadcast %642 : vector<1x128xf32> to vector<64x128xf32>
    %644 = arith.addf %641, %643 : vector<64x128xf32>
    %645 = arith.negf %644 : vector<64x128xf32>
    %646 = math.exp %645 : vector<64x128xf32>
    %cst_219 = arith.constant 1.000000e+00 : f32
    %647 = vector.broadcast %cst_219 : f32 to vector<64x128xf32>
    %648 = arith.addf %647, %646 : vector<64x128xf32>
    %649 = arith.divf %647, %648 : vector<64x128xf32>
    %c0_220 = arith.constant 0 : index
    %c0_221 = arith.constant 0 : index
    %650 = vector.load %arg7[%c0_220, %c0_221] : memref<64x128xf32, #tpu.memory_space<vmem>>, vector<64x128xf32>
    tpu.vector_store %arg7[%c0_220, %c0_221], %649 {strides = array<i32>} : memref<64x128xf32, #tpu.memory_space<vmem>>, vector<64x128xf32>,
    return
  }
}

</mosaic_0001>

<bundles_post_ra>
// kernel: supervisor_forward.1
= control target key start
LH: loop header
LB: loop body
LE: loop exit
PB: predicated region body
PF: predicated region fallthrough
CT: control target
= control target key end

     0   :  { %v7132_v1 = vmov 0   ;;  %v7133_v54 = vmov 0.0   ;;  %vm7134_vm0 = vmmov 0   ;;  %s8875_s1 = inlined_call_operand.vmem [shape: bf16[2,128,384], index: 1, kind: input, shape index: {}]   ;;  %s8876_s2 = inlined_call_operand.vmem [shape: bf16[2,128,384], index: 2, kind: input, shape index: {}]   ;;  %s8877_s0 = inlined_call_operand.vmem [shape: f32[64,128], index: 0, kind: input, shape index: {}]   ;;  %s8878_s3 = inlined_call_operand.vmem [shape: f32[2,1,384], index: 3, kind: input, shape index: {}]   ;;  %s8879_s4 = inlined_call_operand.vmem [shape: f32[2,1,128], index: 4, kind: input, shape index: {}]   ;;  %s8880_s5 = inlined_call_operand.vmem [shape: bf16[128,128], index: 5, kind: input, shape index: {}]   ;;  %s8881_s6 = inlined_call_operand.vmem [shape: f32[1,128], index: 6, kind: input, shape index: {}]   ;;  %s8882_s7 = inlined_call_operand.vmem [shape: f32[64,128], index: 7, kind: output, shape index: {}]  }
   0x1   :  { %v6627_v0 = vld [vmem:[%s8875_s1 + $0xac] ss:$12 sps:$4 sm:$0xff]   ;;  %255 = vmatprep.mubr.bf16.mxu1 %v7132_v1  ;;  %583 = vmatprep.mubr.bf16.mxu0 %v7132_v1  ;;  %v6629_v2 = vld [vmem:[%s8875_s1 + $0xa8] ss:$12 sps:$4 sm:$0xff]   ;;  %v6635_v6 = vld [vmem:[%s8875_s1 + $0x90] ss:$12 sps:$4 sm:$0xff]  }
   0x2   :  { %223 = vmatprep.subr.bf16.mxu1 %v6627_v0  ;;  %v7186_v3 = vld [vmem:[%s8876_s2 + $0xac] ss:$12 sps:$4 sm:$0xff]   ;;  %v7191_v4 = vld [vmem:[%s8876_s2 + $0xa8] ss:$12 sps:$4 sm:$0xff]   ;;  %v7209_v8 = vld [vmem:[%s8876_s2 + $0x90] ss:$12 sps:$4 sm:$0xff]  }
   0x3   :  { %224 = vmatpush1.bf16.msra.mxu1 %v6629_v2  ;;  %v6633_v5 = vld [vmem:[%s8875_s1 + $0x94] ss:$12 sps:$4 sm:$0xff]   ;;  %551 = vmatprep.subr.bf16.mxu0 %v7186_v3  ;;  %v6639_v9 = vld [vmem:[%s8875_s1 + $0x7c] ss:$12 sps:$4 sm:$0xff]   ;;  %v6641_v10 = vld [vmem:[%s8875_s1 + $0x78] ss:$12 sps:$4 sm:$0xff]  }
   0x4   :  { %v7203_v7 = vld [vmem:[%s8876_s2 + $0x94] ss:$12 sps:$4 sm:$0xff]   ;;  %552 = vmatpush1.bf16.msra.mxu0 %v7191_v4  ;;  %225 = vmatprep.subr.bf16.mxu1 %v6633_v5  ;;  %v7221_v11 = vld [vmem:[%s8876_s2 + $0x7c] ss:$12 sps:$4 sm:$0xff]   ;;  %v6645_v12 = vld [vmem:[%s8875_s1 + $0x64] ss:$12 sps:$4 sm:$0xff]  }
   0x5   :  { %553 = vmatprep.subr.bf16.mxu0 %v7203_v7  ;;  %v7230_v13 = vld [vmem:[%s8876_s2 + $0x78] ss:$12 sps:$4 sm:$0xff]   ;;  %v6647_v15 = vld [vmem:[%s8875_s1 + $0x60] ss:$12 sps:$4 sm:$0xff]   ;;  %v6653_v19 = vld [vmem:[%s8875_s1 + $0x48] ss:$12 sps:$4 sm:$0xff]  }
   0x6   :  { %v7236_v14 = vld [vmem:[%s8876_s2 + $0x64] ss:$12 sps:$4 sm:$0xff]   ;;  %v6651_v16 = vld [vmem:[%s8875_s1 + $0x4c] ss:$12 sps:$4 sm:$0xff]   ;;  %v6657_v20 = vld [vmem:[%s8875_s1 + $0x34] ss:$12 sps:$4 sm:$0xff]  }
   0x7   :  { %226 = vmatpush1.bf16.msra.mxu1 %v6635_v6  ;;  %v7248_v17 = vld [vmem:[%s8876_s2 + $0x60] ss:$12 sps:$4 sm:$0xff]   ;;  %v7266_v21 = vld [vmem:[%s8876_s2 + $0x48] ss:$12 sps:$4 sm:$0xff]   ;;  %v6659_v23 = vld [vmem:[%s8875_s1 + $0x30] ss:$12 sps:$4 sm:$0xff]  }
   0x8   :  { %227 = vmatprep.subr.bf16.mxu1 %v6639_v9  ;;  %554 = vmatpush1.bf16.msra.mxu0 %v7209_v8  ;;  %v7254_v18 = vld [vmem:[%s8876_s2 + $0x4c] ss:$12 sps:$4 sm:$0xff]   ;;  %v7272_v22 = vld [vmem:[%s8876_s2 + $0x34] ss:$12 sps:$4 sm:$0xff]   ;;  %v6663_v24 = vld [vmem:[%s8875_s1 + $0x1c] ss:$12 sps:$4 sm:$0xff]  }
   0x9   :  { %555 = vmatprep.subr.bf16.mxu0 %v7221_v11  ;;  %v7284_v25 = vld [vmem:[%s8876_s2 + $0x30] ss:$12 sps:$4 sm:$0xff]   ;;  %v6665_v27 = vld [vmem:[%s8875_s1 + $0x18] ss:$12 sps:$4 sm:$0xff]   ;;  %v6671_v30 = vld [vmem:[%s8875_s1] ss:$12 sps:$4 sm:$0xff]  }
   0xa   :  { %v7290_v26 = vld [vmem:[%s8876_s2 + $0x1c] ss:$12 sps:$4 sm:$0xff]   ;;  %v7298_v28 = vld [vmem:[%s8876_s2 + $0x18] ss:$12 sps:$4 sm:$0xff]   ;;  %v7326_v35 = vld [vmem:[%s8876_s2] ss:$12 sps:$4 sm:$0xff]  }
   0xb   :  { %228 = vmatpush1.bf16.msra.mxu1 %v6641_v10  ;;  %v6669_v29 = vld [vmem:[%s8875_s1 + $0x4] ss:$12 sps:$4 sm:$0xff]   ;;  %v35_v33 = vld [vmem:[%s8877_s0 + $0x8] sm:$0xff]  ;;  %v37_v39 = vld [vmem:[%s8877_s0 + $0x18] sm:$0xff] }
   0xc   :  { %229 = vmatprep.subr.bf16.mxu1 %v6645_v12  ;;  %556 = vmatpush1.bf16.msra.mxu0 %v7230_v13  ;;  %v7311_v31 = vld [vmem:[%s8876_s2 + $0x4] ss:$12 sps:$4 sm:$0xff]   ;;  %v6677_v40 = vld [vmem:[%s8875_s1 + $0x80] ss:$12 sps:$4 sm:$0xff]   ;;  %v6678_v42 = vld [vmem:[%s8875_s1 + $0x68] ss:$12 sps:$4 sm:$0xff]  }
   0xd   :  { %557 = vmatprep.subr.bf16.mxu0 %v7236_v14  ;;  %v34_v32 = vld [vmem:[%s8877_s0] sm:$0xff]  ;;  %v6675_v34 = vld [vmem:[%s8875_s1 + $0xb0] ss:$12 sps:$4 sm:$0xff]   ;;  %v39_v44 = vld [vmem:[%s8877_s0 + $0x28] sm:$0xff] }
   0xe   :  { %v42_v36 = vpack.c.bf16 %v35_v33, %v34_v32  ;;  %v6676_v37 = vld [vmem:[%s8875_s1 + $0x98] ss:$12 sps:$4 sm:$0xff]   ;;  %v36_v38 = vld [vmem:[%s8877_s0 + $0x10] sm:$0xff]  ;;  %v6681_v50 = vld [vmem:[%s8875_s1 + $0x20] ss:$12 sps:$4 sm:$0xff]  }
   0xf   :  { %230 = vmatpush1.bf16.msra.mxu1 %v6647_v15  ;;  %v43_v41 = vpack.c.bf16 %v37_v39, %v36_v38  ;;  %v38_v43 = vld [vmem:[%s8877_s0 + $0x20] sm:$0xff]  ;;  %v6679_v45 = vld [vmem:[%s8875_s1 + $0x50] ss:$12 sps:$4 sm:$0xff]   ;;  %v6682_v52 = vld [vmem:[%s8875_s1 + $0x8] ss:$12 sps:$4 sm:$0xff]  }
  0x10   :  { %231 = vmatprep.subr.bf16.mxu1 %v6651_v16  ;;  %558 = vmatpush1.bf16.msra.mxu0 %v7248_v17  ;;  %v44_v46 = vpack.c.bf16 %v39_v44, %v38_v43  ;;  %v6680_v47 = vld [vmem:[%s8875_s1 + $0x38] ss:$12 sps:$4 sm:$0xff]   ;;  %v40_v48 = vld [vmem:[%s8877_s0 + $0x30] sm:$0xff]  ;;  %v6685_v56 = vld [vmem:[%s8876_s2 + $0x80] ss:$12 sps:$4 sm:$0xff]  }
  0x11   :  { %559 = vmatprep.subr.bf16.mxu0 %v7254_v18  ;;  %v41_v49 = vld [vmem:[%s8877_s0 + $0x38] sm:$0xff]  ;;  %v6686_v57 = vld [vmem:[%s8876_s2 + $0x68] ss:$12 sps:$4 sm:$0xff]   ;;  %v6689_v60 = vld [vmem:[%s8876_s2 + $0x20] ss:$12 sps:$4 sm:$0xff]  }
  0x12   :  { %v45_v51 = vpack.c.bf16 %v41_v49, %v40_v48  ;;  %v6683_v53 = vld [vmem:[%s8876_s2 + $0xb0] ss:$12 sps:$4 sm:$0xff]   ;;  %v6684_v55 = vld [vmem:[%s8876_s2 + $0x98] ss:$12 sps:$4 sm:$0xff]   ;;  %v6690_v61 = vld [vmem:[%s8876_s2 + $0x8] ss:$12 sps:$4 sm:$0xff]  }
  0x13   :  { %232 = vmatpush1.bf16.msra.mxu1 %v6653_v19  ;;  %v6687_v58 = vld [vmem:[%s8876_s2 + $0x50] ss:$12 sps:$4 sm:$0xff]   ;;  %v6688_v59 = vld [vmem:[%s8876_s2 + $0x38] ss:$12 sps:$4 sm:$0xff]   ;;  %v6693_v0 = vld [vmem:[%s8876_s2 + $0x80] ss:$12 sps:$4 sm:$0xff]  }
  0x14   :  { %233 = vmatprep.subr.bf16.mxu1 %v6657_v20  ;;  %560 = vmatpush1.bf16.msra.mxu0 %v7266_v21  ;;  %v6691_v62 = vld [vmem:[%s8876_s2 + $0xb0] ss:$12 sps:$4 sm:$0xff]   ;;  %v6692_v63 = vld [vmem:[%s8876_s2 + $0x98] ss:$12 sps:$4 sm:$0xff]   ;;  %v6694_v2 = vld [vmem:[%s8876_s2 + $0x68] ss:$12 sps:$4 sm:$0xff]  }
  0x15   :  { %561 = vmatprep.subr.bf16.mxu0 %v7272_v22  ;;  %v6697_v5 = vld [vmem:[%s8876_s2 + $0x20] ss:$12 sps:$4 sm:$0xff]   ;;  %v6698_v6 = vld [vmem:[%s8876_s2 + $0x8] ss:$12 sps:$4 sm:$0xff]  }
  0x16   :  { %v78_v10 = vld [vmem:[%s8878_s3] sm:$0x7] }
  0x17   :  { %234 = vmatpush1.bf16.msra.mxu1 %v6659_v23 }
  0x18   :  { %235 = vmatprep.subr.bf16.mxu1 %v6663_v24  ;;  %562 = vmatpush1.bf16.msra.mxu0 %v7284_v25 }
  0x19   :  { %563 = vmatprep.subr.bf16.mxu0 %v7290_v26 }
  0x1b   :  { %236 = vmatpush1.bf16.msra.mxu1 %v6665_v27 }
  0x1c   :  { %237 = vmatprep.subr.bf16.mxu1 %v6669_v29  ;;  %564 = vmatpush1.bf16.msra.mxu0 %v7298_v28 }
  0x1d   :  { %565 = vmatprep.subr.bf16.mxu0 %v7311_v31 }
  0x1f   :  { %238 = vmatpush1.bf16.msra.mxu1 %v6671_v30 }
  0x20   :  { %6232 = vmatprep.subr.bf16.mxu1 %v6675_v34  ;;  %566 = vmatpush1.bf16.msra.mxu0 %v7326_v35 }
  0x21   :  { %822 = vmatprep.subr.bf16.mxu0 %v7186_v3 }
  0x22   :  { %256 = vmatmul.mubr.bf16.vlgmr.msra.gmra.mxu1 %v42_v36 }
  0x23   :  { %6233 = vmatpush3.bf16.msra.mxu1 %v6675_v34  ;;  %265 = vmatprep.mubr.bf16.mxu1 %v7132_v1 }
  0x24   :  { %584 = vmatmul.mubr.bf16.vlgmr.msra.gmra.mxu0 %v7132_v1  ;;  %6234 = vmatprep.subr.bf16.mxu1 %v6676_v37 }
  0x25   :  { %823 = vmatpush1.bf16.msra.mxu0 %v7191_v4  ;;  %854 = vmatprep.mubr.bf16.mxu0 %v7132_v1  ;;  %v6696_v4 = vld [vmem:[%s8876_s2 + $0x38] ss:$12 sps:$4 sm:$0xff]  }
  0x26   :  { %824 = vmatprep.subr.bf16.mxu0 %v7203_v7  ;;  %v80_v7 = vlaneseq }
  0x27   :  { %6235 = vmatpush3.bf16.msra.mxu1 %v6676_v37 }
  0x28   :  { %6236 = vmatprep.subr.bf16.mxu1 %v6677_v40 }
  0x29   :  { %825 = vmatpush1.bf16.msra.mxu0 %v7209_v8  ;;  %v7461_v8 = vshrl.u32 %v80_v7, 7 }
  0x2a   :  { %266 = vmatmul.mubr.bf16.gmra.mxu1 %v43_v41  ;;  %826 = vmatprep.subr.bf16.mxu0 %v7221_v11 }
  0x2b   :  { %6237 = vmatpush3.bf16.msra.mxu1 %v6677_v40  ;;  %275 = vmatprep.mubr.bf16.mxu1 %v7132_v1  ;;  %v82_v9 = vsub.s32 0, %v7461_v8  ;;  %v86_v12 = vsub.s32 1, %v7461_v8  ;;  %v90_v44 = vsub.s32 2, %v7461_v8  ;;  %v6843_v8 = vld [vmem:[%s8876_s2 + $0x170] ss:$12 sps:$4 sm:$0xff]  }
  0x2c   :  { %6238 = vmatprep.subr.bf16.mxu1 %v6678_v42 }
  0x2d   :  { %827 = vmatpush1.bf16.msra.mxu0 %v7230_v13  ;;  %v83_v15 = vrot.slane %v78_v10, %v82_v9 }
  0x2e   :  { %828 = vmatprep.subr.bf16.mxu0 %v7236_v14 }
  0x2f   :  { %6239 = vmatpush3.bf16.msra.mxu1 %v6678_v42 }
  0x30   :  { %6240 = vmatprep.subr.bf16.mxu1 %v6679_v45 }
  0x31   :  { %829 = vmatpush1.bf16.msra.mxu0 %v7248_v17 }
  0x32   :  { %276 = vmatmul.mubr.bf16.gmra.mxu1 %v44_v46  ;;  %830 = vmatprep.subr.bf16.mxu0 %v7254_v18  ;;  %v87_v18 = vrot.slane %v78_v10, %v86_v12 }
  0x33   :  { %6241 = vmatpush3.bf16.msra.mxu1 %v6679_v45  ;;  %285 = vmatprep.mubr.bf16.mxu1 %v7132_v1 }
  0x34   :  { %6242 = vmatprep.subr.bf16.mxu1 %v6680_v47 }
  0x35   :  { %831 = vmatpush1.bf16.msra.mxu0 %v7266_v21 }
  0x36   :  { %832 = vmatprep.subr.bf16.mxu0 %v7272_v22 }
  0x37   :  { %6243 = vmatpush3.bf16.msra.mxu1 %v6680_v47 }
  0x38   :  { %6244 = vmatprep.subr.bf16.mxu1 %v6681_v50 }
  0x39   :  { %833 = vmatpush1.bf16.msra.mxu0 %v7284_v25 }
  0x3a   :  { %286 = vmatmul.mubr.bf16.gmra.mxu1 %v45_v51  ;;  %834 = vmatprep.subr.bf16.mxu0 %v7290_v26 }
  0x3b   :  { %6245 = vmatpush3.bf16.msra.mxu1 %v6681_v50  ;;  %6248 = vmatprep.mubr.bf16.mxu1 %v42_v36  ;;  %v91_v50 = vrot.slane %v78_v10, %v90_v44 }
  0x3c   :  { %6246 = vmatprep.subr.bf16.mxu1 %v6682_v52 }
  0x3d   :  { %835 = vmatpush1.bf16.msra.mxu0 %v7298_v28 }
  0x3e   :  { %836 = vmatprep.subr.bf16.mxu0 %v7311_v31 }
  0x3f   :  { %6247 = vmatpush3.bf16.msra.mxu1 %v6682_v52 }
  0x40   :  { %6256 = vmatprep.subr.bf16.mxu1 %v7133_v54 }
  0x41   :  { %837 = vmatpush1.bf16.msra.mxu0 %v7326_v35 }
  0x42   :  { %6249 = vmatmul.mubr.bf16.vlgmr.msra.gmra.mxu1 %v43_v41  ;;  %1094 = vmatprep.subr.bf16.mxu0 %v7186_v3  ;;  %v6695_v3 = vld [vmem:[%s8876_s2 + $0x50] ss:$12 sps:$4 sm:$0xff]  }
  0x43   :  { %6257 = vmatpush3.bf16.msra.mxu1 %v6683_v53  ;;  %6252 = vmatprep.mubr.bf16.mxu1 %v44_v46 }
  0x44   :  { %6258 = vmatprep.subr.bf16.mxu1 %v7133_v54 }
  0x47   :  { %6259 = vmatpush3.bf16.msra.mxu1 %v6684_v55 }
  0x48   :  { %6260 = vmatprep.subr.bf16.mxu1 %v7133_v54 }
  0x4a   :  { %6253 = vmatmul.mubr.bf16.gmra.mxu1 %v45_v51 }
  0x4b   :  { %6261 = vmatpush3.bf16.msra.mxu1 %v6685_v56  ;;  %6272 = vmatprep.mubr.msk.bf16.mxu1 %vm7134_vm0, %v7133_v54 }
  0x4c   :  { %6262 = vmatprep.subr.bf16.mxu1 %v7133_v54 }
  0x4f   :  { %6263 = vmatpush3.bf16.msra.mxu1 %v6686_v57 }
  0x50   :  { %6264 = vmatprep.subr.bf16.mxu1 %v7133_v54 }
  0x53   :  { %6265 = vmatpush3.bf16.msra.mxu1 %v6687_v58 }
  0x54   :  { %6266 = vmatprep.subr.bf16.mxu1 %v7133_v54 }
  0x57   :  { %6267 = vmatpush3.bf16.msra.mxu1 %v6688_v59 }
  0x58   :  { %6268 = vmatprep.subr.bf16.mxu1 %v7133_v54 }
  0x5b   :  { %6269 = vmatpush3.bf16.msra.mxu1 %v6689_v60 }
  0x5c   :  { %6270 = vmatprep.subr.bf16.mxu1 %v7133_v54 }
  0x5f   :  { %6271 = vmatpush3.bf16.msra.mxu1 %v6690_v61 }
  0x60   :  { %6276 = vmatprep.subr.bf16.mxu1 %v7133_v54 }
  0x62   :  { %6273 = vmatmul.mubr.bf16.vlgmr.msra.gmra.mxu1 %v7132_v1 }
  0x63   :  { %6292 = vmatprep.mubr.msk.bf16.mxu1 %vm7134_vm0, %v7133_v54  ;;  %6277 = vmatpush3.bf16.msra.mxu1 %v6691_v62 }
  0x64   :  { %6278 = vmatprep.subr.bf16.mxu1 %v7133_v54 }
  0x67   :  { %6279 = vmatpush3.bf16.msra.mxu1 %v6692_v63 }
  0x68   :  { %6280 = vmatprep.subr.bf16.mxu1 %v7133_v54 }
  0x6b   :  { %6281 = vmatpush3.bf16.msra.mxu1 %v6693_v0 }
  0x6c   :  { %6282 = vmatprep.subr.bf16.mxu1 %v7133_v54 }
  0x6f   :  { %6283 = vmatpush3.bf16.msra.mxu1 %v6694_v2 }
  0x70   :  { %6284 = vmatprep.subr.bf16.mxu1 %v7133_v54 }
  0x73   :  { %6285 = vmatpush3.bf16.msra.mxu1 %v6695_v3 }
  0x74   :  { %6286 = vmatprep.subr.bf16.mxu1 %v7133_v54 }
  0x77   :  { %6287 = vmatpush3.bf16.msra.mxu1 %v6696_v4 }
  0x78   :  { %6288 = vmatprep.subr.bf16.mxu1 %v7133_v54 }
  0x7b   :  { %6289 = vmatpush3.bf16.msra.mxu1 %v6697_v5 }
  0x7c   :  { %6290 = vmatprep.subr.bf16.mxu1 %v7133_v54 }
  0x7f   :  { %6291 = vmatpush3.bf16.msra.mxu1 %v6698_v6 }
  0x80   :  { %6296 = vmatprep.subr.bf16.mxu1 %v7133_v54 }
  0xe2   :  { %v257_v11 = vpop.f32.mrf.mxu1 }
  0xe3   :  { %v258_v37 = vadd.f32 %v257_v11, %v83_v15 }
  0xe4   :  { %v259_v13 = vpop.f32.mrf.mxu1  ;;  %v585_v14 = vpop.f32.mrf.mxu0 }
  0xe5   :  { %v632_v42 = vadd.f32 %v585_v14, %v258_v37  ;;  %v260_v57 = vadd.f32 %v259_v13, %v87_v18 }
  0xe6   :  { %v261_v16 = vpop.f32.mrf.mxu1  ;;  %v587_v17 = vpop.f32.mrf.mxu0 }
  0xe7   :  { %v7472_v19 = vadd.f32 %v261_v16, %v83_v15  ;;  %v5328_v48 = vmul.f32 -1.442695, %v632_v42  ;;  %v639_v61 = vadd.f32 %v587_v17, %v260_v57  ;;  %v7122_v57 = vld [vmem:[%s8876_s2 + $0x4c] ss:$12 sps:$4 sm:$0xff]  }
  0xe8   :  { %v263_v20 = vpop.f32.mrf.mxu1  ;;  %v589_v21 = vpop.f32.mrf.mxu0 }
  0xe9   :  { %v7474_v22 = vadd.f32 %v263_v20, %v87_v18  ;;  %6923 = vpow2.f32 %v5328_v48  ;;  %v5329_v3 = vmul.f32 -1.442695, %v639_v61  ;;  %v7117_v48 = vld [vmem:[%s8876_s2 + $0x90] ss:$12 sps:$4 sm:$0xff]  }
  0xea   :  { %v267_v23 = vpop.f32.mrf.mxu1  ;;  %v590_v24 = vpop.f32.mrf.mxu0  ;;  %v7125_v61 = vld [vmem:[%s8876_s2 + $0x30] ss:$12 sps:$4 sm:$0xff]  }
  0xeb   :  { %v7476_v25 = vadd.f32 %v267_v23, %v83_v15  ;;  %6925 = vpow2.f32 %v5329_v3  ;;  %v7128_v3 = vld [vmem:[%s8876_s2 + $0x4] ss:$12 sps:$4 sm:$0xff]  }
  0xec   :  { %v269_v26 = vpop.f32.mrf.mxu1 }
  0xed   :  { %v7478_v27 = vadd.f32 %v269_v26, %v87_v18 }
  0xee   :  { %v271_v28 = vpop.f32.mrf.mxu1 }
  0xef   :  { %v7480_v29 = vadd.f32 %v271_v28, %v83_v15 }
  0xf0   :  { %v273_v30 = vpop.f32.mrf.mxu1 }
  0xf1   :  { %v7482_v31 = vadd.f32 %v273_v30, %v87_v18 }
  0xf2   :  { %v277_v32 = vpop.f32.mrf.mxu1 }
  0xf3   :  { %v7484_v33 = vadd.f32 %v277_v32, %v83_v15 }
  0xf4   :  { %v279_v34 = vpop.f32.mrf.mxu1 }
  0xf5   :  { %v7486_v35 = vadd.f32 %v279_v34, %v87_v18 }
  0xf6   :  { %v281_v36 = vpop.f32.mrf.mxu1  ;;  %v6924_v7 = vpop.eup %6923 }
  0xf7   :  { %v7488_v38 = vadd.f32 %v281_v36, %v83_v15  ;;  %v636_v13 = vadd.f32 1.0, %v6924_v7  ;;  %v6699_v7 = vld [vmem:[%s8876_s2 + $0xb0] ss:$12 sps:$4 sm:$0xff]  }
  0xf8   :  { %v283_v39 = vpop.f32.mrf.mxu1  ;;  %v6926_v14 = vpop.eup %6925 }
  0xf9   :  { %v7490_v40 = vadd.f32 %v283_v39, %v87_v18  ;;  %6927 = vrcp.f32 %v636_v13  ;;  %v643_v16 = vadd.f32 1.0, %v6926_v14  ;;  %v6701_v13 = vld [vmem:[%s8876_s2 + $0x80] ss:$12 sps:$4 sm:$0xff]   ;;  %v6702_v14 = vld [vmem:[%s8876_s2 + $0x68] ss:$12 sps:$4 sm:$0xff]  }
  0xfa   :  { %v287_v41 = vpop.f32.mrf.mxu1 }
  0xfb   :  { %v7492_v43 = vadd.f32 %v287_v41, %v83_v15  ;;  %6929 = vrcp.f32 %v643_v16  ;;  %v6703_v16 = vld [vmem:[%s8876_s2 + $0x50] ss:$12 sps:$4 sm:$0xff]  }
  0xfc   :  { %v289_v45 = vpop.f32.mrf.mxu1 }
  0xfd   :  { %v7495_v46 = vadd.f32 %v289_v45, %v87_v18  ;;  %v7115_v45 = vld [vmem:[%s8876_s2 + $0xa8] ss:$12 sps:$4 sm:$0xff]  }
  0xfe   :  { %v291_v47 = vpop.f32.mrf.mxu1 }
  0xff   :  { %v7497_v49 = vadd.f32 %v291_v47, %v83_v15  ;;  %v7520_v15 = vld [vmem:[%s8879_s4] ss:$0 sm:$0xff] }
 0x100   :  { %v293_v51 = vpop.f32.mrf.mxu1  ;;  %v7116_v47 = vld [vmem:[%s8876_s2 + $0x94] ss:$12 sps:$4 sm:$0xff]  }
 0x101   :  { %v7501_v52 = vadd.f32 %v293_v51, %v87_v18  ;;  %v7119_v51 = vld [vmem:[%s8876_s2 + $0x78] ss:$12 sps:$4 sm:$0xff]  }
 0x102   :  { %v6250_v53 = vpop.f32.mrf.mxu1 }
 0x103   :  { %v7503_v55 = vadd.f32 %v6250_v53, %v91_v50  ;;  %v7120_v53 = vld [vmem:[%s8876_s2 + $0x64] ss:$12 sps:$4 sm:$0xff]  }
 0x104   :  { %v330_v56 = vpop.f32.mrf.mxu1 }
 0x105   :  { %v331_v23 = vadd.f32 %v330_v56, %v91_v50  ;;  %v7121_v56 = vld [vmem:[%s8876_s2 + $0x60] ss:$12 sps:$4 sm:$0xff]  }
 0x106   :  { %v6251_v58 = vpop.f32.mrf.mxu1  ;;  %v6928_v20 = vpop.eup %6927 }
 0x107   :  { %v7505_v59 = vadd.f32 %v6251_v58, %v91_v50  ;;  %v7123_v58 = vld [vmem:[%s8876_s2 + $0x48] ss:$12 sps:$4 sm:$0xff]  }
 0x108   :  { %v333_v60 = vpop.f32.mrf.mxu1  ;;  %v6930_v32 = vpop.eup %6929 }
 0x109   :  { %v7507_v62 = vadd.f32 %v333_v60, %v91_v50  ;;  %v650_v34 = vsub.f32 1.0, %v6930_v32  ;;  %v652_v39 = vmul.f32 0.0, %v6930_v32  ;;  %v7124_v60 = vld [vmem:[%s8876_s2 + $0x34] ss:$12 sps:$4 sm:$0xff]  }
 0x10a   :  { %v6254_v63 = vpop.f32.mrf.mxu1 }
 0x10b   :  { %v7509_v0 = vadd.f32 %v6254_v63, %v91_v50  ;;  %v7126_v63 = vld [vmem:[%s8876_s2 + $0x1c] ss:$12 sps:$4 sm:$0xff]  }
 0x10c   :  { %v346_v2 = vpop.f32.mrf.mxu1 }
 0x10d   :  { %v7511_v4 = vadd.f32 %v346_v2, %v91_v50  ;;  %v7127_v2 = vld [vmem:[%s8876_s2 + $0x18] ss:$12 sps:$4 sm:$0xff]  }
 0x10e   :  { %v6255_v5 = vpop.f32.mrf.mxu1 }
 0x10f   :  { %v7513_v6 = vadd.f32 %v6255_v5, %v91_v50  ;;  %v7129_v5 = vld [vmem:[%s8876_s2] ss:$12 sps:$4 sm:$0xff]  }
 0x110   :  { %v349_v10 = vpop.f32.mrf.mxu1 }
 0x111   :  { %v7515_v11 = vadd.f32 %v349_v10, %v91_v50  ;;  %v7118_v50 = vld [vmem:[%s8876_s2 + $0x7c] ss:$12 sps:$4 sm:$0xff]   ;;  %v6700_v10 = vld [vmem:[%s8876_s2 + $0x98] ss:$12 sps:$4 sm:$0xff]  }
 0x122   :  { %v626_v17 = vpop.f32.mrf.mxu1 }
 0x123   :  { %v646_v18 = vadd.f32 %v7520_v15, %v626_v17  ;;  %v6704_v17 = vld [vmem:[%s8876_s2 + $0x38] ss:$12 sps:$4 sm:$0xff]  }
 0x124   :  { %v6274_v21 = vpop.f32.mrf.mxu1 }
 0x125   :  { %v647_v24 = vmul.f32 %v6928_v20, %v646_v18  ;;  %v6705_v18 = vld [vmem:[%s8876_s2 + $0x20] ss:$12 sps:$4 sm:$0xff]   ;;  %v6706_v20 = vld [vmem:[%s8876_s2 + $0x8] ss:$12 sps:$4 sm:$0xff]  }
 0x126   :  { %v629_v26 = vpop.f32.mrf.mxu1 }
 0x127   :  { %v648_v28 = vadd.f32 %v647_v24, %v331_v23 }
 0x128   :  { %v6275_v30 = vpop.f32.mrf.mxu1 }
 0x129   :  { %6931 = vtanh.f32 %v648_v28 }
 0x136   :  { %v6932_v36 = vpop.eup %6931 }
 0x137   :  { %v651_v37 = vmul.f32 %v6932_v36, %v650_v34 }
 0x139   :  { %v7523_v41 = vadd.f32 %v652_v39, %v651_v37 }
 0x13b   :  { %v661_v42 = vpack.c.bf16 %v7523_v41, %v7523_v41 }
 0x13d   :  { %855 = vmatmul.mubr.bf16.vlgmr.msra.gmra.mxu0 %v661_v42  ;;  %6293 = vmatmul.mubr.bf16.vlgmr.msra.gmra.mxu1 %v661_v42 }
 0x13e   :  { %1095 = vmatpush1.bf16.msra.mxu0 %v7115_v45  ;;  %1126 = vmatprep.mubr.bf16.mxu0 %v7132_v1 }
 0x13f   :  { %1096 = vmatprep.subr.bf16.mxu0 %v7116_v47  ;;  %6312 = vmatprep.mubr.msk.bf16.mxu1 %vm7134_vm0, %v7133_v54 }
 0x140   :  { %6297 = vmatpush3.bf16.msra.mxu1 %v6699_v7  ;;  %v7637_v7 = vld [vmem:[%s8876_s2 + $0x94] ss:$12 sps:$4 sm:$0xff]  }
 0x141   :  { %6298 = vmatprep.subr.bf16.mxu1 %v7133_v54 }
 0x142   :  { %1097 = vmatpush1.bf16.msra.mxu0 %v7117_v48 }
 0x143   :  { %1098 = vmatprep.subr.bf16.mxu0 %v7118_v50 }
 0x144   :  { %6299 = vmatpush3.bf16.msra.mxu1 %v6700_v10  ;;  %v7643_v10 = vld [vmem:[%s8876_s2 + $0x90] ss:$12 sps:$4 sm:$0xff]  }
 0x145   :  { %6300 = vmatprep.subr.bf16.mxu1 %v7133_v54 }
 0x146   :  { %1099 = vmatpush1.bf16.msra.mxu0 %v7119_v51 }
 0x147   :  { %1100 = vmatprep.subr.bf16.mxu0 %v7120_v53 }
 0x148   :  { %6301 = vmatpush3.bf16.msra.mxu1 %v6701_v13  ;;  %v6714_v13 = vld [vmem:[%s8876_s2 + $0x98] ss:$12 sps:$4 sm:$0xff]  }
 0x149   :  { %6302 = vmatprep.subr.bf16.mxu1 %v7133_v54 }
 0x14a   :  { %1101 = vmatpush1.bf16.msra.mxu0 %v7121_v56 }
 0x14b   :  { %1102 = vmatprep.subr.bf16.mxu0 %v7122_v57 }
 0x14c   :  { %6303 = vmatpush3.bf16.msra.mxu1 %v6702_v14  ;;  %v7653_v14 = vld [vmem:[%s8876_s2 + $0x7c] ss:$12 sps:$4 sm:$0xff]  }
 0x14d   :  { %6304 = vmatprep.subr.bf16.mxu1 %v7133_v54 }
 0x14e   :  { %1103 = vmatpush1.bf16.msra.mxu0 %v7123_v58 }
 0x14f   :  { %1104 = vmatprep.subr.bf16.mxu0 %v7124_v60 }
 0x150   :  { %6305 = vmatpush3.bf16.msra.mxu1 %v6703_v16  ;;  %v7659_v16 = vld [vmem:[%s8876_s2 + $0x78] ss:$12 sps:$4 sm:$0xff]  }
 0x151   :  { %6306 = vmatprep.subr.bf16.mxu1 %v7133_v54 }
 0x152   :  { %1105 = vmatpush1.bf16.msra.mxu0 %v7125_v61 }
 0x153   :  { %1106 = vmatprep.subr.bf16.mxu0 %v7126_v63 }
 0x154   :  { %6307 = vmatpush3.bf16.msra.mxu1 %v6704_v17  ;;  %v6718_v17 = vld [vmem:[%s8876_s2 + $0x80] ss:$12 sps:$4 sm:$0xff]  }
 0x155   :  { %6308 = vmatprep.subr.bf16.mxu1 %v7133_v54 }
 0x156   :  { %1107 = vmatpush1.bf16.msra.mxu0 %v7127_v2 }
 0x157   :  { %1108 = vmatprep.subr.bf16.mxu0 %v7128_v3  ;;  %v7627_v3 = vld [vmem:[%s8876_s2 + $0xa8] ss:$12 sps:$4 sm:$0xff]  }
 0x158   :  { %6309 = vmatpush3.bf16.msra.mxu1 %v6705_v18  ;;  %v7669_v18 = vld [vmem:[%s8876_s2 + $0x64] ss:$12 sps:$4 sm:$0xff]  }
 0x159   :  { %6310 = vmatprep.subr.bf16.mxu1 %v7133_v54 }
 0x15a   :  { %1109 = vmatpush1.bf16.msra.mxu0 %v7129_v5  ;;  %v6710_v5 = vld [vmem:[%s8876_s2 + $0xb0] ss:$12 sps:$4 sm:$0xff]  }
 0x15c   :  { %6311 = vmatpush3.bf16.msra.mxu1 %v6706_v20  ;;  %v7675_v20 = vld [vmem:[%s8876_s2 + $0x60] ss:$12 sps:$4 sm:$0xff]  }
 0x15d   :  { %6316 = vmatprep.subr.bf16.mxu1 %v7133_v54 }
 0x1fd   :  { %v856_v21 = vpop.f32.mrf.mxu0  ;;  %v897_v23 = vpop.f32.mrf.mxu1 }
 0x1fe   :  { %v903_v24 = vadd.f32 %v856_v21, %v7472_v19  ;;  %v917_v51 = vadd.f32 %v7520_v15, %v897_v23  ;;  %v6722_v21 = vld [vmem:[%s8876_s2 + $0x68] ss:$12 sps:$4 sm:$0xff]   ;;  %v7684_v23 = vld [vmem:[%s8876_s2 + $0x4c] ss:$12 sps:$4 sm:$0xff]  }
 0x1ff   :  { %v858_v26 = vpop.f32.mrf.mxu0  ;;  %v6294_v28 = vpop.f32.mrf.mxu1 }
 0x200   :  { %v5354_v30 = vmul.f32 -1.442695, %v903_v24  ;;  %v910_v39 = vadd.f32 %v858_v26, %v7474_v22  ;;  %v7690_v24 = vld [vmem:[%s8876_s2 + $0x48] ss:$12 sps:$4 sm:$0xff]   ;;  %v6726_v26 = vld [vmem:[%s8876_s2 + $0x50] ss:$12 sps:$4 sm:$0xff]  }
 0x201   :  { %v860_v32 = vpop.f32.mrf.mxu0  ;;  %v900_v34 = vpop.f32.mrf.mxu1  ;;  %v7700_v28 = vld [vmem:[%s8876_s2 + $0x34] ss:$12 sps:$4 sm:$0xff]  }
 0x202   :  { %6933 = vpow2.f32 %v5354_v30  ;;  %v5355_v42 = vmul.f32 -1.442695, %v910_v39  ;;  %v7706_v30 = vld [vmem:[%s8876_s2 + $0x30] ss:$12 sps:$4 sm:$0xff]   ;;  %v6730_v32 = vld [vmem:[%s8876_s2 + $0x38] ss:$12 sps:$4 sm:$0xff]  }
 0x203   :  { %v861_v36 = vpop.f32.mrf.mxu0  ;;  %v6295_v37 = vpop.f32.mrf.mxu1  ;;  %v7716_v34 = vld [vmem:[%s8876_s2 + $0x1c] ss:$12 sps:$4 sm:$0xff]   ;;  %v7732_v39 = vld [vmem:[%s8876_s2 + $0x4] ss:$12 sps:$4 sm:$0xff]  }
 0x204   :  { %6935 = vpow2.f32 %v5355_v42  ;;  %v7722_v36 = vld [vmem:[%s8876_s2 + $0x18] ss:$12 sps:$4 sm:$0xff]   ;;  %v6734_v37 = vld [vmem:[%s8876_s2 + $0x20] ss:$12 sps:$4 sm:$0xff]  }
 0x205   :  { %v7738_v42 = vld [vmem:[%s8876_s2] ss:$12 sps:$4 sm:$0xff]  }
 0x20f   :  { %v6934_v45 = vpop.eup %6933 }
 0x210   :  { %v907_v47 = vadd.f32 1.0, %v6934_v45  ;;  %v6738_v45 = vld [vmem:[%s8876_s2 + $0x8] ss:$12 sps:$4 sm:$0xff]  }
 0x211   :  { %v6936_v48 = vpop.eup %6935 }
 0x212   :  { %6937 = vrcp.f32 %v907_v47  ;;  %v914_v50 = vadd.f32 1.0, %v6936_v48 }
 0x214   :  { %6939 = vrcp.f32 %v914_v50 }
 0x21f   :  { %v6938_v19 = vpop.eup %6937 }
 0x220   :  { %v918_v53 = vmul.f32 %v6938_v19, %v917_v51 }
 0x221   :  { %v6940_v57 = vpop.eup %6939 }
 0x222   :  { %v919_v56 = vadd.f32 %v918_v53, %v7507_v62  ;;  %v921_v58 = vsub.f32 1.0, %v6940_v57  ;;  %v923_v22 = vmul.f32 %v6940_v57, %v7523_v41  ;;  %v7622_v62 = vld [vmem:[%s8876_s2 + $0xac] ss:$12 sps:$4 sm:$0xff]  }
 0x223   :  { %1366 = vmatprep.subr.bf16.mxu0 %v7622_v62 }
 0x224   :  { %6941 = vtanh.f32 %v919_v56 }
 0x231   :  { %v6942_v60 = vpop.eup %6941 }
 0x232   :  { %v922_v61 = vmul.f32 %v6942_v60, %v921_v58 }
 0x234   :  { %v7612_v63 = vadd.f32 %v923_v22, %v922_v61 }
 0x236   :  { %v933_v2 = vpack.c.bf16 %v7612_v63, %v7612_v63 }
 0x238   :  { %1127 = vmatmul.mubr.bf16.vlgmr.msra.gmra.mxu0 %v933_v2  ;;  %6313 = vmatmul.mubr.bf16.vlgmr.msra.gmra.mxu1 %v933_v2 }
 0x239   :  { %1398 = vmatprep.mubr.bf16.mxu0 %v7132_v1  ;;  %6332 = vmatprep.mubr.msk.bf16.mxu1 %vm7134_vm0, %v7133_v54 }
 0x23a   :  { %1367 = vmatpush1.bf16.msra.mxu0 %v7627_v3  ;;  %6317 = vmatpush3.bf16.msra.mxu1 %v6710_v5 }
 0x23b   :  { %6318 = vmatprep.subr.bf16.mxu1 %v7133_v54  ;;  %1368 = vmatprep.subr.bf16.mxu0 %v7637_v7 }
 0x23e   :  { %1369 = vmatpush1.bf16.msra.mxu0 %v7643_v10  ;;  %6319 = vmatpush3.bf16.msra.mxu1 %v6714_v13 }
 0x23f   :  { %6320 = vmatprep.subr.bf16.mxu1 %v7133_v54  ;;  %1370 = vmatprep.subr.bf16.mxu0 %v7653_v14 }
 0x242   :  { %1371 = vmatpush1.bf16.msra.mxu0 %v7659_v16  ;;  %6321 = vmatpush3.bf16.msra.mxu1 %v6718_v17 }
 0x243   :  { %6322 = vmatprep.subr.bf16.mxu1 %v7133_v54  ;;  %1372 = vmatprep.subr.bf16.mxu0 %v7669_v18 }
 0x246   :  { %1373 = vmatpush1.bf16.msra.mxu0 %v7675_v20  ;;  %6323 = vmatpush3.bf16.msra.mxu1 %v6722_v21 }
 0x247   :  { %1374 = vmatprep.subr.bf16.mxu0 %v7684_v23  ;;  %6324 = vmatprep.subr.bf16.mxu1 %v7133_v54 }
 0x24a   :  { %1375 = vmatpush1.bf16.msra.mxu0 %v7690_v24  ;;  %6325 = vmatpush3.bf16.msra.mxu1 %v6726_v26 }
 0x24b   :  { %1376 = vmatprep.subr.bf16.mxu0 %v7700_v28  ;;  %6326 = vmatprep.subr.bf16.mxu1 %v7133_v54 }
 0x24e   :  { %1377 = vmatpush1.bf16.msra.mxu0 %v7706_v30  ;;  %6327 = vmatpush3.bf16.msra.mxu1 %v6730_v32 }
 0x24f   :  { %1378 = vmatprep.subr.bf16.mxu0 %v7716_v34  ;;  %6328 = vmatprep.subr.bf16.mxu1 %v7133_v54 }
 0x252   :  { %1379 = vmatpush1.bf16.msra.mxu0 %v7722_v36  ;;  %6329 = vmatpush3.bf16.msra.mxu1 %v6734_v37 }
 0x253   :  { %1380 = vmatprep.subr.bf16.mxu0 %v7732_v39  ;;  %6330 = vmatprep.subr.bf16.mxu1 %v7133_v54 }
 0x256   :  { %1381 = vmatpush1.bf16.msra.mxu0 %v7738_v42  ;;  %6331 = vmatpush3.bf16.msra.mxu1 %v6738_v45 }
 0x257   :  { %1638 = vmatprep.subr.bf16.mxu0 %v7622_v62  ;;  %6336 = vmatprep.subr.bf16.mxu1 %v7133_v54 }
 0x2f8   :  { %v1128_v47 = vpop.f32.mrf.mxu0  ;;  %v1169_v48 = vpop.f32.mrf.mxu1 }
 0x2f9   :  { %v1175_v50 = vadd.f32 %v1128_v47, %v7476_v25  ;;  %v1189_v21 = vadd.f32 %v7520_v15, %v1169_v48  ;;  %v6740_v48 = vld [vmem:[%s8876_s2 + $0x98] ss:$12 sps:$4 sm:$0xff]  }
 0x2fa   :  { %v1130_v51 = vpop.f32.mrf.mxu0  ;;  %v6314_v19 = vpop.f32.mrf.mxu1 }
 0x2fb   :  { %v5380_v53 = vmul.f32 -1.442695, %v1175_v50  ;;  %v1182_v61 = vadd.f32 %v1130_v51, %v7478_v27 }
 0x2fc   :  { %v1132_v56 = vpop.f32.mrf.mxu0  ;;  %v1172_v57 = vpop.f32.mrf.mxu1 }
 0x2fd   :  { %6943 = vpow2.f32 %v5380_v53  ;;  %v5381_v22 = vmul.f32 -1.442695, %v1182_v61  ;;  %v6741_v53 = vld [vmem:[%s8876_s2 + $0x80] ss:$12 sps:$4 sm:$0xff]   ;;  %v6742_v56 = vld [vmem:[%s8876_s2 + $0x68] ss:$12 sps:$4 sm:$0xff]  }
 0x2fe   :  { %v1133_v58 = vpop.f32.mrf.mxu0  ;;  %v6315_v60 = vpop.f32.mrf.mxu1  ;;  %v6743_v57 = vld [vmem:[%s8876_s2 + $0x50] ss:$12 sps:$4 sm:$0xff]   ;;  %v6746_v61 = vld [vmem:[%s8876_s2 + $0x8] ss:$12 sps:$4 sm:$0xff]  }
 0x2ff   :  { %6945 = vpow2.f32 %v5381_v22  ;;  %v6744_v58 = vld [vmem:[%s8876_s2 + $0x38] ss:$12 sps:$4 sm:$0xff]   ;;  %v6745_v60 = vld [vmem:[%s8876_s2 + $0x20] ss:$12 sps:$4 sm:$0xff]  }
 0x30a   :  { %v6944_v2 = vpop.eup %6943 }
 0x30b   :  { %v1179_v5 = vadd.f32 1.0, %v6944_v2 }
 0x30c   :  { %v6946_v13 = vpop.eup %6945 }
 0x30d   :  { %6947 = vrcp.f32 %v1179_v5  ;;  %v1186_v17 = vadd.f32 1.0, %v6946_v13 }
 0x30f   :  { %6949 = vrcp.f32 %v1186_v17 }
 0x31a   :  { %v6948_v25 = vpop.eup %6947 }
 0x31b   :  { %v1190_v26 = vmul.f32 %v6948_v25, %v1189_v21 }
 0x31c   :  { %v6950_v37 = vpop.eup %6949 }
 0x31d   :  { %v1191_v32 = vadd.f32 %v1190_v26, %v7503_v55  ;;  %v1193_v45 = vsub.f32 1.0, %v6950_v37  ;;  %v1195_v27 = vmul.f32 %v6950_v37, %v7612_v63  ;;  %v6739_v55 = vld [vmem:[%s8876_s2 + $0xb0] ss:$12 sps:$4 sm:$0xff]  }
 0x31f   :  { %6951 = vtanh.f32 %v1191_v32 }
 0x32c   :  { %v6952_v47 = vpop.eup %6951 }
 0x32d   :  { %v1194_v50 = vmul.f32 %v6952_v47, %v1193_v45 }
 0x32f   :  { %v7753_v51 = vadd.f32 %v1195_v27, %v1194_v50 }
 0x331   :  { %v1205_v19 = vpack.c.bf16 %v7753_v51, %v7753_v51 }
 0x333   :  { %1399 = vmatmul.mubr.bf16.vlgmr.msra.gmra.mxu0 %v1205_v19  ;;  %6333 = vmatmul.mubr.bf16.vlgmr.msra.gmra.mxu1 %v1205_v19 }
 0x334   :  { %1639 = vmatpush1.bf16.msra.mxu0 %v7627_v3  ;;  %1670 = vmatprep.mubr.bf16.mxu0 %v7132_v1 }
 0x335   :  { %1640 = vmatprep.subr.bf16.mxu0 %v7637_v7  ;;  %6352 = vmatprep.mubr.msk.bf16.mxu1 %vm7134_vm0, %v7133_v54 }
 0x336   :  { %6337 = vmatpush3.bf16.msra.mxu1 %v6739_v55 }
 0x337   :  { %6338 = vmatprep.subr.bf16.mxu1 %v7133_v54 }
 0x338   :  { %1641 = vmatpush1.bf16.msra.mxu0 %v7643_v10 }
 0x339   :  { %1642 = vmatprep.subr.bf16.mxu0 %v7653_v14 }
 0x33a   :  { %6339 = vmatpush3.bf16.msra.mxu1 %v6740_v48 }
 0x33b   :  { %6340 = vmatprep.subr.bf16.mxu1 %v7133_v54 }
 0x33c   :  { %1643 = vmatpush1.bf16.msra.mxu0 %v7659_v16 }
 0x33d   :  { %1644 = vmatprep.subr.bf16.mxu0 %v7669_v18 }
 0x33e   :  { %6341 = vmatpush3.bf16.msra.mxu1 %v6741_v53 }
 0x33f   :  { %6342 = vmatprep.subr.bf16.mxu1 %v7133_v54 }
 0x340   :  { %1645 = vmatpush1.bf16.msra.mxu0 %v7675_v20 }
 0x341   :  { %1646 = vmatprep.subr.bf16.mxu0 %v7684_v23 }
 0x342   :  { %6343 = vmatpush3.bf16.msra.mxu1 %v6742_v56 }
 0x343   :  { %6344 = vmatprep.subr.bf16.mxu1 %v7133_v54 }
 0x344   :  { %1647 = vmatpush1.bf16.msra.mxu0 %v7690_v24 }
 0x345   :  { %1648 = vmatprep.subr.bf16.mxu0 %v7700_v28 }
 0x346   :  { %6345 = vmatpush3.bf16.msra.mxu1 %v6743_v57 }
 0x347   :  { %6346 = vmatprep.subr.bf16.mxu1 %v7133_v54 }
 0x348   :  { %1649 = vmatpush1.bf16.msra.mxu0 %v7706_v30 }
 0x349   :  { %1650 = vmatprep.subr.bf16.mxu0 %v7716_v34 }
 0x34a   :  { %6347 = vmatpush3.bf16.msra.mxu1 %v6744_v58 }
 0x34b   :  { %6348 = vmatprep.subr.bf16.mxu1 %v7133_v54 }
 0x34c   :  { %1651 = vmatpush1.bf16.msra.mxu0 %v7722_v36 }
 0x34d   :  { %1652 = vmatprep.subr.bf16.mxu0 %v7732_v39 }
 0x34e   :  { %6349 = vmatpush3.bf16.msra.mxu1 %v6745_v60 }
 0x34f   :  { %6350 = vmatprep.subr.bf16.mxu1 %v7133_v54 }
 0x350   :  { %1653 = vmatpush1.bf16.msra.mxu0 %v7738_v42 }
 0x351   :  { %1910 = vmatprep.subr.bf16.mxu0 %v7622_v62 }
 0x352   :  { %6351 = vmatpush3.bf16.msra.mxu1 %v6746_v61 }
 0x353   :  { %6356 = vmatprep.subr.bf16.mxu1 %v7133_v54 }
 0x3f3   :  { %v1400_v22 = vpop.f32.mrf.mxu0  ;;  %v1441_v2 = vpop.f32.mrf.mxu1 }
 0x3f4   :  { %v1447_v5 = vadd.f32 %v1400_v22, %v7480_v29  ;;  %v1461_v48 = vadd.f32 %v7520_v15, %v1441_v2  ;;  %v6748_v2 = vld [vmem:[%s8876_s2 + $0x98] ss:$12 sps:$4 sm:$0xff]  }
 0x3f5   :  { %v1402_v13 = vpop.f32.mrf.mxu0  ;;  %v6334_v17 = vpop.f32.mrf.mxu1 }
 0x3f6   :  { %v5406_v21 = vmul.f32 -1.442695, %v1447_v5  ;;  %v1454_v45 = vadd.f32 %v1402_v13, %v7482_v31  ;;  %v6749_v13 = vld [vmem:[%s8876_s2 + $0x80] ss:$12 sps:$4 sm:$0xff]   ;;  %v6750_v17 = vld [vmem:[%s8876_s2 + $0x68] ss:$12 sps:$4 sm:$0xff]  }
 0x3f7   :  { %v1404_v25 = vpop.f32.mrf.mxu0  ;;  %v1444_v26 = vpop.f32.mrf.mxu1 }
 0x3f8   :  { %6953 = vpow2.f32 %v5406_v21  ;;  %v5407_v47 = vmul.f32 -1.442695, %v1454_v45  ;;  %v6751_v21 = vld [vmem:[%s8876_s2 + $0x50] ss:$12 sps:$4 sm:$0xff]   ;;  %v6752_v25 = vld [vmem:[%s8876_s2 + $0x38] ss:$12 sps:$4 sm:$0xff]  }
 0x3f9   :  { %v1405_v32 = vpop.f32.mrf.mxu0  ;;  %v6335_v37 = vpop.f32.mrf.mxu1  ;;  %v6753_v26 = vld [vmem:[%s8876_s2 + $0x20] ss:$12 sps:$4 sm:$0xff]  }
 0x3fa   :  { %6955 = vpow2.f32 %v5407_v47  ;;  %v6754_v32 = vld [vmem:[%s8876_s2 + $0x8] ss:$12 sps:$4 sm:$0xff]  }
 0x405   :  { %v6954_v50 = vpop.eup %6953 }
 0x406   :  { %v1451_v27 = vadd.f32 1.0, %v6954_v50 }
 0x407   :  { %v6956_v19 = vpop.eup %6955 }
 0x408   :  { %6957 = vrcp.f32 %v1451_v27  ;;  %v1458_v55 = vadd.f32 1.0, %v6956_v19 }
 0x40a   :  { %6959 = vrcp.f32 %v1458_v55 }
 0x415   :  { %v6958_v29 = vpop.eup %6957 }
 0x416   :  { %v1462_v53 = vmul.f32 %v6958_v29, %v1461_v48 }
 0x417   :  { %v6960_v57 = vpop.eup %6959 }
 0x418   :  { %v1463_v56 = vadd.f32 %v1462_v53, %v7505_v59  ;;  %v1465_v58 = vsub.f32 1.0, %v6960_v57  ;;  %v1467_v31 = vmul.f32 %v6960_v57, %v7753_v51  ;;  %v6747_v59 = vld [vmem:[%s8876_s2 + $0xb0] ss:$12 sps:$4 sm:$0xff]  }
 0x41a   :  { %6961 = vtanh.f32 %v1463_v56 }
 0x427   :  { %v6962_v60 = vpop.eup %6961 }
 0x428   :  { %v1466_v61 = vmul.f32 %v6962_v60, %v1465_v58 }
 0x42a   :  { %v7813_v22 = vadd.f32 %v1467_v31, %v1466_v61 }
 0x42c   :  { %v1477_v5 = vpack.c.bf16 %v7813_v22, %v7813_v22 }
 0x42e   :  { %1671 = vmatmul.mubr.bf16.vlgmr.msra.gmra.mxu0 %v1477_v5  ;;  %6353 = vmatmul.mubr.bf16.vlgmr.msra.gmra.mxu1 %v1477_v5 }
 0x42f   :  { %1911 = vmatpush1.bf16.msra.mxu0 %v7627_v3  ;;  %1942 = vmatprep.mubr.bf16.mxu0 %v7132_v1 }
 0x430   :  { %1912 = vmatprep.subr.bf16.mxu0 %v7637_v7  ;;  %6372 = vmatprep.mubr.msk.bf16.mxu1 %vm7134_vm0, %v7133_v54 }
 0x431   :  { %6357 = vmatpush3.bf16.msra.mxu1 %v6747_v59 }
 0x432   :  { %6358 = vmatprep.subr.bf16.mxu1 %v7133_v54 }
 0x433   :  { %1913 = vmatpush1.bf16.msra.mxu0 %v7643_v10 }
 0x434   :  { %1914 = vmatprep.subr.bf16.mxu0 %v7653_v14 }
 0x435   :  { %6359 = vmatpush3.bf16.msra.mxu1 %v6748_v2 }
 0x436   :  { %6360 = vmatprep.subr.bf16.mxu1 %v7133_v54 }
 0x437   :  { %1915 = vmatpush1.bf16.msra.mxu0 %v7659_v16 }
 0x438   :  { %1916 = vmatprep.subr.bf16.mxu0 %v7669_v18 }
 0x439   :  { %6361 = vmatpush3.bf16.msra.mxu1 %v6749_v13 }
 0x43a   :  { %6362 = vmatprep.subr.bf16.mxu1 %v7133_v54 }
 0x43b   :  { %1917 = vmatpush1.bf16.msra.mxu0 %v7675_v20 }
 0x43c   :  { %1918 = vmatprep.subr.bf16.mxu0 %v7684_v23 }
 0x43d   :  { %6363 = vmatpush3.bf16.msra.mxu1 %v6750_v17 }
 0x43e   :  { %6364 = vmatprep.subr.bf16.mxu1 %v7133_v54 }
 0x43f   :  { %1919 = vmatpush1.bf16.msra.mxu0 %v7690_v24 }
 0x440   :  { %1920 = vmatprep.subr.bf16.mxu0 %v7700_v28 }
 0x441   :  { %6365 = vmatpush3.bf16.msra.mxu1 %v6751_v21 }
 0x442   :  { %6366 = vmatprep.subr.bf16.mxu1 %v7133_v54 }
 0x443   :  { %1921 = vmatpush1.bf16.msra.mxu0 %v7706_v30 }
 0x444   :  { %1922 = vmatprep.subr.bf16.mxu0 %v7716_v34 }
 0x445   :  { %6367 = vmatpush3.bf16.msra.mxu1 %v6752_v25 }
 0x446   :  { %6368 = vmatprep.subr.bf16.mxu1 %v7133_v54 }
 0x447   :  { %1923 = vmatpush1.bf16.msra.mxu0 %v7722_v36 }
 0x448   :  { %1924 = vmatprep.subr.bf16.mxu0 %v7732_v39 }
 0x449   :  { %6369 = vmatpush3.bf16.msra.mxu1 %v6753_v26 }
 0x44a   :  { %6370 = vmatprep.subr.bf16.mxu1 %v7133_v54 }
 0x44b   :  { %1925 = vmatpush1.bf16.msra.mxu0 %v7738_v42 }
 0x44c   :  { %2182 = vmatprep.subr.bf16.mxu0 %v7622_v62 }
 0x44d   :  { %6371 = vmatpush3.bf16.msra.mxu1 %v6754_v32 }
 0x44e   :  { %6376 = vmatprep.subr.bf16.mxu1 %v7133_v54 }
 0x4ee   :  { %v1672_v37 = vpop.f32.mrf.mxu0  ;;  %v1713_v45 = vpop.f32.mrf.mxu1 }
 0x4ef   :  { %v1719_v47 = vadd.f32 %v1672_v37, %v7484_v33  ;;  %v1733_v5 = vadd.f32 %v7520_v15, %v1713_v45  ;;  %v6756_v37 = vld [vmem:[%s8876_s2 + $0x98] ss:$12 sps:$4 sm:$0xff]   ;;  %v6757_v45 = vld [vmem:[%s8876_s2 + $0x80] ss:$12 sps:$4 sm:$0xff]  }
 0x4f0   :  { %v1674_v50 = vpop.f32.mrf.mxu0  ;;  %v6354_v27 = vpop.f32.mrf.mxu1 }
 0x4f1   :  { %v5432_v19 = vmul.f32 -1.442695, %v1719_v47  ;;  %v1726_v56 = vadd.f32 %v1674_v50, %v7486_v35  ;;  %v6759_v47 = vld [vmem:[%s8876_s2 + $0x50] ss:$12 sps:$4 sm:$0xff]   ;;  %v6760_v50 = vld [vmem:[%s8876_s2 + $0x38] ss:$12 sps:$4 sm:$0xff]  }
 0x4f2   :  { %v1676_v55 = vpop.f32.mrf.mxu0  ;;  %v1716_v48 = vpop.f32.mrf.mxu1  ;;  %v6761_v27 = vld [vmem:[%s8876_s2 + $0x20] ss:$12 sps:$4 sm:$0xff]  }
 0x4f3   :  { %6963 = vpow2.f32 %v5432_v19  ;;  %v5433_v57 = vmul.f32 -1.442695, %v1726_v56  ;;  %v6762_v19 = vld [vmem:[%s8876_s2 + $0x8] ss:$12 sps:$4 sm:$0xff]  }
 0x4f4   :  { %v1677_v29 = vpop.f32.mrf.mxu0  ;;  %v6355_v53 = vpop.f32.mrf.mxu1 }
 0x4f5   :  { %6965 = vpow2.f32 %v5433_v57 }
 0x500   :  { %v6964_v58 = vpop.eup %6963 }
 0x501   :  { %v1723_v60 = vadd.f32 1.0, %v6964_v58 }
 0x502   :  { %v6966_v61 = vpop.eup %6965 }
 0x503   :  { %6967 = vrcp.f32 %v1723_v60  ;;  %v1730_v31 = vadd.f32 1.0, %v6966_v61 }
 0x505   :  { %6969 = vrcp.f32 %v1730_v31 }
 0x510   :  { %v6968_v33 = vpop.eup %6967 }
 0x511   :  { %v1734_v59 = vmul.f32 %v6968_v33, %v1733_v5 }
 0x512   :  { %v6970_v13 = vpop.eup %6969 }
 0x513   :  { %v1735_v2 = vadd.f32 %v1734_v59, %v7511_v4  ;;  %v1737_v17 = vsub.f32 1.0, %v6970_v13  ;;  %v1739_v35 = vmul.f32 %v6970_v13, %v7813_v22  ;;  %v6755_v4 = vld [vmem:[%s8876_s2 + $0xb0] ss:$12 sps:$4 sm:$0xff]  }
 0x515   :  { %6971 = vtanh.f32 %v1735_v2 }
 0x522   :  { %v6972_v21 = vpop.eup %6971 }
 0x523   :  { %v1738_v25 = vmul.f32 %v6972_v21, %v1737_v17 }
 0x525   :  { %v7873_v26 = vadd.f32 %v1739_v35, %v1738_v25 }
 0x527   :  { %v1749_v32 = vpack.c.bf16 %v7873_v26, %v7873_v26 }
 0x529   :  { %1943 = vmatmul.mubr.bf16.vlgmr.msra.gmra.mxu0 %v1749_v32  ;;  %6373 = vmatmul.mubr.bf16.vlgmr.msra.gmra.mxu1 %v1749_v32 }
 0x52a   :  { %2183 = vmatpush1.bf16.msra.mxu0 %v7627_v3  ;;  %2214 = vmatprep.mubr.bf16.mxu0 %v7132_v1 }
 0x52b   :  { %2184 = vmatprep.subr.bf16.mxu0 %v7637_v7  ;;  %6392 = vmatprep.mubr.msk.bf16.mxu1 %vm7134_vm0, %v7133_v54 }
 0x52c   :  { %6377 = vmatpush3.bf16.msra.mxu1 %v6755_v4 }
 0x52d   :  { %6378 = vmatprep.subr.bf16.mxu1 %v7133_v54 }
 0x52e   :  { %2185 = vmatpush1.bf16.msra.mxu0 %v7643_v10 }
 0x52f   :  { %2186 = vmatprep.subr.bf16.mxu0 %v7653_v14 }
 0x530   :  { %6379 = vmatpush3.bf16.msra.mxu1 %v6756_v37 }
 0x531   :  { %6380 = vmatprep.subr.bf16.mxu1 %v7133_v54 }
 0x532   :  { %2187 = vmatpush1.bf16.msra.mxu0 %v7659_v16 }
 0x533   :  { %2188 = vmatprep.subr.bf16.mxu0 %v7669_v18 }
 0x534   :  { %6381 = vmatpush3.bf16.msra.mxu1 %v6757_v45 }
 0x535   :  { %6382 = vmatprep.subr.bf16.mxu1 %v7133_v54 }
 0x536   :  { %2189 = vmatpush1.bf16.msra.mxu0 %v7675_v20 }
 0x537   :  { %2190 = vmatprep.subr.bf16.mxu0 %v7684_v23 }
 0x53a   :  { %2191 = vmatpush1.bf16.msra.mxu0 %v7690_v24 }
 0x53b   :  { %2192 = vmatprep.subr.bf16.mxu0 %v7700_v28 }
 0x53e   :  { %2193 = vmatpush1.bf16.msra.mxu0 %v7706_v30 }
 0x53f   :  { %2194 = vmatprep.subr.bf16.mxu0 %v7716_v34 }
 0x542   :  { %2195 = vmatpush1.bf16.msra.mxu0 %v7722_v36 }
 0x543   :  { %2196 = vmatprep.subr.bf16.mxu0 %v7732_v39 }
 0x546   :  { %2197 = vmatpush1.bf16.msra.mxu0 %v7738_v42 }
 0x547   :  { %2454 = vmatprep.subr.bf16.mxu0 %v7622_v62  ;;  %v6758_v62 = vld [vmem:[%s8876_s2 + $0x68] ss:$12 sps:$4 sm:$0xff]  }
 0x548   :  { %6383 = vmatpush3.bf16.msra.mxu1 %v6758_v62 }
 0x549   :  { %6384 = vmatprep.subr.bf16.mxu1 %v7133_v54 }
 0x54c   :  { %6385 = vmatpush3.bf16.msra.mxu1 %v6759_v47 }
 0x54d   :  { %6386 = vmatprep.subr.bf16.mxu1 %v7133_v54 }
 0x550   :  { %6387 = vmatpush3.bf16.msra.mxu1 %v6760_v50 }
 0x551   :  { %6388 = vmatprep.subr.bf16.mxu1 %v7133_v54 }
 0x554   :  { %6389 = vmatpush3.bf16.msra.mxu1 %v6761_v27 }
 0x555   :  { %6390 = vmatprep.subr.bf16.mxu1 %v7133_v54 }
 0x558   :  { %6391 = vmatpush3.bf16.msra.mxu1 %v6762_v19 }
 0x559   :  { %6396 = vmatprep.subr.bf16.mxu1 %v7133_v54 }
 0x5e9   :  { %v1944_v55 = vpop.f32.mrf.mxu0  ;;  %v1985_v48 = vpop.f32.mrf.mxu1 }
 0x5ea   :  { %v1991_v29 = vadd.f32 %v1944_v55, %v7488_v38  ;;  %v2005_v21 = vadd.f32 %v7520_v15, %v1985_v48 }
 0x5eb   :  { %v1946_v53 = vpop.f32.mrf.mxu0  ;;  %v6374_v56 = vpop.f32.mrf.mxu1 }
 0x5ec   :  { %v5458_v57 = vmul.f32 -1.442695, %v1991_v29  ;;  %v1998_v5 = vadd.f32 %v1946_v53, %v7490_v40 }
 0x5ed   :  { %v1948_v58 = vpop.f32.mrf.mxu0  ;;  %v1988_v60 = vpop.f32.mrf.mxu1 }
 0x5ee   :  { %6973 = vpow2.f32 %v5458_v57  ;;  %v5459_v33 = vmul.f32 -1.442695, %v1998_v5 }
 0x5ef   :  { %v1949_v61 = vpop.f32.mrf.mxu0  ;;  %v6375_v31 = vpop.f32.mrf.mxu1 }
 0x5f0   :  { %6975 = vpow2.f32 %v5459_v33 }
 0x5fb   :  { %v6974_v59 = vpop.eup %6973 }
 0x5fc   :  { %v1995_v2 = vadd.f32 1.0, %v6974_v59 }
 0x5fd   :  { %v6976_v13 = vpop.eup %6975 }
 0x5fe   :  { %6977 = vrcp.f32 %v1995_v2  ;;  %v2002_v17 = vadd.f32 1.0, %v6976_v13 }
 0x600   :  { %6979 = vrcp.f32 %v2002_v17  ;;  %v6771_v17 = vld [vmem:[%s8875_s1 + $0x168] ss:$12 sps:$4 sm:$0xff]  }
 0x60b   :  { %v6978_v38 = vpop.eup %6977 }
 0x60c   :  { %v2006_v25 = vmul.f32 %v6978_v38, %v2005_v21  ;;  %v6778_v21 = vld [vmem:[%s8875_s1 + $0x158] ss:$12 sps:$4 sm:$0xff]   ;;  %v2575_v38 = vpack.c.bf16 %v7612_v63, %v7523_v41 }
 0x60d   :  { %v6980_v32 = vpop.eup %6979  ;;  %v6779_v41 = vld [vmem:[%s8875_s1 + $0x138] ss:$12 sps:$4 sm:$0xff]  }
 0x60e   :  { %v2007_v35 = vadd.f32 %v2006_v25, %v7515_v11  ;;  %v2009_v4 = vsub.f32 1.0, %v6980_v32  ;;  %v2011_v40 = vmul.f32 %v6980_v32, %v7873_v26  ;;  %v6763_v11 = vld [vmem:[%s8876_s2 + $0xb0] ss:$12 sps:$4 sm:$0xff]   ;;  %v6782_v32 = vld [vmem:[%s8875_s1 + $0x140] ss:$12 sps:$4 sm:$0xff]  }
 0x60f   :  { %v6775_v25 = vld [vmem:[%s8875_s1 + $0x150] ss:$12 sps:$4 sm:$0xff]  }
 0x610   :  { %6981 = vtanh.f32 %v2007_v35  ;;  %v6781_v35 = vld [vmem:[%s8875_s1 + $0x13c] ss:$12 sps:$4 sm:$0xff]   ;;  %v6785_v63 = vld [vmem:[%s8875_s1 + $0x124] ss:$12 sps:$4 sm:$0xff]  }
 0x61d   :  { %v6982_v37 = vpop.eup %6981 }
 0x61e   :  { %v2010_v45 = vmul.f32 %v6982_v37, %v2009_v4  ;;  %v6786_v4 = vld [vmem:[%s8875_s1 + $0x128] ss:$12 sps:$4 sm:$0xff]   ;;  %v6783_v37 = vld [vmem:[%s8875_s1 + $0x120] ss:$12 sps:$4 sm:$0xff]  }
 0x620   :  { %v7933_v62 = vadd.f32 %v2011_v40, %v2010_v45  ;;  %v6789_v45 = vld [vmem:[%s8875_s1 + $0x10c] ss:$12 sps:$4 sm:$0xff]   ;;  %v6790_v40 = vld [vmem:[%s8875_s1 + $0x110] ss:$12 sps:$4 sm:$0xff]  }
 0x622   :  { %v2021_v47 = vpack.c.bf16 %v7933_v62, %v7933_v62 }
 0x624   :  { %2215 = vmatmul.mubr.bf16.vlgmr.msra.gmra.mxu0 %v2021_v47  ;;  %6393 = vmatmul.mubr.bf16.vlgmr.msra.gmra.mxu1 %v2021_v47  ;;  %v6787_v47 = vld [vmem:[%s8875_s1 + $0x108] ss:$12 sps:$4 sm:$0xff]  }
 0x625   :  { %2455 = vmatpush1.bf16.msra.mxu0 %v7627_v3  ;;  %2486 = vmatprep.mubr.bf16.mxu0 %v7132_v1  ;;  %v6764_v3 = vld [vmem:[%s8876_s2 + $0x98] ss:$12 sps:$4 sm:$0xff]  }
 0x626   :  { %2456 = vmatprep.subr.bf16.mxu0 %v7637_v7  ;;  %6412 = vmatprep.mubr.msk.bf16.mxu1 %vm7134_vm0, %v7133_v54  ;;  %v6765_v7 = vld [vmem:[%s8876_s2 + $0x80] ss:$12 sps:$4 sm:$0xff]  }
 0x627   :  { %6397 = vmatpush3.bf16.msra.mxu1 %v6763_v11  ;;  %v6793_v11 = vld [vmem:[%s8875_s1 + $0xf4] ss:$12 sps:$4 sm:$0xff]  }
 0x628   :  { %6398 = vmatprep.subr.bf16.mxu1 %v7133_v54 }
 0x629   :  { %2457 = vmatpush1.bf16.msra.mxu0 %v7643_v10  ;;  %v6766_v10 = vld [vmem:[%s8876_s2 + $0x68] ss:$12 sps:$4 sm:$0xff]  }
 0x62a   :  { %2458 = vmatprep.subr.bf16.mxu0 %v7653_v14  ;;  %v6767_v14 = vld [vmem:[%s8876_s2 + $0x50] ss:$12 sps:$4 sm:$0xff]  }
 0x62b   :  { %6399 = vmatpush3.bf16.msra.mxu1 %v6764_v3  ;;  %v6794_v3 = vld [vmem:[%s8875_s1 + $0xf8] ss:$12 sps:$4 sm:$0xff]  }
 0x62c   :  { %6400 = vmatprep.subr.bf16.mxu1 %v7133_v54 }
 0x62d   :  { %2459 = vmatpush1.bf16.msra.mxu0 %v7659_v16  ;;  %v6773_v16 = vld [vmem:[%s8875_s1 + $0x16c] ss:$12 sps:$4 sm:$0xff]  }
 0x62e   :  { %2460 = vmatprep.subr.bf16.mxu0 %v7669_v18  ;;  %v6768_v18 = vld [vmem:[%s8876_s2 + $0x38] ss:$12 sps:$4 sm:$0xff]  }
 0x62f   :  { %6401 = vmatpush3.bf16.msra.mxu1 %v6765_v7  ;;  %v6791_v7 = vld [vmem:[%s8875_s1 + $0xf0] ss:$12 sps:$4 sm:$0xff]  }
 0x630   :  { %6402 = vmatprep.subr.bf16.mxu1 %v7133_v54 }
 0x631   :  { %2461 = vmatpush1.bf16.msra.mxu0 %v7675_v20  ;;  %v6769_v20 = vld [vmem:[%s8876_s2 + $0x20] ss:$12 sps:$4 sm:$0xff]  }
 0x632   :  { %2462 = vmatprep.subr.bf16.mxu0 %v7684_v23  ;;  %v6770_v23 = vld [vmem:[%s8876_s2 + $0x8] ss:$12 sps:$4 sm:$0xff]  }
 0x633   :  { %6403 = vmatpush3.bf16.msra.mxu1 %v6766_v10  ;;  %v6797_v10 = vld [vmem:[%s8875_s1 + $0xdc] ss:$12 sps:$4 sm:$0xff]  }
 0x634   :  { %6404 = vmatprep.subr.bf16.mxu1 %v7133_v54 }
 0x635   :  { %2463 = vmatpush1.bf16.msra.mxu0 %v7690_v24  ;;  %v6774_v24 = vld [vmem:[%s8875_s1 + $0x170] ss:$12 sps:$4 sm:$0xff]  }
 0x636   :  { %2464 = vmatprep.subr.bf16.mxu0 %v7700_v28 }
 0x637   :  { %6405 = vmatpush3.bf16.msra.mxu1 %v6767_v14  ;;  %v6798_v14 = vld [vmem:[%s8875_s1 + $0xe0] ss:$12 sps:$4 sm:$0xff]  }
 0x638   :  { %6406 = vmatprep.subr.bf16.mxu1 %v7133_v54 }
 0x639   :  { %2465 = vmatpush1.bf16.msra.mxu0 %v7706_v30 }
 0x63a   :  { %2466 = vmatprep.subr.bf16.mxu0 %v7716_v34 }
 0x63b   :  { %6407 = vmatpush3.bf16.msra.mxu1 %v6768_v18  ;;  %v6801_v18 = vld [vmem:[%s8875_s1 + $0xc4] ss:$12 sps:$4 sm:$0xff]  }
 0x63c   :  { %6408 = vmatprep.subr.bf16.mxu1 %v7133_v54 }
 0x63d   :  { %2467 = vmatpush1.bf16.msra.mxu0 %v7722_v36 }
 0x63e   :  { %2468 = vmatprep.subr.bf16.mxu0 %v7732_v39 }
 0x63f   :  { %6409 = vmatpush3.bf16.msra.mxu1 %v6769_v20  ;;  %v6802_v20 = vld [vmem:[%s8875_s1 + $0xc8] ss:$12 sps:$4 sm:$0xff]  }
 0x640   :  { %6410 = vmatprep.subr.bf16.mxu1 %v7133_v54 }
 0x641   :  { %2469 = vmatpush1.bf16.msra.mxu0 %v7738_v42 }
 0x642   :  { %2758 = vmatprep.subr.bf16.mxu0 %v6773_v16  ;;  %v6795_v16 = vld [vmem:[%s8875_s1 + $0xd8] ss:$12 sps:$4 sm:$0xff]  }
 0x643   :  { %6411 = vmatpush3.bf16.msra.mxu1 %v6770_v23  ;;  %v6799_v23 = vld [vmem:[%s8875_s1 + $0xc0] ss:$12 sps:$4 sm:$0xff]  }
 0x644   :  { %6416 = vmatprep.subr.bf16.mxu1 %v6774_v24 }
 0x6e4   :  { %v2216_v28 = vpop.f32.mrf.mxu0  ;;  %v2257_v30 = vpop.f32.mrf.mxu1 }
 0x6e5   :  { %v2263_v34 = vadd.f32 %v2216_v28, %v7492_v43  ;;  %v2277_v60 = vadd.f32 %v7520_v15, %v2257_v30  ;;  %v2577_v28 = vpack.c.bf16 %v7933_v62, %v7873_v26  ;;  %v8093_v26 = vld [vmem:[%s8876_s2 + $0x154] ss:$12 sps:$4 sm:$0xff]   ;;  %v8105_v30 = vld [vmem:[%s8876_s2 + $0x13c] ss:$12 sps:$4 sm:$0xff]  }
 0x6e6   :  { %v2218_v36 = vpop.f32.mrf.mxu0  ;;  %v6394_v39 = vpop.f32.mrf.mxu1 }
 0x6e7   :  { %v5484_v42 = vmul.f32 -1.442695, %v2263_v34  ;;  %v2270_v48 = vadd.f32 %v2218_v36, %v7495_v46  ;;  %v8110_v34 = vld [vmem:[%s8876_s2 + $0x138] ss:$12 sps:$4 sm:$0xff]   ;;  %v8122_v39 = vld [vmem:[%s8876_s2 + $0x120] ss:$12 sps:$4 sm:$0xff]  }
 0x6e8   :  { %v2220_v50 = vpop.f32.mrf.mxu0  ;;  %v2260_v27 = vpop.f32.mrf.mxu1  ;;  %v8117_v36 = vld [vmem:[%s8876_s2 + $0x124] ss:$12 sps:$4 sm:$0xff]  }
 0x6e9   :  { %6983 = vpow2.f32 %v5484_v42  ;;  %v5485_v29 = vmul.f32 -1.442695, %v2270_v48  ;;  %v8129_v42 = vld [vmem:[%s8876_s2 + $0x10c] ss:$12 sps:$4 sm:$0xff]   ;;  %v8134_v50 = vld [vmem:[%s8876_s2 + $0x108] ss:$12 sps:$4 sm:$0xff]  }
 0x6ea   :  { %v2221_v19 = vpop.f32.mrf.mxu0  ;;  %v6395_v55 = vpop.f32.mrf.mxu1  ;;  %v8141_v27 = vld [vmem:[%s8876_s2 + $0xf4] ss:$12 sps:$4 sm:$0xff]   ;;  %v8158_v48 = vld [vmem:[%s8876_s2 + $0xd8] ss:$12 sps:$4 sm:$0xff]  }
 0x6eb   :  { %6985 = vpow2.f32 %v5485_v29  ;;  %v8146_v19 = vld [vmem:[%s8876_s2 + $0xf0] ss:$12 sps:$4 sm:$0xff]  }
 0x6ec   :  { %v8151_v55 = vld [vmem:[%s8876_s2 + $0xdc] ss:$12 sps:$4 sm:$0xff]   ;;  %v8164_v29 = vld [vmem:[%s8876_s2 + $0xc4] ss:$12 sps:$4 sm:$0xff]  }
 0x6f6   :  { %v6984_v53 = vpop.eup %6983 }
 0x6f7   :  { %v2267_v56 = vadd.f32 1.0, %v6984_v53  ;;  %v6827_v53 = vld [vmem:[%s8876_s2 + $0x170] ss:$12 sps:$4 sm:$0xff]  }
 0x6f8   :  { %v6986_v57 = vpop.eup %6985 }
 0x6f9   :  { %6987 = vrcp.f32 %v2267_v56  ;;  %v2274_v58 = vadd.f32 1.0, %v6986_v57  ;;  %v8173_v56 = vld [vmem:[%s8876_s2 + $0xc0] ss:$12 sps:$4 sm:$0xff]   ;;  %v6828_v57 = vld [vmem:[%s8876_s2 + $0x158] ss:$12 sps:$4 sm:$0xff]  }
 0x6fb   :  { %6989 = vrcp.f32 %v2274_v58  ;;  %v6829_v58 = vld [vmem:[%s8876_s2 + $0x140] ss:$12 sps:$4 sm:$0xff]  }
 0x706   :  { %v6988_v43 = vpop.eup %6987 }
 0x707   :  { %v2278_v61 = vmul.f32 %v6988_v43, %v2277_v60  ;;  %v6830_v60 = vld [vmem:[%s8876_s2 + $0x128] ss:$12 sps:$4 sm:$0xff]   ;;  %v6831_v43 = vld [vmem:[%s8876_s2 + $0x110] ss:$12 sps:$4 sm:$0xff]  }
 0x708   :  { %v6990_v5 = vpop.eup %6989 }
 0x709   :  { %v2279_v31 = vadd.f32 %v2278_v61, %v7509_v0  ;;  %v2281_v33 = vsub.f32 1.0, %v6990_v5  ;;  %v2283_v46 = vmul.f32 %v6990_v5, %v7933_v62  ;;  %v6777_v0 = vld [vmem:[%s8875_s1 + $0x154] ss:$12 sps:$4 sm:$0xff]   ;;  %v8098_v62 = vld [vmem:[%s8876_s2 + $0x150] ss:$12 sps:$4 sm:$0xff]  }
 0x70a   :  { %v6832_v61 = vld [vmem:[%s8876_s2 + $0xf8] ss:$12 sps:$4 sm:$0xff]   ;;  %v6834_v5 = vld [vmem:[%s8876_s2 + $0xc8] ss:$12 sps:$4 sm:$0xff]  }
 0x70b   :  { %6991 = vtanh.f32 %v2279_v31  ;;  %v6833_v31 = vld [vmem:[%s8876_s2 + $0xe0] ss:$12 sps:$4 sm:$0xff]  }
 0x718   :  { %v6992_v59 = vpop.eup %6991 }
 0x719   :  { %v2282_v2 = vmul.f32 %v6992_v59, %v2281_v33 }
 0x71b   :  { %v7997_v13 = vadd.f32 %v2283_v46, %v2282_v2 }
 0x71d   :  { %v2293_v15 = vpack.c.bf16 %v7997_v13, %v7997_v13 }
 0x71f   :  { %2487 = vmatmul.mubr.bf16.vlgmr.msra.gmra.mxu0 %v2293_v15  ;;  %6413 = vmatmul.mubr.bf16.vlgmr.msra.gmra.mxu1 %v2293_v15 }
 0x720   :  { %2759 = vmatpush1.bf16.msra.mxu0 %v6771_v17  ;;  %6417 = vmatpush3.bf16.msra.mxu1 %v6774_v24  ;;  %v2576_v24 = vpack.c.bf16 %v7813_v22, %v7753_v51  ;;  %v8081_v51 = vld [vmem:[%s8876_s2 + $0x16c] ss:$12 sps:$4 sm:$0xff]   ;;  %v8086_v22 = vld [vmem:[%s8876_s2 + $0x168] ss:$12 sps:$4 sm:$0xff]  }
 0x721   :  { %6432 = vmatprep.mubr.bf16.mxu1 %v2575_v38  ;;  %2760 = vmatprep.subr.bf16.mxu0 %v6777_v0 }
 0x722   :  { %6418 = vmatprep.subr.bf16.mxu1 %v6778_v21  ;;  %2790 = vmatprep.mubr.bf16.mxu0 %v7132_v1 }
 0x724   :  { %2761 = vmatpush1.bf16.msra.mxu0 %v6775_v25  ;;  %6419 = vmatpush3.bf16.msra.mxu1 %v6778_v21 }
 0x725   :  { %2762 = vmatprep.subr.bf16.mxu0 %v6781_v35  ;;  %6420 = vmatprep.subr.bf16.mxu1 %v6782_v32 }
 0x728   :  { %2763 = vmatpush1.bf16.msra.mxu0 %v6779_v41  ;;  %6421 = vmatpush3.bf16.msra.mxu1 %v6782_v32 }
 0x729   :  { %2764 = vmatprep.subr.bf16.mxu0 %v6785_v63  ;;  %6422 = vmatprep.subr.bf16.mxu1 %v6786_v4 }
 0x72c   :  { %2765 = vmatpush1.bf16.msra.mxu0 %v6783_v37  ;;  %6423 = vmatpush3.bf16.msra.mxu1 %v6786_v4 }
 0x72d   :  { %2766 = vmatprep.subr.bf16.mxu0 %v6789_v45  ;;  %6424 = vmatprep.subr.bf16.mxu1 %v6790_v40 }
 0x730   :  { %2767 = vmatpush1.bf16.msra.mxu0 %v6787_v47  ;;  %6425 = vmatpush3.bf16.msra.mxu1 %v6790_v40 }
 0x731   :  { %2768 = vmatprep.subr.bf16.mxu0 %v6793_v11  ;;  %6426 = vmatprep.subr.bf16.mxu1 %v6794_v3 }
 0x734   :  { %2769 = vmatpush1.bf16.msra.mxu0 %v6791_v7  ;;  %6427 = vmatpush3.bf16.msra.mxu1 %v6794_v3 }
 0x735   :  { %2770 = vmatprep.subr.bf16.mxu0 %v6797_v10  ;;  %6428 = vmatprep.subr.bf16.mxu1 %v6798_v14 }
 0x738   :  { %2771 = vmatpush1.bf16.msra.mxu0 %v6795_v16  ;;  %6429 = vmatpush3.bf16.msra.mxu1 %v6798_v14 }
 0x739   :  { %2772 = vmatprep.subr.bf16.mxu0 %v6801_v18  ;;  %6430 = vmatprep.subr.bf16.mxu1 %v6802_v20 }
 0x73c   :  { %2773 = vmatpush1.bf16.msra.mxu0 %v6799_v23  ;;  %6431 = vmatpush3.bf16.msra.mxu1 %v6802_v20  ;;  %v6837_v20 = vld [vmem:[%s8876_s2 + $0x140] ss:$12 sps:$4 sm:$0xff]   ;;  %v6838_v23 = vld [vmem:[%s8876_s2 + $0x128] ss:$12 sps:$4 sm:$0xff]  }
 0x73d   :  { %6440 = vmatprep.subr.bf16.mxu1 %v7133_v54  ;;  %3084 = vmatprep.subr.bf16.mxu0 %v8081_v51 }
 0x73f   :  { %2791 = vmatmul.mubr.bf16.vlgmr.msra.gmra.mxu0 %v2575_v38  ;;  %6433 = vmatmul.mubr.bf16.vlgmr.msra.gmra.mxu1 %v2576_v24 }
 0x740   :  { %6436 = vmatprep.mubr.bf16.mxu1 %v2577_v28  ;;  %2800 = vmatprep.mubr.bf16.mxu0 %v7132_v1 }
 0x741   :  { %3085 = vmatpush1.bf16.msra.mxu0 %v8086_v22  ;;  %6441 = vmatpush3.bf16.msra.mxu1 %v6827_v53  ;;  %v6841_v53 = vld [vmem:[%s8876_s2 + $0xe0] ss:$12 sps:$4 sm:$0xff]  }
 0x742   :  { %3086 = vmatprep.subr.bf16.mxu0 %v8093_v26  ;;  %6442 = vmatprep.subr.bf16.mxu1 %v7133_v54 }
 0x745   :  { %3087 = vmatpush1.bf16.msra.mxu0 %v8098_v62  ;;  %6443 = vmatpush3.bf16.msra.mxu1 %v6828_v57  ;;  %v6842_v57 = vld [vmem:[%s8876_s2 + $0xc8] ss:$12 sps:$4 sm:$0xff]  }
 0x746   :  { %3088 = vmatprep.subr.bf16.mxu0 %v8105_v30  ;;  %6444 = vmatprep.subr.bf16.mxu1 %v7133_v54 }
 0x747   :  { %2801 = vmatmul.mubr.bf16.gmra.mxu0 %v2576_v24  ;;  %v6839_v24 = vld [vmem:[%s8876_s2 + $0x110] ss:$12 sps:$4 sm:$0xff]  }
 0x748   :  { %2810 = vmatprep.mubr.bf16.mxu0 %v7132_v1 }
 0x749   :  { %3089 = vmatpush1.bf16.msra.mxu0 %v8110_v34  ;;  %6445 = vmatpush3.bf16.msra.mxu1 %v6829_v58 }
 0x74a   :  { %3090 = vmatprep.subr.bf16.mxu0 %v8117_v36  ;;  %6446 = vmatprep.subr.bf16.mxu1 %v7133_v54 }
 0x74d   :  { %3091 = vmatpush1.bf16.msra.mxu0 %v8122_v39  ;;  %6447 = vmatpush3.bf16.msra.mxu1 %v6830_v60 }
 0x74e   :  { %3092 = vmatprep.subr.bf16.mxu0 %v8129_v42  ;;  %6448 = vmatprep.subr.bf16.mxu1 %v7133_v54 }
 0x74f   :  { %2811 = vmatmul.mubr.bf16.gmra.mxu0 %v2577_v28  ;;  %v6840_v28 = vld [vmem:[%s8876_s2 + $0xf8] ss:$12 sps:$4 sm:$0xff]  }
 0x750   :  { %2820 = vmatprep.mubr.bf16.mxu0 %v7132_v1 }
 0x751   :  { %3093 = vmatpush1.bf16.msra.mxu0 %v8134_v50  ;;  %6449 = vmatpush3.bf16.msra.mxu1 %v6831_v43 }
 0x752   :  { %3094 = vmatprep.subr.bf16.mxu0 %v8141_v27  ;;  %6450 = vmatprep.subr.bf16.mxu1 %v7133_v54 }
 0x755   :  { %3095 = vmatpush1.bf16.msra.mxu0 %v8146_v19  ;;  %6451 = vmatpush3.bf16.msra.mxu1 %v6832_v61 }
 0x756   :  { %3096 = vmatprep.subr.bf16.mxu0 %v8151_v55  ;;  %6452 = vmatprep.subr.bf16.mxu1 %v7133_v54 }
 0x759   :  { %3097 = vmatpush1.bf16.msra.mxu0 %v8158_v48  ;;  %6453 = vmatpush3.bf16.msra.mxu1 %v6833_v31 }
 0x75a   :  { %3098 = vmatprep.subr.bf16.mxu0 %v8164_v29  ;;  %6454 = vmatprep.subr.bf16.mxu1 %v7133_v54 }
 0x75d   :  { %3099 = vmatpush1.bf16.msra.mxu0 %v8173_v56  ;;  %6455 = vmatpush3.bf16.msra.mxu1 %v6834_v5 }
 0x75e   :  { %3352 = vmatprep.subr.bf16.mxu0 %v8081_v51  ;;  %6460 = vmatprep.subr.bf16.mxu1 %v7133_v54 }
 0x7df   :  { %v2488_v33 = vpop.f32.mrf.mxu0  ;;  %v2529_v59 = vpop.f32.mrf.mxu1 }
 0x7e0   :  { %v2535_v2 = vadd.f32 %v2488_v33, %v7497_v49  ;;  %v7130_v49 = vld [vmem:[%s8879_s4] ss:$0 sm:$0xff] }
 0x7e1   :  { %v2490_v46 = vpop.f32.mrf.mxu0  ;;  %v6414_v17 = vpop.f32.mrf.mxu1  ;;  %v2549_v45 = vadd.f32 %v7130_v49, %v2529_v59 }
 0x7e2   :  { %v5510_v15 = vmul.f32 -1.442695, %v2535_v2  ;;  %v2542_v35 = vadd.f32 %v2490_v46, %v7501_v52 }
 0x7e3   :  { %v2492_v0 = vpop.f32.mrf.mxu0  ;;  %v2532_v21 = vpop.f32.mrf.mxu1 }
 0x7e4   :  { %6993 = vpow2.f32 %v5510_v15  ;;  %v5511_v32 = vmul.f32 -1.442695, %v2542_v35  ;;  %v5546_v35 = vld [vmem:[%s8878_s3 + $0x3] sm:$0x7] }
 0x7e5   :  { %v2493_v38 = vpop.f32.mrf.mxu0  ;;  %v6415_v25 = vpop.f32.mrf.mxu1 }
 0x7e6   :  { %6995 = vpow2.f32 %v5511_v32 }
 0x7f1   :  { %v6994_v41 = vpop.eup %6993 }
 0x7f2   :  { %v2539_v63 = vadd.f32 1.0, %v6994_v41 }
 0x7f3   :  { %v6996_v4 = vpop.eup %6995 }
 0x7f4   :  { %6997 = vrcp.f32 %v2539_v63  ;;  %v2546_v37 = vadd.f32 1.0, %v6996_v4 }
 0x7f6   :  { %6999 = vrcp.f32 %v2546_v37  ;;  %v8310_v37 = vrot.slane %v5546_v35, %v82_v9 }
 0x7ff   :  { %v2792_v58 = vpop.f32.mrf.mxu0  ;;  %v8283_v2 = vpop.f32.mrf.mxu1 }
 0x801   :  { %v6998_v40 = vpop.eup %6997  ;;  %v2794_v60 = vpop.f32.mrf.mxu0 }
 0x802   :  { %v2550_v47 = vmul.f32 %v6998_v40, %v2549_v45  ;;  %v2865_v17 = vpop.f32.mrf.mxu1 }
 0x803   :  { %v7000_v3 = vpop.eup %6999  ;;  %v8271_v43 = vpop.f32.mrf.mxu0 }
 0x804   :  { %v2551_v11 = vadd.f32 %v2550_v47, %v7513_v6  ;;  %v2553_v52 = vsub.f32 1.0, %v7000_v3  ;;  %v2555_v14 = vmul.f32 %v7000_v3, %v7997_v13  ;;  %v6835_v6 = vld [vmem:[%s8876_s2 + $0x170] ss:$12 sps:$4 sm:$0xff]   ;;  %v8289_v0 = vpop.f32.mrf.mxu1 }
 0x805   :  { %v8273_v61 = vpop.f32.mrf.mxu0 }
 0x806   :  { %7001 = vtanh.f32 %v2551_v11  ;;  %v8293_v38 = vpop.f32.mrf.mxu1  ;;  %v2793_v11 = vadd.f32 %v2792_v58, %v8310_v37 }
 0x807   :  { %v8275_v31 = vpop.f32.mrf.mxu0 }
 0x809   :  { %v8277_v5 = vpop.f32.mrf.mxu0 }
 0x80b   :  { %v8279_v33 = vpop.f32.mrf.mxu0 }
 0x80d   :  { %v8281_v59 = vpop.f32.mrf.mxu0 }
 0x80f   :  { %v8285_v46 = vpop.f32.mrf.mxu0 }
 0x811   :  { %v8287_v15 = vpop.f32.mrf.mxu0 }
 0x813   :  { %v7002_v7 = vpop.eup %7001  ;;  %v8291_v21 = vpop.f32.mrf.mxu0 }
 0x814   :  { %v2554_v10 = vmul.f32 %v7002_v7, %v2553_v52  ;;  %v8323_v7 = vrot.slane %v5546_v35, %v86_v12  ;;  %v8329_v12 = vld [vmem:[%s8879_s4 + $0x1] ss:$0 sm:$0xff] }
 0x815   :  { %v8295_v25 = vpop.f32.mrf.mxu0 }
 0x816   :  { %v2556_v16 = vadd.f32 %v2555_v14, %v2554_v10 }
 0x818   :  { %v2578_v18 = vpack.c.bf16 %v2556_v16, %v7997_v13  ;;  %v6836_v13 = vld [vmem:[%s8876_s2 + $0x158] ss:$12 sps:$4 sm:$0xff]  }
 0x81a   :  { %2821 = vmatmul.mubr.bf16.gmra.mxu0 %v2578_v18  ;;  %6437 = vmatmul.mubr.bf16.gmra.mxu1 %v2578_v18 }
 0x81b   :  { %3116 = vmatprep.mubr.bf16.mxu0 %v7132_v1  ;;  %6456 = vmatprep.mubr.msk.bf16.mxu1 %vm7134_vm0, %v7133_v54 }
 0x822   :  { %3117 = vmatmul.mubr.bf16.vlgmr.msra.gmra.mxu0 %v7132_v1  ;;  %6457 = vmatmul.mubr.bf16.vlgmr.msra.gmra.mxu1 %v7132_v1 }
 0x823   :  { %3353 = vmatpush1.bf16.msra.mxu0 %v8086_v22  ;;  %3384 = vmatprep.mubr.bf16.mxu0 %v7132_v1 }
 0x824   :  { %3354 = vmatprep.subr.bf16.mxu0 %v8093_v26  ;;  %6476 = vmatprep.mubr.msk.bf16.mxu1 %vm7134_vm0, %v7133_v54 }
 0x825   :  { %6461 = vmatpush3.bf16.msra.mxu1 %v6835_v6 }
 0x826   :  { %6462 = vmatprep.subr.bf16.mxu1 %v7133_v54 }
 0x827   :  { %3355 = vmatpush1.bf16.msra.mxu0 %v8098_v62 }
 0x828   :  { %3356 = vmatprep.subr.bf16.mxu0 %v8105_v30 }
 0x829   :  { %6463 = vmatpush3.bf16.msra.mxu1 %v6836_v13  ;;  %v2795_v13 = vadd.f32 %v2794_v60, %v8323_v7  ;;  %v8334_v60 = vrot.slane %v5546_v35, %v90_v44  ;;  %v6844_v44 = vld [vmem:[%s8876_s2 + $0x158] ss:$12 sps:$4 sm:$0xff]   ;;  %v6847_v35 = vld [vmem:[%s8876_s2 + $0x110] ss:$12 sps:$4 sm:$0xff]  }
 0x82a   :  { %6464 = vmatprep.subr.bf16.mxu1 %v7133_v54 }
 0x82b   :  { %3357 = vmatpush1.bf16.msra.mxu0 %v8110_v34 }
 0x82c   :  { %3358 = vmatprep.subr.bf16.mxu0 %v8117_v36 }
 0x82d   :  { %6465 = vmatpush3.bf16.msra.mxu1 %v6837_v20 }
 0x82e   :  { %6466 = vmatprep.subr.bf16.mxu1 %v7133_v54 }
 0x82f   :  { %3359 = vmatpush1.bf16.msra.mxu0 %v8122_v39 }
 0x830   :  { %3360 = vmatprep.subr.bf16.mxu0 %v8129_v42 }
 0x831   :  { %6467 = vmatpush3.bf16.msra.mxu1 %v6838_v23 }
 0x832   :  { %6468 = vmatprep.subr.bf16.mxu1 %v7133_v54 }
 0x833   :  { %3361 = vmatpush1.bf16.msra.mxu0 %v8134_v50 }
 0x834   :  { %3362 = vmatprep.subr.bf16.mxu0 %v8141_v27 }
 0x835   :  { %6469 = vmatpush3.bf16.msra.mxu1 %v6839_v24 }
 0x836   :  { %6470 = vmatprep.subr.bf16.mxu1 %v7133_v54 }
 0x837   :  { %3363 = vmatpush1.bf16.msra.mxu0 %v8146_v19 }
 0x838   :  { %3364 = vmatprep.subr.bf16.mxu0 %v8151_v55 }
 0x839   :  { %6471 = vmatpush3.bf16.msra.mxu1 %v6840_v28 }
 0x83a   :  { %6472 = vmatprep.subr.bf16.mxu1 %v7133_v54 }
 0x83b   :  { %3365 = vmatpush1.bf16.msra.mxu0 %v8158_v48 }
 0x83c   :  { %3366 = vmatprep.subr.bf16.mxu0 %v8164_v29 }
 0x83d   :  { %6473 = vmatpush3.bf16.msra.mxu1 %v6841_v53 }
 0x83e   :  { %6474 = vmatprep.subr.bf16.mxu1 %v7133_v54 }
 0x83f   :  { %3367 = vmatpush1.bf16.msra.mxu0 %v8173_v56 }
 0x840   :  { %3620 = vmatprep.subr.bf16.mxu0 %v8081_v51 }
 0x841   :  { %6475 = vmatpush3.bf16.msra.mxu1 %v6842_v57 }
 0x842   :  { %6480 = vmatprep.subr.bf16.mxu1 %v7133_v54 }
 0x8da   :  { %v8300_v32 = vpop.f32.mrf.mxu0  ;;  %v8302_v41 = vpop.f32.mrf.mxu1 }
 0x8dc   :  { %v8304_v63 = vpop.f32.mrf.mxu0  ;;  %v8306_v4 = vpop.f32.mrf.mxu1 }
 0x8de   :  { %v8312_v49 = vpop.f32.mrf.mxu0  ;;  %v8314_v45 = vpop.f32.mrf.mxu1 }
 0x8e0   :  { %v8316_v40 = vpop.f32.mrf.mxu0  ;;  %v8318_v47 = vpop.f32.mrf.mxu1 }
 0x8e2   :  { %v3118_v3 = vpop.f32.mrf.mxu0  ;;  %v3159_v52 = vpop.f32.mrf.mxu1 }
 0x8e3   :  { %v3165_v10 = vadd.f32 %v3118_v3, %v2793_v11  ;;  %v3179_v3 = vadd.f32 %v8329_v12, %v3159_v52 }
 0x8e4   :  { %v3120_v14 = vpop.f32.mrf.mxu0  ;;  %v6458_v9 = vpop.f32.mrf.mxu1 }
 0x8e5   :  { %v5627_v16 = vmul.f32 -1.442695, %v3165_v10  ;;  %v3172_v24 = vadd.f32 %v3120_v14, %v2795_v13  ;;  %v2866_v14 = vadd.f32 %v2865_v17, %v8334_v60  ;;  %v6845_v17 = vld [vmem:[%s8876_s2 + $0x140] ss:$12 sps:$4 sm:$0xff]  }
 0x8e6   :  { %v3122_v18 = vpop.f32.mrf.mxu0  ;;  %v3162_v6 = vpop.f32.mrf.mxu1 }
 0x8e7   :  { %7003 = vpow2.f32 %v5627_v16  ;;  %v5628_v28 = vmul.f32 -1.442695, %v3172_v24 }
 0x8e8   :  { %v3123_v20 = vpop.f32.mrf.mxu0  ;;  %v6459_v23 = vpop.f32.mrf.mxu1 }
 0x8e9   :  { %7005 = vpow2.f32 %v5628_v28  ;;  %v6848_v28 = vld [vmem:[%s8876_s2 + $0xf8] ss:$12 sps:$4 sm:$0xff]  }
 0x8f4   :  { %v7004_v53 = vpop.eup %7003 }
 0x8f5   :  { %v3169_v57 = vadd.f32 1.0, %v7004_v53  ;;  %v6849_v53 = vld [vmem:[%s8876_s2 + $0xe0] ss:$12 sps:$4 sm:$0xff]  }
 0x8f6   :  { %v7006_v58 = vpop.eup %7005 }
 0x8f7   :  { %7007 = vrcp.f32 %v3169_v57  ;;  %v3176_v11 = vadd.f32 1.0, %v7006_v58  ;;  %v6850_v57 = vld [vmem:[%s8876_s2 + $0xc8] ss:$12 sps:$4 sm:$0xff]   ;;  %v2797_v58 = vadd.f32 %v8271_v43, %v8310_v37 }
 0x8f9   :  { %7009 = vrcp.f32 %v3176_v11 }
 0x904   :  { %v7008_v10 = vpop.eup %7007 }
 0x905   :  { %v3180_v9 = vmul.f32 %v7008_v10, %v3179_v3 }
 0x906   :  { %v7010_v18 = vpop.eup %7009 }
 0x907   :  { %v3181_v16 = vadd.f32 %v3180_v9, %v2866_v14  ;;  %v3183_v6 = vsub.f32 1.0, %v7010_v18  ;;  %v3185_v23 = vmul.f32 0.0, %v7010_v18 }
 0x909   :  { %7011 = vtanh.f32 %v3181_v16 }
 0x916   :  { %v7012_v13 = vpop.eup %7011 }
 0x917   :  { %v3184_v20 = vmul.f32 %v7012_v13, %v3183_v6  ;;  %v2799_v13 = vadd.f32 %v8273_v61, %v8323_v7 }
 0x919   :  { %v8337_v24 = vadd.f32 %v3185_v23, %v3184_v20 }
 0x91b   :  { %v3191_v52 = vpack.c.bf16 %v8337_v24, %v8337_v24 }
 0x91d   :  { %3385 = vmatmul.mubr.bf16.vlgmr.msra.gmra.mxu0 %v3191_v52  ;;  %6477 = vmatmul.mubr.bf16.vlgmr.msra.gmra.mxu1 %v3191_v52 }
 0x91e   :  { %3621 = vmatpush1.bf16.msra.mxu0 %v8086_v22  ;;  %3652 = vmatprep.mubr.bf16.mxu0 %v7132_v1 }
 0x91f   :  { %3622 = vmatprep.subr.bf16.mxu0 %v8093_v26  ;;  %6496 = vmatprep.mubr.msk.bf16.mxu1 %vm7134_vm0, %v7133_v54 }
 0x920   :  { %6481 = vmatpush3.bf16.msra.mxu1 %v6843_v8 }
 0x921   :  { %6482 = vmatprep.subr.bf16.mxu1 %v7133_v54 }
 0x922   :  { %3623 = vmatpush1.bf16.msra.mxu0 %v8098_v62 }
 0x923   :  { %3624 = vmatprep.subr.bf16.mxu0 %v8105_v30 }
 0x924   :  { %6483 = vmatpush3.bf16.msra.mxu1 %v6844_v44 }
 0x925   :  { %6484 = vmatprep.subr.bf16.mxu1 %v7133_v54 }
 0x926   :  { %3625 = vmatpush1.bf16.msra.mxu0 %v8110_v34 }
 0x927   :  { %3626 = vmatprep.subr.bf16.mxu0 %v8117_v36 }
 0x928   :  { %6485 = vmatpush3.bf16.msra.mxu1 %v6845_v17 }
 0x929   :  { %6486 = vmatprep.subr.bf16.mxu1 %v7133_v54 }
 0x92a   :  { %3627 = vmatpush1.bf16.msra.mxu0 %v8122_v39 }
 0x92b   :  { %3628 = vmatprep.subr.bf16.mxu0 %v8129_v42 }
 0x92e   :  { %3629 = vmatpush1.bf16.msra.mxu0 %v8134_v50 }
 0x92f   :  { %3630 = vmatprep.subr.bf16.mxu0 %v8141_v27 }
 0x932   :  { %3631 = vmatpush1.bf16.msra.mxu0 %v8146_v19 }
 0x933   :  { %3632 = vmatprep.subr.bf16.mxu0 %v8151_v55 }
 0x936   :  { %3633 = vmatpush1.bf16.msra.mxu0 %v8158_v48 }
 0x937   :  { %3634 = vmatprep.subr.bf16.mxu0 %v8164_v29 }
 0x93a   :  { %3635 = vmatpush1.bf16.msra.mxu0 %v8173_v56 }
 0x93b   :  { %3888 = vmatprep.subr.bf16.mxu0 %v8081_v51  ;;  %v6846_v51 = vld [vmem:[%s8876_s2 + $0x128] ss:$12 sps:$4 sm:$0xff]  }
 0x93c   :  { %6487 = vmatpush3.bf16.msra.mxu1 %v6846_v51 }
 0x93d   :  { %6488 = vmatprep.subr.bf16.mxu1 %v7133_v54 }
 0x940   :  { %6489 = vmatpush3.bf16.msra.mxu1 %v6847_v35 }
 0x941   :  { %6490 = vmatprep.subr.bf16.mxu1 %v7133_v54 }
 0x944   :  { %6491 = vmatpush3.bf16.msra.mxu1 %v6848_v28 }
 0x945   :  { %6492 = vmatprep.subr.bf16.mxu1 %v7133_v54 }
 0x948   :  { %6493 = vmatpush3.bf16.msra.mxu1 %v6849_v53  ;;  %v2869_v53 = vadd.f32 %v8293_v38, %v8334_v60 }
 0x949   :  { %6494 = vmatprep.subr.bf16.mxu1 %v7133_v54 }
 0x94c   :  { %6495 = vmatpush3.bf16.msra.mxu1 %v6850_v57 }
 0x94d   :  { %6500 = vmatprep.subr.bf16.mxu1 %v7133_v54 }
 0x9dd   :  { %v3386_v11 = vpop.f32.mrf.mxu0  ;;  %v3427_v3 = vpop.f32.mrf.mxu1 }
 0x9de   :  { %v3433_v10 = vadd.f32 %v3386_v11, %v2797_v58  ;;  %v3447_v35 = vadd.f32 %v8329_v12, %v3427_v3 }
 0x9df   :  { %v3388_v14 = vpop.f32.mrf.mxu0  ;;  %v6478_v9 = vpop.f32.mrf.mxu1 }
 0x9e0   :  { %v5685_v16 = vmul.f32 -1.442695, %v3433_v10  ;;  %v3440_v52 = vadd.f32 %v3388_v14, %v2799_v13 }
 0x9e1   :  { %v3390_v18 = vpop.f32.mrf.mxu0  ;;  %v3430_v6 = vpop.f32.mrf.mxu1 }
 0x9e2   :  { %7013 = vpow2.f32 %v5685_v16  ;;  %v5686_v8 = vmul.f32 -1.442695, %v3440_v52  ;;  %v2805_v6 = vadd.f32 %v8277_v5, %v8323_v7 }
 0x9e3   :  { %v3391_v20 = vpop.f32.mrf.mxu0  ;;  %v6479_v23 = vpop.f32.mrf.mxu1 }
 0x9e4   :  { %7015 = vpow2.f32 %v5686_v8 }
 0x9ef   :  { %v7014_v44 = vpop.eup %7013 }
 0x9f0   :  { %v3437_v17 = vadd.f32 1.0, %v7014_v44 }
 0x9f1   :  { %v7016_v43 = vpop.eup %7015 }
 0x9f2   :  { %7017 = vrcp.f32 %v3437_v17  ;;  %v3444_v51 = vadd.f32 1.0, %v7016_v43 }
 0x9f4   :  { %7019 = vrcp.f32 %v3444_v51 }
 0x9ff   :  { %v7018_v28 = vpop.eup %7017 }
 0xa00   :  { %v3448_v57 = vmul.f32 %v7018_v28, %v3447_v35  ;;  %v2874_v35 = vadd.f32 %v8283_v2, %v8334_v60  ;;  %v8472_v2 = vld [vmem:[%s8876_s2 + $0x16c] ss:$12 sps:$4 sm:$0xff]  }
 0xa01   :  { %v7020_v58 = vpop.eup %7019 }
 0xa02   :  { %v3449_v61 = vadd.f32 %v3448_v57, %v2869_v53  ;;  %v3451_v11 = vsub.f32 1.0, %v7020_v58  ;;  %v3453_v9 = vmul.f32 %v7020_v58, %v8337_v24 }
 0xa04   :  { %7021 = vtanh.f32 %v3449_v61 }
 0xa11   :  { %v7022_v10 = vpop.eup %7021 }
 0xa12   :  { %v3452_v14 = vmul.f32 %v7022_v10, %v3451_v11 }
 0xa14   :  { %v8400_v16 = vadd.f32 %v3453_v9, %v3452_v14  ;;  %v8477_v9 = vld [vmem:[%s8876_s2 + $0x168] ss:$12 sps:$4 sm:$0xff]  }
 0xa16   :  { %v3459_v18 = vpack.c.bf16 %v8400_v16, %v8400_v16 }
 0xa18   :  { %3653 = vmatmul.mubr.bf16.vlgmr.msra.gmra.mxu0 %v3459_v18  ;;  %6497 = vmatmul.mubr.bf16.vlgmr.msra.gmra.mxu1 %v3459_v18  ;;  %v6862_v18 = vld [vmem:[%s8876_s2 + $0x170] ss:$12 sps:$4 sm:$0xff]  }
 0xa19   :  { %3889 = vmatpush1.bf16.msra.mxu0 %v8086_v22  ;;  %3920 = vmatprep.mubr.bf16.mxu0 %v7132_v1  ;;  %v6851_v22 = vld [vmem:[%s8876_s2 + $0x170] ss:$12 sps:$4 sm:$0xff]  }
 0xa1a   :  { %3890 = vmatprep.subr.bf16.mxu0 %v8093_v26  ;;  %6516 = vmatprep.mubr.msk.bf16.mxu1 %vm7134_vm0, %v7133_v54  ;;  %v6852_v26 = vld [vmem:[%s8876_s2 + $0x158] ss:$12 sps:$4 sm:$0xff]  }
 0xa1b   :  { %6501 = vmatpush3.bf16.msra.mxu1 %v6851_v22  ;;  %v8487_v22 = vld [vmem:[%s8876_s2 + $0x154] ss:$12 sps:$4 sm:$0xff]  }
 0xa1c   :  { %6502 = vmatprep.subr.bf16.mxu1 %v7133_v54 }
 0xa1d   :  { %3891 = vmatpush1.bf16.msra.mxu0 %v8098_v62  ;;  %v6853_v62 = vld [vmem:[%s8876_s2 + $0x140] ss:$12 sps:$4 sm:$0xff]  }
 0xa1e   :  { %3892 = vmatprep.subr.bf16.mxu0 %v8105_v30  ;;  %v6854_v30 = vld [vmem:[%s8876_s2 + $0x128] ss:$12 sps:$4 sm:$0xff]  }
 0xa1f   :  { %6503 = vmatpush3.bf16.msra.mxu1 %v6852_v26  ;;  %v8493_v26 = vld [vmem:[%s8876_s2 + $0x150] ss:$12 sps:$4 sm:$0xff]  }
 0xa20   :  { %6504 = vmatprep.subr.bf16.mxu1 %v7133_v54 }
 0xa21   :  { %3893 = vmatpush1.bf16.msra.mxu0 %v8110_v34  ;;  %v6855_v34 = vld [vmem:[%s8876_s2 + $0x110] ss:$12 sps:$4 sm:$0xff]  }
 0xa22   :  { %3894 = vmatprep.subr.bf16.mxu0 %v8117_v36  ;;  %v6856_v36 = vld [vmem:[%s8876_s2 + $0xf8] ss:$12 sps:$4 sm:$0xff]  }
 0xa23   :  { %6505 = vmatpush3.bf16.msra.mxu1 %v6853_v62  ;;  %v6866_v62 = vld [vmem:[%s8876_s2 + $0x158] ss:$12 sps:$4 sm:$0xff]  }
 0xa24   :  { %6506 = vmatprep.subr.bf16.mxu1 %v7133_v54 }
 0xa25   :  { %3895 = vmatpush1.bf16.msra.mxu0 %v8122_v39  ;;  %v6857_v39 = vld [vmem:[%s8876_s2 + $0xe0] ss:$12 sps:$4 sm:$0xff]  }
 0xa26   :  { %3896 = vmatprep.subr.bf16.mxu0 %v8129_v42  ;;  %v6858_v42 = vld [vmem:[%s8876_s2 + $0xc8] ss:$12 sps:$4 sm:$0xff]  }
 0xa27   :  { %6507 = vmatpush3.bf16.msra.mxu1 %v6854_v30  ;;  %v8503_v30 = vld [vmem:[%s8876_s2 + $0x13c] ss:$12 sps:$4 sm:$0xff]  }
 0xa28   :  { %6508 = vmatprep.subr.bf16.mxu1 %v7133_v54 }
 0xa29   :  { %3897 = vmatpush1.bf16.msra.mxu0 %v8134_v50  ;;  %v2803_v50 = vadd.f32 %v8275_v31, %v8310_v37 }
 0xa2a   :  { %3898 = vmatprep.subr.bf16.mxu0 %v8141_v27 }
 0xa2b   :  { %6509 = vmatpush3.bf16.msra.mxu1 %v6855_v34  ;;  %v8509_v34 = vld [vmem:[%s8876_s2 + $0x138] ss:$12 sps:$4 sm:$0xff]  }
 0xa2c   :  { %6510 = vmatprep.subr.bf16.mxu1 %v7133_v54 }
 0xa2d   :  { %3899 = vmatpush1.bf16.msra.mxu0 %v8146_v19 }
 0xa2e   :  { %3900 = vmatprep.subr.bf16.mxu0 %v8151_v55 }
 0xa2f   :  { %6511 = vmatpush3.bf16.msra.mxu1 %v6856_v36  ;;  %v6870_v36 = vld [vmem:[%s8876_s2 + $0x140] ss:$12 sps:$4 sm:$0xff]  }
 0xa30   :  { %6512 = vmatprep.subr.bf16.mxu1 %v7133_v54 }
 0xa31   :  { %3901 = vmatpush1.bf16.msra.mxu0 %v8158_v48 }
 0xa32   :  { %3902 = vmatprep.subr.bf16.mxu0 %v8164_v29 }
 0xa33   :  { %6513 = vmatpush3.bf16.msra.mxu1 %v6857_v39  ;;  %v8519_v39 = vld [vmem:[%s8876_s2 + $0x124] ss:$12 sps:$4 sm:$0xff]  }
 0xa34   :  { %6514 = vmatprep.subr.bf16.mxu1 %v7133_v54 }
 0xa35   :  { %3903 = vmatpush1.bf16.msra.mxu0 %v8173_v56 }
 0xa36   :  { %4156 = vmatprep.subr.bf16.mxu0 %v8472_v2 }
 0xa37   :  { %6515 = vmatpush3.bf16.msra.mxu1 %v6858_v42  ;;  %v8525_v42 = vld [vmem:[%s8876_s2 + $0x120] ss:$12 sps:$4 sm:$0xff]  }
 0xa38   :  { %6520 = vmatprep.subr.bf16.mxu1 %v7133_v54 }
 0xad8   :  { %v3654_v27 = vpop.f32.mrf.mxu0  ;;  %v3695_v19 = vpop.f32.mrf.mxu1 }
 0xad9   :  { %v3701_v55 = vadd.f32 %v3654_v27, %v2803_v50  ;;  %v3715_v43 = vadd.f32 %v8329_v12, %v3695_v19  ;;  %v6874_v50 = vld [vmem:[%s8876_s2 + $0x128] ss:$12 sps:$4 sm:$0xff]   ;;  %v8534_v27 = vld [vmem:[%s8876_s2 + $0x10c] ss:$12 sps:$4 sm:$0xff]  }
 0xada   :  { %v3656_v48 = vpop.f32.mrf.mxu0  ;;  %v6498_v29 = vpop.f32.mrf.mxu1  ;;  %v8540_v19 = vld [vmem:[%s8876_s2 + $0x108] ss:$12 sps:$4 sm:$0xff]  }
 0xadb   :  { %v5743_v56 = vmul.f32 -1.442695, %v3701_v55  ;;  %v3708_v23 = vadd.f32 %v3656_v48, %v2805_v6  ;;  %v6878_v55 = vld [vmem:[%s8876_s2 + $0x110] ss:$12 sps:$4 sm:$0xff]   ;;  %v8550_v48 = vld [vmem:[%s8876_s2 + $0xf4] ss:$12 sps:$4 sm:$0xff]  }
 0xadc   :  { %v3658_v38 = vpop.f32.mrf.mxu0  ;;  %v3698_v3 = vpop.f32.mrf.mxu1  ;;  %v8556_v29 = vld [vmem:[%s8876_s2 + $0xf0] ss:$12 sps:$4 sm:$0xff]   ;;  %v6886_v6 = vld [vmem:[%s8876_s2 + $0xe0] ss:$12 sps:$4 sm:$0xff]  }
 0xadd   :  { %7023 = vpow2.f32 %v5743_v56  ;;  %v5744_v52 = vmul.f32 -1.442695, %v3708_v23  ;;  %v6882_v56 = vld [vmem:[%s8876_s2 + $0xf8] ss:$12 sps:$4 sm:$0xff]   ;;  %v8566_v38 = vld [vmem:[%s8876_s2 + $0xdc] ss:$12 sps:$4 sm:$0xff]  }
 0xade   :  { %v3659_v13 = vpop.f32.mrf.mxu0  ;;  %v6499_v20 = vpop.f32.mrf.mxu1  ;;  %v8572_v3 = vld [vmem:[%s8876_s2 + $0xd8] ss:$12 sps:$4 sm:$0xff]   ;;  %v6890_v23 = vld [vmem:[%s8876_s2 + $0xc8] ss:$12 sps:$4 sm:$0xff]  }
 0xadf   :  { %7025 = vpow2.f32 %v5744_v52  ;;  %v8582_v13 = vld [vmem:[%s8876_s2 + $0xc4] ss:$12 sps:$4 sm:$0xff]   ;;  %v8588_v20 = vld [vmem:[%s8876_s2 + $0xc0] ss:$12 sps:$4 sm:$0xff]   ;;  %v2807_v52 = vadd.f32 %v8279_v33, %v8310_v37 }
 0xaea   :  { %v7024_v8 = vpop.eup %7023 }
 0xaeb   :  { %v3705_v44 = vadd.f32 1.0, %v7024_v8 }
 0xaec   :  { %v7026_v31 = vpop.eup %7025 }
 0xaed   :  { %7027 = vrcp.f32 %v3705_v44  ;;  %v3712_v17 = vadd.f32 1.0, %v7026_v31 }
 0xaef   :  { %7029 = vrcp.f32 %v3712_v17 }
 0xafa   :  { %v7028_v51 = vpop.eup %7027 }
 0xafb   :  { %v3716_v28 = vmul.f32 %v7028_v51, %v3715_v43 }
 0xafc   :  { %v7030_v53 = vpop.eup %7029 }
 0xafd   :  { %v3717_v5 = vadd.f32 %v3716_v28, %v2874_v35  ;;  %v3719_v57 = vsub.f32 1.0, %v7030_v53  ;;  %v3721_v11 = vmul.f32 %v7030_v53, %v8400_v16 }
 0xaff   :  { %7031 = vtanh.f32 %v3717_v5  ;;  %v2809_v5 = vadd.f32 %v8281_v59, %v8323_v7 }
 0xb0c   :  { %v7032_v61 = vpop.eup %7031 }
 0xb0d   :  { %v3720_v58 = vmul.f32 %v7032_v61, %v3719_v57 }
 0xb0f   :  { %v8462_v10 = vadd.f32 %v3721_v11, %v3720_v58 }
 0xb11   :  { %v3727_v14 = vpack.c.bf16 %v8462_v10, %v8462_v10 }
 0xb13   :  { %3921 = vmatmul.mubr.bf16.vlgmr.msra.gmra.mxu0 %v3727_v14  ;;  %6517 = vmatmul.mubr.bf16.vlgmr.msra.gmra.mxu1 %v3727_v14 }
 0xb14   :  { %4188 = vmatprep.mubr.bf16.mxu0 %v7132_v1  ;;  %6536 = vmatprep.mubr.msk.bf16.mxu1 %vm7134_vm0, %v7133_v54 }
 0xb15   :  { %4157 = vmatpush1.bf16.msra.mxu0 %v8477_v9  ;;  %6521 = vmatpush3.bf16.msra.mxu1 %v6862_v18 }
 0xb16   :  { %6522 = vmatprep.subr.bf16.mxu1 %v7133_v54  ;;  %4158 = vmatprep.subr.bf16.mxu0 %v8487_v22 }
 0xb19   :  { %4159 = vmatpush1.bf16.msra.mxu0 %v8493_v26  ;;  %6523 = vmatpush3.bf16.msra.mxu1 %v6866_v62 }
 0xb1a   :  { %6524 = vmatprep.subr.bf16.mxu1 %v7133_v54  ;;  %4160 = vmatprep.subr.bf16.mxu0 %v8503_v30 }
 0xb1d   :  { %4161 = vmatpush1.bf16.msra.mxu0 %v8509_v34  ;;  %6525 = vmatpush3.bf16.msra.mxu1 %v6870_v36 }
 0xb1e   :  { %6526 = vmatprep.subr.bf16.mxu1 %v7133_v54  ;;  %4162 = vmatprep.subr.bf16.mxu0 %v8519_v39 }
 0xb21   :  { %4163 = vmatpush1.bf16.msra.mxu0 %v8525_v42  ;;  %6527 = vmatpush3.bf16.msra.mxu1 %v6874_v50  ;;  %v2877_v50 = vadd.f32 %v8289_v0, %v8334_v60  ;;  %v6891_v0 = vld [vmem:[%s8876_s2 + $0x170] ss:$12 sps:$4 sm:$0xff]  }
 0xb22   :  { %4164 = vmatprep.subr.bf16.mxu0 %v8534_v27  ;;  %6528 = vmatprep.subr.bf16.mxu1 %v7133_v54 }
 0xb25   :  { %4165 = vmatpush1.bf16.msra.mxu0 %v8540_v19  ;;  %6529 = vmatpush3.bf16.msra.mxu1 %v6878_v55 }
 0xb26   :  { %4166 = vmatprep.subr.bf16.mxu0 %v8550_v48  ;;  %6530 = vmatprep.subr.bf16.mxu1 %v7133_v54 }
 0xb29   :  { %4167 = vmatpush1.bf16.msra.mxu0 %v8556_v29  ;;  %6531 = vmatpush3.bf16.msra.mxu1 %v6882_v56 }
 0xb2a   :  { %4168 = vmatprep.subr.bf16.mxu0 %v8566_v38  ;;  %6532 = vmatprep.subr.bf16.mxu1 %v7133_v54 }
 0xb2d   :  { %4169 = vmatpush1.bf16.msra.mxu0 %v8572_v3  ;;  %6533 = vmatpush3.bf16.msra.mxu1 %v6886_v6 }
 0xb2e   :  { %4170 = vmatprep.subr.bf16.mxu0 %v8582_v13  ;;  %6534 = vmatprep.subr.bf16.mxu1 %v7133_v54 }
 0xb31   :  { %4171 = vmatpush1.bf16.msra.mxu0 %v8588_v20  ;;  %6535 = vmatpush3.bf16.msra.mxu1 %v6890_v23 }
 0xb32   :  { %4424 = vmatprep.subr.bf16.mxu0 %v8472_v2  ;;  %6540 = vmatprep.subr.bf16.mxu1 %v7133_v54 }
 0xbd3   :  { %v3922_v8 = vpop.f32.mrf.mxu0  ;;  %v3963_v44 = vpop.f32.mrf.mxu1 }
 0xbd4   :  { %v3969_v31 = vadd.f32 %v3922_v8, %v2807_v52  ;;  %v3983_v62 = vadd.f32 %v8329_v12, %v3963_v44  ;;  %v6892_v44 = vld [vmem:[%s8876_s2 + $0x158] ss:$12 sps:$4 sm:$0xff]  }
 0xbd5   :  { %v3924_v17 = vpop.f32.mrf.mxu0  ;;  %v6518_v43 = vpop.f32.mrf.mxu1 }
 0xbd6   :  { %v5801_v51 = vmul.f32 -1.442695, %v3969_v31  ;;  %v3976_v61 = vadd.f32 %v3924_v17, %v2809_v5  ;;  %v6893_v43 = vld [vmem:[%s8876_s2 + $0x140] ss:$12 sps:$4 sm:$0xff]  }
 0xbd7   :  { %v3926_v35 = vpop.f32.mrf.mxu0  ;;  %v3966_v28 = vpop.f32.mrf.mxu1  ;;  %v6897_v5 = vld [vmem:[%s8876_s2 + $0xe0] ss:$12 sps:$4 sm:$0xff]  }
 0xbd8   :  { %7033 = vpow2.f32 %v5801_v51  ;;  %v5802_v58 = vmul.f32 -1.442695, %v3976_v61  ;;  %v6894_v51 = vld [vmem:[%s8876_s2 + $0x128] ss:$12 sps:$4 sm:$0xff]   ;;  %v6895_v35 = vld [vmem:[%s8876_s2 + $0x110] ss:$12 sps:$4 sm:$0xff]  }
 0xbd9   :  { %v3927_v53 = vpop.f32.mrf.mxu0  ;;  %v6519_v57 = vpop.f32.mrf.mxu1  ;;  %v6896_v28 = vld [vmem:[%s8876_s2 + $0xf8] ss:$12 sps:$4 sm:$0xff]  }
 0xbda   :  { %7035 = vpow2.f32 %v5802_v58  ;;  %v6898_v53 = vld [vmem:[%s8876_s2 + $0xc8] ss:$12 sps:$4 sm:$0xff]   ;;  %v2813_v57 = vadd.f32 %v8285_v46, %v8310_v37 }
 0xbe5   :  { %v7034_v11 = vpop.eup %7033 }
 0xbe6   :  { %v3973_v14 = vadd.f32 1.0, %v7034_v11 }
 0xbe7   :  { %v7036_v33 = vpop.eup %7035 }
 0xbe8   :  { %7037 = vrcp.f32 %v3973_v14  ;;  %v3980_v18 = vadd.f32 1.0, %v7036_v33 }
 0xbea   :  { %7039 = vrcp.f32 %v3980_v18 }
 0xbf5   :  { %v7038_v36 = vpop.eup %7037 }
 0xbf6   :  { %v3984_v55 = vmul.f32 %v7038_v36, %v3983_v62 }
 0xbf7   :  { %v7040_v56 = vpop.eup %7039 }
 0xbf8   :  { %v3985_v59 = vadd.f32 %v3984_v55, %v2877_v50  ;;  %v3987_v6 = vsub.f32 1.0, %v7040_v56  ;;  %v3989_v8 = vmul.f32 %v7040_v56, %v8462_v10  ;;  %v2815_v50 = vadd.f32 %v8287_v15, %v8323_v7 }
 0xbfa   :  { %7041 = vtanh.f32 %v3985_v59 }
 0xc07   :  { %v7042_v23 = vpop.eup %7041 }
 0xc08   :  { %v3988_v52 = vmul.f32 %v7042_v23, %v3987_v6 }
 0xc0a   :  { %v8606_v31 = vadd.f32 %v3989_v8, %v3988_v52 }
 0xc0c   :  { %v3995_v17 = vpack.c.bf16 %v8606_v31, %v8606_v31 }
 0xc0e   :  { %4189 = vmatmul.mubr.bf16.vlgmr.msra.gmra.mxu0 %v3995_v17  ;;  %6537 = vmatmul.mubr.bf16.vlgmr.msra.gmra.mxu1 %v3995_v17 }
 0xc0f   :  { %4425 = vmatpush1.bf16.msra.mxu0 %v8477_v9  ;;  %4456 = vmatprep.mubr.bf16.mxu0 %v7132_v1 }
 0xc10   :  { %4426 = vmatprep.subr.bf16.mxu0 %v8487_v22  ;;  %6556 = vmatprep.mubr.msk.bf16.mxu1 %vm7134_vm0, %v7133_v54 }
 0xc11   :  { %6541 = vmatpush3.bf16.msra.mxu1 %v6891_v0 }
 0xc12   :  { %6542 = vmatprep.subr.bf16.mxu1 %v7133_v54 }
 0xc13   :  { %4427 = vmatpush1.bf16.msra.mxu0 %v8493_v26 }
 0xc14   :  { %4428 = vmatprep.subr.bf16.mxu0 %v8503_v30 }
 0xc15   :  { %6543 = vmatpush3.bf16.msra.mxu1 %v6892_v44  ;;  %v2882_v44 = vadd.f32 %v8306_v4, %v8334_v60  ;;  %v6899_v4 = vld [vmem:[%s8876_s2 + $0x170] ss:$12 sps:$4 sm:$0xff]  }
 0xc16   :  { %6544 = vmatprep.subr.bf16.mxu1 %v7133_v54 }
 0xc17   :  { %4429 = vmatpush1.bf16.msra.mxu0 %v8509_v34 }
 0xc18   :  { %4430 = vmatprep.subr.bf16.mxu0 %v8519_v39 }
 0xc19   :  { %6545 = vmatpush3.bf16.msra.mxu1 %v6893_v43 }
 0xc1a   :  { %6546 = vmatprep.subr.bf16.mxu1 %v7133_v54 }
 0xc1b   :  { %4431 = vmatpush1.bf16.msra.mxu0 %v8525_v42 }
 0xc1c   :  { %4432 = vmatprep.subr.bf16.mxu0 %v8534_v27 }
 0xc1d   :  { %6547 = vmatpush3.bf16.msra.mxu1 %v6894_v51 }
 0xc1e   :  { %6548 = vmatprep.subr.bf16.mxu1 %v7133_v54 }
 0xc1f   :  { %4433 = vmatpush1.bf16.msra.mxu0 %v8540_v19 }
 0xc20   :  { %4434 = vmatprep.subr.bf16.mxu0 %v8550_v48 }
 0xc21   :  { %6549 = vmatpush3.bf16.msra.mxu1 %v6895_v35 }
 0xc22   :  { %6550 = vmatprep.subr.bf16.mxu1 %v7133_v54 }
 0xc23   :  { %4435 = vmatpush1.bf16.msra.mxu0 %v8556_v29 }
 0xc24   :  { %4436 = vmatprep.subr.bf16.mxu0 %v8566_v38 }
 0xc25   :  { %6551 = vmatpush3.bf16.msra.mxu1 %v6896_v28 }
 0xc26   :  { %6552 = vmatprep.subr.bf16.mxu1 %v7133_v54 }
 0xc27   :  { %4437 = vmatpush1.bf16.msra.mxu0 %v8572_v3 }
 0xc28   :  { %4438 = vmatprep.subr.bf16.mxu0 %v8582_v13 }
 0xc29   :  { %6553 = vmatpush3.bf16.msra.mxu1 %v6897_v5 }
 0xc2a   :  { %6554 = vmatprep.subr.bf16.mxu1 %v7133_v54 }
 0xc2b   :  { %4439 = vmatpush1.bf16.msra.mxu0 %v8588_v20 }
 0xc2c   :  { %4692 = vmatprep.subr.bf16.mxu0 %v8472_v2 }
 0xc2d   :  { %6555 = vmatpush3.bf16.msra.mxu1 %v6898_v53 }
 0xc2e   :  { %6560 = vmatprep.subr.bf16.mxu1 %v7133_v54 }
 0xcce   :  { %v4190_v61 = vpop.f32.mrf.mxu0  ;;  %v4231_v58 = vpop.f32.mrf.mxu1 }
 0xccf   :  { %v4237_v11 = vadd.f32 %v4190_v61, %v2813_v57  ;;  %v4251_v17 = vadd.f32 %v8329_v12, %v4231_v58  ;;  %v6900_v58 = vld [vmem:[%s8876_s2 + $0x158] ss:$12 sps:$4 sm:$0xff]  }
 0xcd0   :  { %v4192_v14 = vpop.f32.mrf.mxu0  ;;  %v6538_v33 = vpop.f32.mrf.mxu1 }
 0xcd1   :  { %v5859_v18 = vmul.f32 -1.442695, %v4237_v11  ;;  %v4244_v56 = vadd.f32 %v4192_v14, %v2815_v50  ;;  %v6901_v11 = vld [vmem:[%s8876_s2 + $0x140] ss:$12 sps:$4 sm:$0xff]   ;;  %v6903_v14 = vld [vmem:[%s8876_s2 + $0x110] ss:$12 sps:$4 sm:$0xff]  }
 0xcd2   :  { %v4194_v62 = vpop.f32.mrf.mxu0  ;;  %v4234_v36 = vpop.f32.mrf.mxu1  ;;  %v6904_v33 = vld [vmem:[%s8876_s2 + $0xf8] ss:$12 sps:$4 sm:$0xff]  }
 0xcd3   :  { %7043 = vpow2.f32 %v5859_v18  ;;  %v5860_v6 = vmul.f32 -1.442695, %v4244_v56  ;;  %v6905_v18 = vld [vmem:[%s8876_s2 + $0xe0] ss:$12 sps:$4 sm:$0xff]   ;;  %v6906_v62 = vld [vmem:[%s8876_s2 + $0xc8] ss:$12 sps:$4 sm:$0xff]   ;;  %v2817_v36 = vadd.f32 %v8291_v21, %v8310_v37 }
 0xcd4   :  { %v4195_v55 = vpop.f32.mrf.mxu0  ;;  %v6539_v59 = vpop.f32.mrf.mxu1 }
 0xcd5   :  { %7045 = vpow2.f32 %v5860_v6 }
 0xce0   :  { %v7044_v23 = vpop.eup %7043 }
 0xce1   :  { %v4241_v52 = vadd.f32 1.0, %v7044_v23 }
 0xce2   :  { %v7046_v46 = vpop.eup %7045 }
 0xce3   :  { %7047 = vrcp.f32 %v4241_v52  ;;  %v4248_v8 = vadd.f32 1.0, %v7046_v46 }
 0xce5   :  { %7049 = vrcp.f32 %v4248_v8  ;;  %v2819_v8 = vadd.f32 %v8295_v25, %v8323_v7 }
 0xcf0   :  { %v7048_v0 = vpop.eup %7047 }
 0xcf1   :  { %v4252_v43 = vmul.f32 %v7048_v0, %v4251_v17 }
 0xcf2   :  { %v7050_v51 = vpop.eup %7049 }
 0xcf3   :  { %v4253_v15 = vadd.f32 %v4252_v43, %v2882_v44  ;;  %v4255_v35 = vsub.f32 1.0, %v7050_v51  ;;  %v4257_v53 = vmul.f32 %v7050_v51, %v8606_v31 }
 0xcf5   :  { %7051 = vtanh.f32 %v4253_v15 }
 0xd02   :  { %v7052_v28 = vpop.eup %7051 }
 0xd03   :  { %v4256_v5 = vmul.f32 %v7052_v28, %v4255_v35 }
 0xd05   :  { %v8669_v57 = vadd.f32 %v4257_v53, %v4256_v5  ;;  %v2885_v53 = vadd.f32 %v8318_v47, %v8334_v60  ;;  %v6908_v47 = vld [vmem:[%s8876_s2 + $0x158] ss:$12 sps:$4 sm:$0xff]  }
 0xd07   :  { %v4263_v61 = vpack.c.bf16 %v8669_v57, %v8669_v57 }
 0xd09   :  { %4457 = vmatmul.mubr.bf16.vlgmr.msra.gmra.mxu0 %v4263_v61  ;;  %6557 = vmatmul.mubr.bf16.vlgmr.msra.gmra.mxu1 %v4263_v61 }
 0xd0a   :  { %4693 = vmatpush1.bf16.msra.mxu0 %v8477_v9  ;;  %4724 = vmatprep.mubr.bf16.mxu0 %v7132_v1 }
 0xd0b   :  { %4694 = vmatprep.subr.bf16.mxu0 %v8487_v22  ;;  %6576 = vmatprep.mubr.msk.bf16.mxu1 %vm7134_vm0, %v7133_v54 }
 0xd0c   :  { %6561 = vmatpush3.bf16.msra.mxu1 %v6899_v4 }
 0xd0d   :  { %6562 = vmatprep.subr.bf16.mxu1 %v7133_v54 }
 0xd0e   :  { %4695 = vmatpush1.bf16.msra.mxu0 %v8493_v26 }
 0xd0f   :  { %4696 = vmatprep.subr.bf16.mxu0 %v8503_v30 }
 0xd10   :  { %6563 = vmatpush3.bf16.msra.mxu1 %v6900_v58 }
 0xd11   :  { %6564 = vmatprep.subr.bf16.mxu1 %v7133_v54 }
 0xd12   :  { %4697 = vmatpush1.bf16.msra.mxu0 %v8509_v34 }
 0xd13   :  { %4698 = vmatprep.subr.bf16.mxu0 %v8519_v39 }
 0xd14   :  { %6565 = vmatpush3.bf16.msra.mxu1 %v6901_v11 }
 0xd15   :  { %6566 = vmatprep.subr.bf16.mxu1 %v7133_v54 }
 0xd16   :  { %4699 = vmatpush1.bf16.msra.mxu0 %v8525_v42 }
 0xd17   :  { %4700 = vmatprep.subr.bf16.mxu0 %v8534_v27 }
 0xd1a   :  { %4701 = vmatpush1.bf16.msra.mxu0 %v8540_v19 }
 0xd1b   :  { %4702 = vmatprep.subr.bf16.mxu0 %v8550_v48 }
 0xd1e   :  { %4703 = vmatpush1.bf16.msra.mxu0 %v8556_v29 }
 0xd1f   :  { %4704 = vmatprep.subr.bf16.mxu0 %v8566_v38 }
 0xd22   :  { %4705 = vmatpush1.bf16.msra.mxu0 %v8572_v3 }
 0xd23   :  { %4706 = vmatprep.subr.bf16.mxu0 %v8582_v13 }
 0xd26   :  { %4707 = vmatpush1.bf16.msra.mxu0 %v8588_v20 }
 0xd27   :  { %4960 = vmatprep.subr.bf16.mxu0 %v8472_v2  ;;  %v6902_v2 = vld [vmem:[%s8876_s2 + $0x128] ss:$12 sps:$4 sm:$0xff]  }
 0xd28   :  { %6567 = vmatpush3.bf16.msra.mxu1 %v6902_v2 }
 0xd29   :  { %6568 = vmatprep.subr.bf16.mxu1 %v7133_v54 }
 0xd2c   :  { %6569 = vmatpush3.bf16.msra.mxu1 %v6903_v14 }
 0xd2d   :  { %6570 = vmatprep.subr.bf16.mxu1 %v7133_v54 }
 0xd30   :  { %6571 = vmatpush3.bf16.msra.mxu1 %v6904_v33 }
 0xd31   :  { %6572 = vmatprep.subr.bf16.mxu1 %v7133_v54 }
 0xd34   :  { %6573 = vmatpush3.bf16.msra.mxu1 %v6905_v18 }
 0xd35   :  { %6574 = vmatprep.subr.bf16.mxu1 %v7133_v54 }
 0xd38   :  { %6575 = vmatpush3.bf16.msra.mxu1 %v6906_v62 }
 0xd39   :  { %6580 = vmatprep.subr.bf16.mxu1 %v7133_v54 }
 0xdc9   :  { %v4458_v50 = vpop.f32.mrf.mxu0  ;;  %v4499_v55 = vpop.f32.mrf.mxu1 }
 0xdca   :  { %v4505_v59 = vadd.f32 %v4458_v50, %v2817_v36  ;;  %v4519_v28 = vadd.f32 %v8329_v12, %v4499_v55  ;;  %v2825_v36 = vadd.f32 %v8304_v63, %v8323_v7 }
 0xdcb   :  { %v4460_v56 = vpop.f32.mrf.mxu0  ;;  %v6558_v6 = vpop.f32.mrf.mxu1 }
 0xdcc   :  { %v5917_v23 = vmul.f32 -1.442695, %v4505_v59  ;;  %v4512_v44 = vadd.f32 %v4460_v56, %v2819_v8  ;;  %v2890_v8 = vadd.f32 %v8302_v41, %v8334_v60  ;;  %v5072_v41 = vpack.c.bf16 %v8400_v16, %v8337_v24  ;;  %v6919_v24 = vld [vmem:[%s8880_s5 + $0x18] sm:$0xff]   ;;  %v6920_v16 = vld [vmem:[%s8880_s5 + $0x10] sm:$0xff]  }
 0xdcd   :  { %v4462_v52 = vpop.f32.mrf.mxu0  ;;  %v4502_v46 = vpop.f32.mrf.mxu1 }
 0xdce   :  { %7053 = vpow2.f32 %v5917_v23  ;;  %v5918_v43 = vmul.f32 -1.442695, %v4512_v44 }
 0xdcf   :  { %v4463_v17 = vpop.f32.mrf.mxu0  ;;  %v6559_v0 = vpop.f32.mrf.mxu1 }
 0xdd0   :  { %7055 = vpow2.f32 %v5918_v43 }
 0xddb   :  { %v7054_v15 = vpop.eup %7053 }
 0xddc   :  { %v4509_v51 = vadd.f32 1.0, %v7054_v15 }
 0xddd   :  { %v7056_v21 = vpop.eup %7055 }
 0xdde   :  { %7057 = vrcp.f32 %v4509_v51  ;;  %v4516_v35 = vadd.f32 1.0, %v7056_v21 }
 0xde0   :  { %7059 = vrcp.f32 %v4516_v35 }
 0xdeb   :  { %v7058_v5 = vpop.eup %7057 }
 0xdec   :  { %v4520_v61 = vmul.f32 %v7058_v5, %v4519_v28  ;;  %v6917_v28 = vld [vmem:[%s8880_s5 + $0x28] sm:$0xff]   ;;  %v6918_v5 = vld [vmem:[%s8880_s5 + $0x20] sm:$0xff]  }
 0xded   :  { %v7060_v4 = vpop.eup %7059 }
 0xdee   :  { %v4521_v25 = vadd.f32 %v4520_v61, %v2885_v53  ;;  %v4523_v58 = vsub.f32 1.0, %v7060_v4  ;;  %v4525_v14 = vmul.f32 %v7060_v4, %v8669_v57  ;;  %v6921_v53 = vld [vmem:[%s8880_s5 + $0x8] sm:$0xff]   ;;  %v6922_v61 = vld [vmem:[%s8880_s5] sm:$0xff]  }
 0xdf0   :  { %7061 = vtanh.f32 %v4521_v25  ;;  %v5073_v25 = vpack.c.bf16 %v8606_v31, %v8462_v10 }
 0xdfd   :  { %v7062_v11 = vpop.eup %7061 }
 0xdfe   :  { %v4524_v2 = vmul.f32 %v7062_v11, %v4523_v58  ;;  %v2827_v58 = vadd.f32 %v8312_v49, %v8310_v37  ;;  %v8834_v49 = vld [vmem:[%s8881_s6] ss:$0 sm:$0xff] }
 0xe00   :  { %v8732_v33 = vadd.f32 %v4525_v14, %v4524_v2 }
 0xe02   :  { %v4531_v18 = vpack.c.bf16 %v8732_v33, %v8732_v33  ;;  %v5074_v4 = vpack.c.bf16 %v8732_v33, %v8669_v57 }
 0xe04   :  { %4725 = vmatmul.mubr.bf16.vlgmr.msra.gmra.mxu0 %v4531_v18  ;;  %6577 = vmatmul.mubr.bf16.vlgmr.msra.gmra.mxu1 %v4531_v18 }
 0xe05   :  { %4961 = vmatpush1.bf16.msra.mxu0 %v8477_v9  ;;  %4992 = vmatprep.mubr.bf16.mxu0 %v7132_v1  ;;  %v6907_v1 = vld [vmem:[%s8876_s2 + $0x170] ss:$12 sps:$4 sm:$0xff]   ;;  %v6909_v9 = vld [vmem:[%s8876_s2 + $0x140] ss:$12 sps:$4 sm:$0xff]  }
 0xe06   :  { %4962 = vmatprep.subr.bf16.mxu0 %v8487_v22  ;;  %6596 = vmatprep.mubr.msk.bf16.mxu1 %vm7134_vm0, %v7133_v54  ;;  %v6910_v22 = vld [vmem:[%s8876_s2 + $0x128] ss:$12 sps:$4 sm:$0xff]  }
 0xe07   :  { %6581 = vmatpush3.bf16.msra.mxu1 %v6907_v1 }
 0xe08   :  { %6582 = vmatprep.subr.bf16.mxu1 %v7133_v54 }
 0xe09   :  { %4963 = vmatpush1.bf16.msra.mxu0 %v8493_v26  ;;  %v6911_v26 = vld [vmem:[%s8876_s2 + $0x110] ss:$12 sps:$4 sm:$0xff]  }
 0xe0a   :  { %4964 = vmatprep.subr.bf16.mxu0 %v8503_v30  ;;  %v6915_v30 = vld [vmem:[%s8880_s5 + $0x38] sm:$0xff]  }
 0xe0b   :  { %6583 = vmatpush3.bf16.msra.mxu1 %v6908_v47 }
 0xe0c   :  { %6584 = vmatprep.subr.bf16.mxu1 %v7133_v54 }
 0xe0d   :  { %4965 = vmatpush1.bf16.msra.mxu0 %v8509_v34  ;;  %v6912_v34 = vld [vmem:[%s8876_s2 + $0xf8] ss:$12 sps:$4 sm:$0xff]  }
 0xe0e   :  { %4966 = vmatprep.subr.bf16.mxu0 %v8519_v39  ;;  %v6913_v39 = vld [vmem:[%s8876_s2 + $0xe0] ss:$12 sps:$4 sm:$0xff]  }
 0xe0f   :  { %6585 = vmatpush3.bf16.msra.mxu1 %v6909_v9 }
 0xe10   :  { %6586 = vmatprep.subr.bf16.mxu1 %v7133_v54 }
 0xe11   :  { %4967 = vmatpush1.bf16.msra.mxu0 %v8525_v42  ;;  %v6914_v42 = vld [vmem:[%s8876_s2 + $0xc8] ss:$12 sps:$4 sm:$0xff]  }
 0xe12   :  { %4968 = vmatprep.subr.bf16.mxu0 %v8534_v27  ;;  %v2823_v27 = vadd.f32 %v8300_v32, %v8310_v37 }
 0xe13   :  { %6587 = vmatpush3.bf16.msra.mxu1 %v6910_v22 }
 0xe14   :  { %6588 = vmatprep.subr.bf16.mxu1 %v7133_v54 }
 0xe15   :  { %4969 = vmatpush1.bf16.msra.mxu0 %v8540_v19 }
 0xe16   :  { %4970 = vmatprep.subr.bf16.mxu0 %v8550_v48 }
 0xe17   :  { %6589 = vmatpush3.bf16.msra.mxu1 %v6911_v26  ;;  %v2829_v26 = vadd.f32 %v8316_v40, %v8323_v7  ;;  %v7131_v40 = vld [vmem:[%s8879_s4 + $0x1] ss:$0 sm:$0xff] }
 0xe18   :  { %6590 = vmatprep.subr.bf16.mxu1 %v7133_v54 }
 0xe19   :  { %4971 = vmatpush1.bf16.msra.mxu0 %v8556_v29 }
 0xe1a   :  { %4972 = vmatprep.subr.bf16.mxu0 %v8566_v38 }
 0xe1b   :  { %6591 = vmatpush3.bf16.msra.mxu1 %v6912_v34 }
 0xe1c   :  { %6592 = vmatprep.subr.bf16.mxu1 %v7133_v54 }
 0xe1d   :  { %4973 = vmatpush1.bf16.msra.mxu0 %v8572_v3 }
 0xe1e   :  { %4974 = vmatprep.subr.bf16.mxu0 %v8582_v13 }
 0xe1f   :  { %6593 = vmatpush3.bf16.msra.mxu1 %v6913_v39 }
 0xe20   :  { %6594 = vmatprep.subr.bf16.mxu1 %v7133_v54 }
 0xe21   :  { %4975 = vmatpush1.bf16.msra.mxu0 %v8588_v20 }
 0xe22   :  { %6600 = vmatprep.subr.bf16.mxu0 %v6915_v30 }
 0xe23   :  { %6595 = vmatpush3.bf16.msra.mxu1 %v6914_v42 }
 0xec4   :  { %v4726_v19 = vpop.f32.mrf.mxu0  ;;  %v4767_v48 = vpop.f32.mrf.mxu1 }
 0xec5   :  { %v4773_v29 = vadd.f32 %v4726_v19, %v2823_v27  ;;  %v4787_v52 = vadd.f32 %v8329_v12, %v4767_v48  ;;  %v6916_v12 = vld [vmem:[%s8880_s5 + $0x30] sm:$0xff]   ;;  %v2893_v48 = vadd.f32 %v8314_v45, %v8334_v60 }
 0xec6   :  { %v4728_v38 = vpop.f32.mrf.mxu0  ;;  %v6578_v3 = vpop.f32.mrf.mxu1 }
 0xec7   :  { %v5975_v13 = vmul.f32 -1.442695, %v4773_v29  ;;  %v4780_v59 = vadd.f32 %v4728_v38, %v2825_v36 }
 0xec8   :  { %v4730_v20 = vpop.f32.mrf.mxu0  ;;  %v4770_v62 = vpop.f32.mrf.mxu1 }
 0xec9   :  { %7063 = vpow2.f32 %v5975_v13  ;;  %v5976_v54 = vmul.f32 -1.442695, %v4780_v59 }
 0xeca   :  { %v4731_v50 = vpop.f32.mrf.mxu0  ;;  %v6579_v55 = vpop.f32.mrf.mxu1 }
 0xecb   :  { %7065 = vpow2.f32 %v5976_v54 }
 0xed6   :  { %v7064_v56 = vpop.eup %7063 }
 0xed7   :  { %v4777_v6 = vadd.f32 1.0, %v7064_v56 }
 0xed8   :  { %v7066_v32 = vpop.eup %7065 }
 0xed9   :  { %7067 = vrcp.f32 %v4777_v6  ;;  %v4784_v23 = vadd.f32 1.0, %v7066_v32 }
 0xedb   :  { %7069 = vrcp.f32 %v4784_v23 }
 0xee6   :  { %v7068_v46 = vpop.eup %7067 }
 0xee7   :  { %v4788_v17 = vmul.f32 %v7068_v46, %v4787_v52 }
 0xee8   :  { %v7070_v0 = vpop.eup %7069 }
 0xee9   :  { %v4789_v63 = vadd.f32 %v4788_v17, %v2890_v8  ;;  %v4791_v44 = vsub.f32 1.0, %v7070_v0  ;;  %v4793_v51 = vmul.f32 %v7070_v0, %v8732_v33 }
 0xeeb   :  { %7071 = vtanh.f32 %v4789_v63 }
 0xef8   :  { %v7072_v43 = vpop.eup %7071 }
 0xef9   :  { %v4792_v15 = vmul.f32 %v7072_v43, %v4791_v44 }
 0xefb   :  { %v8796_v21 = vadd.f32 %v4793_v51, %v4792_v15 }
 0xefd   :  { %v4799_v35 = vpack.c.bf16 %v8796_v21, %v8796_v21 }
 0xeff   :  { %4993 = vmatmul.mubr.bf16.vlgmr.msra.gmra.mxu0 %v4799_v35  ;;  %6597 = vmatmul.mubr.bf16.vlgmr.msra.gmra.mxu1 %v4799_v35 }
 0xf00   :  { %6601 = vmatpush3.bf16.msra.mxu0 %v6915_v30  ;;  %6616 = vmatprep.mubr.bf16.mxu0 %v5072_v41 }
 0xf01   :  { %6602 = vmatprep.subr.bf16.mxu0 %v6916_v12 }
 0xf04   :  { %6603 = vmatpush3.bf16.msra.mxu0 %v6916_v12 }
 0xf05   :  { %6604 = vmatprep.subr.bf16.mxu0 %v6917_v28 }
 0xf08   :  { %6605 = vmatpush3.bf16.msra.mxu0 %v6917_v28 }
 0xf09   :  { %6606 = vmatprep.subr.bf16.mxu0 %v6918_v5 }
 0xf0c   :  { %6607 = vmatpush3.bf16.msra.mxu0 %v6918_v5 }
 0xf0d   :  { %6608 = vmatprep.subr.bf16.mxu0 %v6919_v24 }
 0xf10   :  { %6609 = vmatpush3.bf16.msra.mxu0 %v6919_v24 }
 0xf11   :  { %6610 = vmatprep.subr.bf16.mxu0 %v6920_v16 }
 0xf14   :  { %6611 = vmatpush3.bf16.msra.mxu0 %v6920_v16 }
 0xf15   :  { %6612 = vmatprep.subr.bf16.mxu0 %v6921_v53 }
 0xf18   :  { %6613 = vmatpush3.bf16.msra.mxu0 %v6921_v53 }
 0xf19   :  { %6614 = vmatprep.subr.bf16.mxu0 %v6922_v61 }
 0xf1c   :  { %6615 = vmatpush3.bf16.msra.mxu0 %v6922_v61 }
 0xf1f   :  { %6617 = vmatmul.mubr.bf16.vlgmr.msra.gmra.mxu0 %v5073_v25 }
 0xf20   :  { %6620 = vmatprep.mubr.bf16.mxu0 %v5074_v4 }
 0xfbf   :  { %v4994_v11 = vpop.f32.mrf.mxu0  ;;  %v5035_v2 = vpop.f32.mrf.mxu1 }
 0xfc0   :  { %v5041_v14 = vadd.f32 %v4994_v11, %v2827_v58  ;;  %v5055_v7 = vadd.f32 %v7131_v40, %v5035_v2 }
 0xfc1   :  { %v4996_v18 = vpop.f32.mrf.mxu0  ;;  %v6598_v1 = vpop.f32.mrf.mxu1 }
 0xfc2   :  { %v6033_v47 = vmul.f32 -1.442695, %v5041_v14  ;;  %v5048_v57 = vadd.f32 %v4996_v18, %v2829_v26 }
 0xfc3   :  { %v4998_v9 = vpop.f32.mrf.mxu0  ;;  %v5038_v22 = vpop.f32.mrf.mxu1 }
 0xfc4   :  { %7073 = vpow2.f32 %v6033_v47  ;;  %v6034_v33 = vmul.f32 -1.442695, %v5048_v57 }
 0xfc5   :  { %v4999_v10 = vpop.f32.mrf.mxu0  ;;  %v6599_v31 = vpop.f32.mrf.mxu1 }
 0xfc6   :  { %7075 = vpow2.f32 %v6034_v33 }
 0xfd1   :  { %v7074_v30 = vpop.eup %7073 }
 0xfd2   :  { %v5045_v34 = vadd.f32 1.0, %v7074_v30 }
 0xfd3   :  { %v7076_v37 = vpop.eup %7075 }
 0xfd4   :  { %7077 = vrcp.f32 %v5045_v34  ;;  %v5052_v39 = vadd.f32 1.0, %v7076_v37 }
 0xfd6   :  { %7079 = vrcp.f32 %v5052_v39 }
 0xfdf   :  { %v6618_v42 = vpop.f32.mrf.mxu0 }
 0xfe0   :  { %v5190_v27 = vadd.f32 %v6618_v42, %v8834_v49 }
 0xfe1   :  { %v7078_v19 = vpop.eup %7077  ;;  %v5181_v29 = vpop.f32.mrf.mxu0 }
 0xfe2   :  { %v5056_v38 = vmul.f32 %v7078_v19, %v5055_v7  ;;  %v6046_v3 = vmul.f32 -1.442695, %v5190_v27  ;;  %v5182_v13 = vadd.f32 %v8834_v49, %v5181_v29 }
 0xfe3   :  { %v6619_v20 = vpop.f32.mrf.mxu0  ;;  %v7080_v60 = vpop.eup %7079 }
 0xfe4   :  { %v5057_v62 = vadd.f32 %v5056_v38, %v2893_v48  ;;  %7081 = vpow2.f32 %v6046_v3  ;;  %v6044_v36 = vmul.f32 -1.442695, %v5182_v13  ;;  %v5193_v50 = vadd.f32 %v6619_v20, %v8834_v49 }
 0xfe5   :  { %v5184_v55 = vpop.f32.mrf.mxu0  ;;  %v5059_v32 = vsub.f32 1.0, %v7080_v60  ;;  %v5061_v8 = vmul.f32 %v7080_v60, %v8796_v21 }
 0xfe6   :  { %7083 = vtanh.f32 %v5057_v62  ;;  %v6047_v59 = vmul.f32 -1.442695, %v5193_v50  ;;  %v5185_v54 = vadd.f32 %v8834_v49, %v5184_v55 }
 0xfe7   :  { %7085 = vpow2.f32 %v6044_v36 }
 0xfe8   :  { %7087 = vpow2.f32 %v6047_v59  ;;  %v6045_v45 = vmul.f32 -1.442695, %v5185_v54 }
 0xfea   :  { %7089 = vpow2.f32 %v6045_v45 }
 0xff1   :  { %v7082_v56 = vpop.eup %7081 }
 0xff2   :  { %v5238_v6 = vadd.f32 1.0, %v7082_v56 }
 0xff3   :  { %v7084_v23 = vpop.eup %7083 }
 0xff4   :  { %v7086_v52 = vpop.eup %7085  ;;  %7091 = vrcp.f32 %v5238_v6  ;;  %v5060_v46 = vmul.f32 %v7084_v23, %v5059_v32 }
 0xff5   :  { %v7088_v17 = vpop.eup %7087  ;;  %v5236_v63 = vadd.f32 1.0, %v7086_v52 }
 0xff6   :  { %v5239_v0 = vadd.f32 1.0, %v7088_v17  ;;  %v5062_v44 = vadd.f32 %v5061_v8, %v5060_v46 }
 0xff7   :  { %v7090_v43 = vpop.eup %7089  ;;  %7093 = vrcp.f32 %v5236_v63 }
 0xff8   :  { %7095 = vrcp.f32 %v5239_v0  ;;  %v5237_v15 = vadd.f32 1.0, %v7090_v43  ;;  %v5075_v51 = vpack.c.bf16 %v5062_v44, %v8796_v21 }
 0xffa   :  { %7097 = vrcp.f32 %v5237_v15  ;;  %6621 = vmatmul.mubr.bf16.gmra.mxu0 %v5075_v51 }
0x1001   :  { %v7092_v35 = vpop.eup %7091 }
0x1002   :  { %5262 = vst [vmem:[%s8882_s7 + $0x10] sm:$0xff] %v7092_v35 }
0x1004   :  { %v7094_v12 = vpop.eup %7093 }
0x1005   :  { %v7096_v41 = vpop.eup %7095  ;;  %5260 = vst [vmem:[%s8882_s7] sm:$0xff] %v7094_v12 }
0x1006   :  { %5263 = vst [vmem:[%s8882_s7 + $0x18] sm:$0xff] %v7096_v41 }
0x1007   :  { %v7098_v28 = vpop.eup %7097 }
0x1008   :  { %5261 = vst [vmem:[%s8882_s7 + $0x8] sm:$0xff] %v7098_v28 }
0x10ba   :  { %v6622_v21 = vpop.f32.mrf.mxu0 }
0x10bb   :  { %v5206_v5 = vadd.f32 %v6622_v21, %v8834_v49 }
0x10bc   :  { %v5197_v24 = vpop.f32.mrf.mxu0 }
0x10bd   :  { %v6050_v16 = vmul.f32 -1.442695, %v5206_v5  ;;  %v5198_v53 = vadd.f32 %v8834_v49, %v5197_v24 }
0x10be   :  { %v6623_v61 = vpop.f32.mrf.mxu0 }
0x10bf   :  { %7099 = vpow2.f32 %v6050_v16  ;;  %v6048_v25 = vmul.f32 -1.442695, %v5198_v53  ;;  %v5209_v4 = vadd.f32 %v6623_v61, %v8834_v49 }
0x10c0   :  { %v5200_v58 = vpop.f32.mrf.mxu0 }
0x10c1   :  { %7101 = vpow2.f32 %v6048_v25  ;;  %v6051_v11 = vmul.f32 -1.442695, %v5209_v4  ;;  %v5201_v2 = vadd.f32 %v8834_v49, %v5200_v58 }
0x10c3   :  { %7103 = vpow2.f32 %v6051_v11  ;;  %v6049_v14 = vmul.f32 -1.442695, %v5201_v2 }
0x10c5   :  { %7105 = vpow2.f32 %v6049_v14 }
0x10cc   :  { %v7100_v18 = vpop.eup %7099 }
0x10cd   :  { %v5242_v1 = vadd.f32 1.0, %v7100_v18 }
0x10ce   :  { %v7102_v47 = vpop.eup %7101 }
0x10cf   :  { %7107 = vrcp.f32 %v5242_v1  ;;  %v5240_v9 = vadd.f32 1.0, %v7102_v47 }
0x10d0   :  { %v7104_v22 = vpop.eup %7103 }
0x10d1   :  { %7109 = vrcp.f32 %v5240_v9  ;;  %v5243_v26 = vadd.f32 1.0, %v7104_v22 }
0x10d2   :  { %v7106_v10 = vpop.eup %7105 }
0x10d3   :  { %7111 = vrcp.f32 %v5243_v26  ;;  %v5241_v31 = vadd.f32 1.0, %v7106_v10 }
0x10d5   :  { %7113 = vrcp.f32 %v5241_v31 }
0x10dc   :  { %v7108_v57 = vpop.eup %7107 }
0x10dd   :  { %5266 = vst [vmem:[%s8882_s7 + $0x30] sm:$0xff] %v7108_v57 }
0x10de   :  { %v7110_v33 = vpop.eup %7109 }
0x10df   :  { %5264 = vst [vmem:[%s8882_s7 + $0x20] sm:$0xff] %v7110_v33 }
0x10e0   :  { %v7112_v30 = vpop.eup %7111 }
0x10e1   :  { %5267 = vst [vmem:[%s8882_s7 + $0x38] sm:$0xff] %v7112_v30 }
0x10e2   :  { %v7114_v34 = vpop.eup %7113 }
0x10e3   :  { %5265 = vst [vmem:[%s8882_s7 + $0x28] sm:$0xff] %v7114_v34 }

</bundles_post_ra>
